<compile_context>
chip_gen: v7x
topology: tpu7x:2x2x1
jax: 0.10.0
libtpu: 0.0.40
codegen_flags: <defaults>
</compile_context>

<pallas_src>
import functools

import jax
import jax.numpy as jnp
import numpy as np
from jax.experimental import pallas as pl
from jax.experimental.pallas import tpu as pltpu


# ----------------------------------------------------------------------------
# Fused decoder kernel: the whole answer-synthesis loop in one pallas_call.
# ----------------------------------------------------------------------------
def _decoder_kernel(hq_ref, hp_ref, ans_ref,
                    wdT_ref, bd_ref, waT_ref, uaT_ref, vT_ref,
                    wih_wT_ref, wih_cT_ref, whhT_ref, bih_ref, bhh_ref,
                    wrT_ref, urT_ref, vrT_ref, woT_ref,
                    probs_ref):
    f32 = jnp.float32
    D = hq_ref.shape[1]        # 2 * hidden_dim
    H = D // 2                 # hidden_dim
    G = whhT_ref.shape[0]      # 4 * hidden_dim  (GRU hidden size, = 128 -> lane aligned)
    T = ans_ref.shape[0]       # ans_len (static)

    def softmax(x, axis):
        m = jnp.max(x, axis=axis, keepdims=True)
        e = jnp.exp(x - m)
        return e / jnp.sum(e, axis=axis, keepdims=True)

    # ---- step-invariant work, hoisted out of the recurrence -----------------
    h = (jnp.sum(hq_ref[...], axis=0, keepdims=True) +
         jnp.sum(hp_ref[...], axis=0, keepdims=True))                          # (1, D)
    uah = jnp.dot(h, uaT_ref[...], preferred_element_type=f32)                 # (1, D)

    ans = ans_ref[...]                                                         # (T, E)
    # GRU input projection of the w-part of x_t = [w_t, c_t]  (one big matmul)
    gxw = jnp.dot(ans, wih_wT_ref[...], preferred_element_type=f32) + bih_ref[...]   # (T, 3G)
    # W_r(w_t) for all t (one big matmul)
    wr_all = jnp.dot(ans, wrT_ref[...], preferred_element_type=f32)            # (T, D)

    # d0 = tanh(W_d @ stack([h_q[0], h_p[0]]) + b_d)
    d0 = jnp.tanh(
        jnp.dot(jnp.concatenate([hq_ref[0:1, :], hp_ref[0:1, :]], axis=0),
                wdT_ref[...], preferred_element_type=f32) + bd_ref[...])       # (2, D)
    d4 = jnp.concatenate([d0[0:1, :], d0[1:2, :]], axis=1)                     # (1, G) flattened hidden

    wa = waT_ref[...]
    vt = vT_ref[...]
    wihc = wih_cT_ref[...]
    whh = whhT_ref[...]
    bhh = bhh_ref[...]
    ur = urT_ref[...]
    vr = vrT_ref[...]
    wo = woT_ref[...]

    # ---- serial decode loop (T is small & static -> fully unrolled) ---------
    for t in range(T):
        # two-row view of the hidden state (== d.reshape(2, -1) in PyTorch)
        d2 = jnp.concatenate([d4[:, :D], d4[:, D:]], axis=0)                   # (2, D)

        # attention pooling over the two rows of d
        s = jnp.dot(jnp.tanh(jnp.dot(d2, wa, preferred_element_type=f32) + uah),
                    vt, preferred_element_type=f32)                            # (2, 1)
        a = softmax(s, axis=0)                                                 # (2, 1)
        c = jnp.sum(a * d2, axis=0, keepdims=True)                             # (1, D)

        # one GRU step: input = [w_t, c], hidden = d (flattened)
        gx = gxw[t:t + 1, :] + jnp.dot(c, wihc, preferred_element_type=f32)    # (1, 3G)
        gh = jnp.dot(d4, whh, preferred_element_type=f32) + bhh                # (1, 3G)
        r = jax.nn.sigmoid(gx[:, :G] + gh[:, :G])
        z = jax.nn.sigmoid(gx[:, G:2 * G] + gh[:, G:2 * G])
        n = jnp.tanh(gx[:, 2 * G:] + r * gh[:, 2 * G:])
        h_new = (1.0 - z) * n + z * d4                                         # (1, G)

        # readout: r_t = W_r w + U_r c + V_r d ; maxout ; vocab softmax
        r_t = (wr_all[t:t + 1, :]
               + jnp.dot(c, ur, preferred_element_type=f32)
               + jnp.dot(h_new, vr, preferred_element_type=f32))               # (1, D)
        r_t = jnp.maximum(r_t[:, :H], r_t[:, H:])                              # (1, H)  maxout
        logits = jnp.dot(r_t, wo, preferred_element_type=f32)                  # (1, V)
        probs_ref[t:t + 1, :] = softmax(logits, axis=-1)

        d4 = h_new


# ----------------------------------------------------------------------------
# Wrapper: single pallas_call, everything lives in VMEM (working set << 1 MiB).
# ----------------------------------------------------------------------------
def prepare_params(p):
    """Pre-transpose / split PyTorch-layout weights once (stable DMA layout)."""
    E = p["w_r_w"].shape[1]   # embedding_dim (== 2*hidden_dim)
    f32 = jnp.float32
    return dict(
        wdT=p["w_d_w"].T.astype(f32), bd=p["w_d_b"].reshape(1, -1).astype(f32),
        waT=p["w_a_w"].T.astype(f32), uaT=p["u_a_w"].T.astype(f32),
        vT=p["v_w"].T.astype(f32),
        wih_wT=p["w_ih"][:, :E].T.astype(f32),     # (E, 3G)   acts on w_t
        wih_cT=p["w_ih"][:, E:].T.astype(f32),     # (2H, 3G)  acts on c_t
        whhT=p["w_hh"].T.astype(f32),
        bih=p["b_ih"].reshape(1, -1).astype(f32),
        bhh=p["b_hh"].reshape(1, -1).astype(f32),
        wrT=p["w_r_w"].T.astype(f32), urT=p["u_r_w"].T.astype(f32),
        vrT=p["v_r_w"].T.astype(f32), woT=p["w_o_w"].T.astype(f32),
    )


def answer_synthesis_forward(h_q, h_p, ans_embeds, prep):
    T = ans_embeds.shape[0]
    V = prep["woT"].shape[1]
    vmem = pl.BlockSpec(memory_space=pltpu.MemorySpace.VMEM)
    args = (h_q.astype(jnp.float32), h_p.astype(jnp.float32),
            ans_embeds.astype(jnp.float32),
            prep["wdT"], prep["bd"], prep["waT"], prep["uaT"], prep["vT"],
            prep["wih_wT"], prep["wih_cT"], prep["whhT"], prep["bih"], prep["bhh"],
            prep["wrT"], prep["urT"], prep["vrT"], prep["woT"])
    probs = pl.pallas_call(
        _decoder_kernel,
        out_shape=jax.ShapeDtypeStruct((T, V), jnp.float32),
        in_specs=[vmem] * len(args),
        out_specs=vmem,
    )(*args)
    return probs   # (ans_len, vocab_size); PyTorch returns the same rows as a list


# ----------------------------------------------------------------------------
# Pure-JAX reference (direct transliteration of the PyTorch forward).
# ----------------------------------------------------------------------------
def _forward_ref(h_q, h_p, ans_embeds, p):
    D = h_q.shape[1]           # 2H
    G = 2 * D                  # 4H
    T = ans_embeds.shape[0]
    h = jnp.concatenate([h_q, h_p], axis=0).sum(axis=0)                        # (D,)
    d = jnp.tanh(jnp.stack([h_q[0], h_p[0]]) @ p["w_d_w"].T + p["w_d_b"])      # (2, D)
    probs = []
    for i in range(T):
        w = ans_embeds[i]
        s = jnp.tanh(d @ p["w_a_w"].T + p["u_a_w"] @ h) @ p["v_w"].T           # (2, 1)
        a = jax.nn.softmax(s[:, 0], axis=0)                                    # (2,)
        c = (a[:, None] * d).sum(axis=0)                                       # (D,)
        x = jnp.concatenate([w, c])                                            # (2D,)
        hprev = d.reshape(-1)                                                  # (G,)
        gx = p["w_ih"] @ x + p["b_ih"]
        gh = p["w_hh"] @ hprev + p["b_hh"]
        r = jax.nn.sigmoid(gx[:G] + gh[:G])
        z = jax.nn.sigmoid(gx[G:2 * G] + gh[G:2 * G])
        n = jnp.tanh(gx[2 * G:] + r * gh[2 * G:])
        hnew = (1.0 - z) * n + z * hprev                                       # (G,)
        d = hnew.reshape(2, D)
        r_t = p["w_r_w"] @ w + p["u_r_w"] @ c + p["v_r_w"] @ hnew              # (D,)
        r_t = r_t.reshape(2, -1).max(axis=0)                                   # (H,)
        probs.append(jax.nn.softmax(p["w_o_w"] @ r_t, axis=0))                 # (V,)
    return jnp.stack(probs)


# ----------------------------------------------------------------------------
# Deterministic parameter init (PyTorch-style U(-1/sqrt(fan_in), 1/sqrt(fan_in))).
# ----------------------------------------------------------------------------
def init_params(key, vocab_size, embedding_dim, hidden_dim):
    D = 2 * hidden_dim
    G = 2 * D
    # torch.stack([w, c]) in the reference module requires embedding_dim == 2*hidden_dim
    assert embedding_dim == D
    ks = jax.random.split(key, 13)

    def u(k, shape, fan_in):
        b = 1.0 / np.sqrt(fan_in)
        return jax.random.uniform(k, shape, jnp.float32, -b, b)

    return dict(
        v_w=u(ks[0], (1, D), D),
        w_d_w=u(ks[1], (D, D), D), w_d_b=u(ks[2], (D,), D),
        w_a_w=u(ks[3], (D, D), D),
        u_a_w=u(ks[4], (D, D), D),
        w_ih=u(ks[5], (3 * G, embedding_dim + D), G),
        w_hh=u(ks[6], (3 * G, G), G),
        b_ih=u(ks[7], (3 * G,), G),
        b_hh=u(ks[8], (3 * G,), G),
        w_r_w=u(ks[9], (D, embedding_dim), embedding_dim),
        u_r_w=u(ks[10], (D, D), D),
        v_r_w=u(ks[11], (D, G), G),
        w_o_w=u(ks[12], (vocab_size, hidden_dim), hidden_dim),
    )


if __name__ == "__main__":
    key = jax.random.PRNGKey(0)
    k_p, k_q, k_hp, k_a = jax.random.split(key, 4)

    HIDDEN_DIM = 32
    EMBEDDING_DIM = 2 * HIDDEN_DIM        # 64, required by the reference module
    VOCAB_SIZE = 256                      # lane-dense output (multiple of 128)
    M, N, ANS_LEN = 6, 20, 8

    params = init_params(k_p, VOCAB_SIZE, EMBEDDING_DIM, HIDDEN_DIM)
    prep = prepare_params(params)

    h_q = jax.random.normal(k_q, (M, 2 * HIDDEN_DIM), jnp.float32)
    h_p = jax.random.normal(k_hp, (N, 2 * HIDDEN_DIM), jnp.float32)
    ans_embeds = jax.random.normal(k_a, (ANS_LEN, EMBEDDING_DIM), jnp.float32)

    fwd = jax.jit(functools.partial(answer_synthesis_forward, prep=prep))
    probs = fwd(h_q, h_p, ans_embeds)
    jax.block_until_ready(probs)

    assert probs.shape == (ANS_LEN, VOCAB_SIZE)

    probs_ref = _forward_ref(h_q, h_p, ans_embeds, params)
    np.testing.assert_allclose(np.asarray(probs), np.asarray(probs_ref),
                               rtol=1e-3, atol=1e-5)
    np.testing.assert_allclose(np.asarray(probs.sum(-1)),
                               np.ones(ANS_LEN, np.float32), rtol=1e-5)

    print("KERNEL_OK")
</pallas_src>

<mosaic_0001>
module attributes {stable_mosaic.version = 11 : i64} {
  func.func @_decoder_kernel(%arg0: memref<6x64xf32, #tpu.memory_space<vmem>>, %arg1: memref<20x64xf32, #tpu.memory_space<vmem>>, %arg2: memref<8x64xf32, #tpu.memory_space<vmem>>, %arg3: memref<64x64xf32, #tpu.memory_space<vmem>>, %arg4: memref<1x64xf32, #tpu.memory_space<vmem>>, %arg5: memref<64x64xf32, #tpu.memory_space<vmem>>, %arg6: memref<64x64xf32, #tpu.memory_space<vmem>>, %arg7: memref<64x1xf32, #tpu.memory_space<vmem>>, %arg8: memref<64x384xf32, #tpu.memory_space<vmem>>, %arg9: memref<64x384xf32, #tpu.memory_space<vmem>>, %arg10: memref<128x384xf32, #tpu.memory_space<vmem>>, %arg11: memref<1x384xf32, #tpu.memory_space<vmem>>, %arg12: memref<1x384xf32, #tpu.memory_space<vmem>>, %arg13: memref<64x64xf32, #tpu.memory_space<vmem>>, %arg14: memref<64x64xf32, #tpu.memory_space<vmem>>, %arg15: memref<128x64xf32, #tpu.memory_space<vmem>>, %arg16: memref<32x256xf32, #tpu.memory_space<vmem>>, %arg17: memref<8x256xf32, #tpu.memory_space<vmem>>) attributes {dimension_semantics = [], scalar_prefetch = 0 : i64, scratch_operands = 0 : i64, tpu.core_type = #tpu.core_type<tc>} {
    %c0 = arith.constant 0 : index
    %c0_0 = arith.constant 0 : index
    %0 = vector.load %arg0[%c0, %c0_0] : memref<6x64xf32, #tpu.memory_space<vmem>>, vector<6x64xf32>
    %cst = arith.constant dense<0.000000e+00> : vector<64xf32>
    %1 = vector.multi_reduction <add>, %0, %cst [0] : vector<6x64xf32> to vector<64xf32>
    %2 = vector.shape_cast %1 : vector<64xf32> to vector<1x64xf32>
    %c0_1 = arith.constant 0 : index
    %c0_2 = arith.constant 0 : index
    %3 = vector.load %arg1[%c0_1, %c0_2] : memref<20x64xf32, #tpu.memory_space<vmem>>, vector<20x64xf32>
    %cst_3 = arith.constant dense<0.000000e+00> : vector<64xf32>
    %4 = vector.multi_reduction <add>, %3, %cst_3 [0] : vector<20x64xf32> to vector<64xf32>
    %5 = vector.shape_cast %4 : vector<64xf32> to vector<1x64xf32>
    %6 = arith.addf %2, %5 : vector<1x64xf32>
    %c0_4 = arith.constant 0 : index
    %c0_5 = arith.constant 0 : index
    %7 = vector.load %arg6[%c0_4, %c0_5] : memref<64x64xf32, #tpu.memory_space<vmem>>, vector<64x64xf32>
    %cst_6 = arith.constant dense<0.000000e+00> : vector<1x64xf32>
    %8 = tpu.matmul %6, %7, %cst_6 {dimension_numbers = #tpu.dot_dimension_numbers<[1], [0], [0], [1], [0, 0, 1, 1], [], []>} : vector<1x64xf32>, vector<64x64xf32>, vector<1x64xf32> -> vector<1x64xf32>
    %c0_7 = arith.constant 0 : index
    %c0_8 = arith.constant 0 : index
    %9 = vector.load %arg2[%c0_7, %c0_8] : memref<8x64xf32, #tpu.memory_space<vmem>>, vector<8x64xf32>
    %c0_9 = arith.constant 0 : index
    %c0_10 = arith.constant 0 : index
    %10 = vector.load %arg8[%c0_9, %c0_10] : memref<64x384xf32, #tpu.memory_space<vmem>>, vector<64x384xf32>
    %cst_11 = arith.constant dense<0.000000e+00> : vector<8x384xf32>
    %11 = tpu.matmul %9, %10, %cst_11 {dimension_numbers = #tpu.dot_dimension_numbers<[1], [0], [0], [1], [0, 0, 1, 1], [], []>} : vector<8x64xf32>, vector<64x384xf32>, vector<8x384xf32> -> vector<8x384xf32>
    %c0_12 = arith.constant 0 : index
    %c0_13 = arith.constant 0 : index
    %12 = vector.load %arg11[%c0_12, %c0_13] : memref<1x384xf32, #tpu.memory_space<vmem>>, vector<1x384xf32>
    %13 = vector.broadcast %12 : vector<1x384xf32> to vector<8x384xf32>
    %14 = arith.addf %11, %13 : vector<8x384xf32>
    %c0_14 = arith.constant 0 : index
    %c0_15 = arith.constant 0 : index
    %15 = vector.load %arg13[%c0_14, %c0_15] : memref<64x64xf32, #tpu.memory_space<vmem>>, vector<64x64xf32>
    %cst_16 = arith.constant dense<0.000000e+00> : vector<8x64xf32>
    %16 = tpu.matmul %9, %15, %cst_16 {dimension_numbers = #tpu.dot_dimension_numbers<[1], [0], [0], [1], [0, 0, 1, 1], [], []>} : vector<8x64xf32>, vector<64x64xf32>, vector<8x64xf32> -> vector<8x64xf32>
    %c0_17 = arith.constant 0 : index
    %c0_18 = arith.constant 0 : index
    %17 = vector.load %arg0[%c0_17, %c0_18] : memref<6x64xf32, #tpu.memory_space<vmem>>, vector<1x64xf32>
    %c0_19 = arith.constant 0 : index
    %c0_20 = arith.constant 0 : index
    %18 = vector.load %arg1[%c0_19, %c0_20] : memref<20x64xf32, #tpu.memory_space<vmem>>, vector<1x64xf32>
    %19 = tpu.concatenate %17, %18 in 0 : vector<1x64xf32>, vector<1x64xf32> -> vector<2x64xf32>
    %c0_21 = arith.constant 0 : index
    %c0_22 = arith.constant 0 : index
    %20 = vector.load %arg3[%c0_21, %c0_22] : memref<64x64xf32, #tpu.memory_space<vmem>>, vector<64x64xf32>
    %cst_23 = arith.constant dense<0.000000e+00> : vector<2x64xf32>
    %21 = tpu.matmul %19, %20, %cst_23 {dimension_numbers = #tpu.dot_dimension_numbers<[1], [0], [0], [1], [0, 0, 1, 1], [], []>} : vector<2x64xf32>, vector<64x64xf32>, vector<2x64xf32> -> vector<2x64xf32>
    %c0_24 = arith.constant 0 : index
    %c0_25 = arith.constant 0 : index
    %22 = vector.load %arg4[%c0_24, %c0_25] : memref<1x64xf32, #tpu.memory_space<vmem>>, vector<1x64xf32>
    %23 = vector.broadcast %22 : vector<1x64xf32> to vector<2x64xf32>
    %24 = arith.addf %21, %23 : vector<2x64xf32>
    %25 = math.tanh %24 : vector<2x64xf32>
    %26 = vector.extract_strided_slice %25 {offsets = [0, 0], sizes = [1, 64], strides = [1, 1]} : vector<2x64xf32> to vector<1x64xf32>
    %27 = vector.extract_strided_slice %25 {offsets = [1, 0], sizes = [1, 64], strides = [1, 1]} : vector<2x64xf32> to vector<1x64xf32>
    %28 = tpu.concatenate %26, %27 in 1 : vector<1x64xf32>, vector<1x64xf32> -> vector<1x128xf32>
    %c0_26 = arith.constant 0 : index
    %c0_27 = arith.constant 0 : index
    %29 = vector.load %arg5[%c0_26, %c0_27] : memref<64x64xf32, #tpu.memory_space<vmem>>, vector<64x64xf32>
    %c0_28 = arith.constant 0 : index
    %c0_29 = arith.constant 0 : index
    %30 = vector.load %arg7[%c0_28, %c0_29] : memref<64x1xf32, #tpu.memory_space<vmem>>, vector<64x1xf32>
    %c0_30 = arith.constant 0 : index
    %c0_31 = arith.constant 0 : index
    %31 = vector.load %arg9[%c0_30, %c0_31] : memref<64x384xf32, #tpu.memory_space<vmem>>, vector<64x384xf32>
    %c0_32 = arith.constant 0 : index
    %c0_33 = arith.constant 0 : index
    %32 = vector.load %arg10[%c0_32, %c0_33] : memref<128x384xf32, #tpu.memory_space<vmem>>, vector<128x384xf32>
    %c0_34 = arith.constant 0 : index
    %c0_35 = arith.constant 0 : index
    %33 = vector.load %arg12[%c0_34, %c0_35] : memref<1x384xf32, #tpu.memory_space<vmem>>, vector<1x384xf32>
    %c0_36 = arith.constant 0 : index
    %c0_37 = arith.constant 0 : index
    %34 = vector.load %arg14[%c0_36, %c0_37] : memref<64x64xf32, #tpu.memory_space<vmem>>, vector<64x64xf32>
    %c0_38 = arith.constant 0 : index
    %c0_39 = arith.constant 0 : index
    %35 = vector.load %arg15[%c0_38, %c0_39] : memref<128x64xf32, #tpu.memory_space<vmem>>, vector<128x64xf32>
    %c0_40 = arith.constant 0 : index
    %c0_41 = arith.constant 0 : index
    %36 = vector.load %arg16[%c0_40, %c0_41] : memref<32x256xf32, #tpu.memory_space<vmem>>, vector<32x256xf32>
    %37 = vector.extract_strided_slice %28 {offsets = [0, 0], sizes = [1, 64], strides = [1, 1]} : vector<1x128xf32> to vector<1x64xf32>
    %38 = vector.extract_strided_slice %28 {offsets = [0, 64], sizes = [1, 64], strides = [1, 1]} : vector<1x128xf32> to vector<1x64xf32>
    %39 = tpu.concatenate %37, %38 in 0 : vector<1x64xf32>, vector<1x64xf32> -> vector<2x64xf32>
    %cst_42 = arith.constant dense<0.000000e+00> : vector<2x64xf32>
    %40 = tpu.matmul %39, %29, %cst_42 {dimension_numbers = #tpu.dot_dimension_numbers<[1], [0], [0], [1], [0, 0, 1, 1], [], []>} : vector<2x64xf32>, vector<64x64xf32>, vector<2x64xf32> -> vector<2x64xf32>
    %41 = vector.broadcast %8 : vector<1x64xf32> to vector<2x64xf32>
    %42 = arith.addf %40, %41 : vector<2x64xf32>
    %43 = math.tanh %42 : vector<2x64xf32>
    %cst_43 = arith.constant dense<0.000000e+00> : vector<2x1xf32>
    %44 = tpu.matmul %43, %30, %cst_43 {dimension_numbers = #tpu.dot_dimension_numbers<[1], [0], [0], [1], [0, 0, 1, 1], [], []>} : vector<2x64xf32>, vector<64x1xf32>, vector<2x1xf32> -> vector<2x1xf32>
    %cst_44 = arith.constant dense<0xFF800000> : vector<1xf32>
    %45 = vector.multi_reduction <maximumf>, %44, %cst_44 [0] : vector<2x1xf32> to vector<1xf32>
    %46 = vector.shape_cast %45 : vector<1xf32> to vector<1x1xf32>
    %47 = vector.broadcast %46 : vector<1x1xf32> to vector<2x1xf32>
    %48 = arith.subf %44, %47 : vector<2x1xf32>
    %49 = math.exp %48 : vector<2x1xf32>
    %cst_45 = arith.constant dense<0.000000e+00> : vector<1xf32>
    %50 = vector.multi_reduction <add>, %49, %cst_45 [0] : vector<2x1xf32> to vector<1xf32>
    %51 = vector.shape_cast %50 : vector<1xf32> to vector<1x1xf32>
    %52 = vector.broadcast %51 : vector<1x1xf32> to vector<2x1xf32>
    %53 = arith.divf %49, %52 : vector<2x1xf32>
    %54 = vector.broadcast %53 : vector<2x1xf32> to vector<2x64xf32>
    %55 = arith.mulf %54, %39 : vector<2x64xf32>
    %cst_46 = arith.constant dense<0.000000e+00> : vector<64xf32>
    %56 = vector.multi_reduction <add>, %55, %cst_46 [0] : vector<2x64xf32> to vector<64xf32>
    %57 = vector.shape_cast %56 : vector<64xf32> to vector<1x64xf32>
    %58 = vector.extract_strided_slice %14 {offsets = [0, 0], sizes = [1, 384], strides = [1, 1]} : vector<8x384xf32> to vector<1x384xf32>
    %cst_47 = arith.constant dense<0.000000e+00> : vector<1x384xf32>
    %59 = tpu.matmul %57, %31, %cst_47 {dimension_numbers = #tpu.dot_dimension_numbers<[1], [0], [0], [1], [0, 0, 1, 1], [], []>} : vector<1x64xf32>, vector<64x384xf32>, vector<1x384xf32> -> vector<1x384xf32>
    %60 = arith.addf %58, %59 : vector<1x384xf32>
    %cst_48 = arith.constant dense<0.000000e+00> : vector<1x384xf32>
    %61 = tpu.matmul %28, %32, %cst_48 {dimension_numbers = #tpu.dot_dimension_numbers<[1], [0], [0], [1], [0, 0, 1, 1], [], []>} : vector<1x128xf32>, vector<128x384xf32>, vector<1x384xf32> -> vector<1x384xf32>
    %62 = arith.addf %61, %33 : vector<1x384xf32>
    %63 = vector.extract_strided_slice %60 {offsets = [0, 0], sizes = [1, 128], strides = [1, 1]} : vector<1x384xf32> to vector<1x128xf32>
    %64 = vector.extract_strided_slice %62 {offsets = [0, 0], sizes = [1, 128], strides = [1, 1]} : vector<1x384xf32> to vector<1x128xf32>
    %65 = arith.addf %63, %64 : vector<1x128xf32>
    %66 = arith.negf %65 : vector<1x128xf32>
    %67 = math.exp %66 : vector<1x128xf32>
    %cst_49 = arith.constant 1.000000e+00 : f32
    %68 = vector.broadcast %cst_49 : f32 to vector<1x128xf32>
    %69 = arith.addf %68, %67 : vector<1x128xf32>
    %70 = arith.divf %68, %69 : vector<1x128xf32>
    %71 = vector.extract_strided_slice %60 {offsets = [0, 128], sizes = [1, 128], strides = [1, 1]} : vector<1x384xf32> to vector<1x128xf32>
    %72 = vector.extract_strided_slice %62 {offsets = [0, 128], sizes = [1, 128], strides = [1, 1]} : vector<1x384xf32> to vector<1x128xf32>
    %73 = arith.addf %71, %72 : vector<1x128xf32>
    %74 = arith.negf %73 : vector<1x128xf32>
    %75 = math.exp %74 : vector<1x128xf32>
    %cst_50 = arith.constant 1.000000e+00 : f32
    %76 = vector.broadcast %cst_50 : f32 to vector<1x128xf32>
    %77 = arith.addf %76, %75 : vector<1x128xf32>
    %78 = arith.divf %76, %77 : vector<1x128xf32>
    %79 = vector.extract_strided_slice %60 {offsets = [0, 256], sizes = [1, 128], strides = [1, 1]} : vector<1x384xf32> to vector<1x128xf32>
    %80 = vector.extract_strided_slice %62 {offsets = [0, 256], sizes = [1, 128], strides = [1, 1]} : vector<1x384xf32> to vector<1x128xf32>
    %81 = arith.mulf %70, %80 : vector<1x128xf32>
    %82 = arith.addf %79, %81 : vector<1x128xf32>
    %83 = math.tanh %82 : vector<1x128xf32>
    %cst_51 = arith.constant 1.000000e+00 : f32
    %84 = vector.broadcast %cst_51 : f32 to vector<1x128xf32>
    %85 = arith.subf %84, %78 : vector<1x128xf32>
    %86 = arith.mulf %85, %83 : vector<1x128xf32>
    %87 = arith.mulf %78, %28 : vector<1x128xf32>
    %88 = arith.addf %86, %87 : vector<1x128xf32>
    %89 = vector.extract_strided_slice %16 {offsets = [0, 0], sizes = [1, 64], strides = [1, 1]} : vector<8x64xf32> to vector<1x64xf32>
    %cst_52 = arith.constant dense<0.000000e+00> : vector<1x64xf32>
    %90 = tpu.matmul %57, %34, %cst_52 {dimension_numbers = #tpu.dot_dimension_numbers<[1], [0], [0], [1], [0, 0, 1, 1], [], []>} : vector<1x64xf32>, vector<64x64xf32>, vector<1x64xf32> -> vector<1x64xf32>
    %91 = arith.addf %89, %90 : vector<1x64xf32>
    %cst_53 = arith.constant dense<0.000000e+00> : vector<1x64xf32>
    %92 = tpu.matmul %88, %35, %cst_53 {dimension_numbers = #tpu.dot_dimension_numbers<[1], [0], [0], [1], [0, 0, 1, 1], [], []>} : vector<1x128xf32>, vector<128x64xf32>, vector<1x64xf32> -> vector<1x64xf32>
    %93 = arith.addf %91, %92 : vector<1x64xf32>
    %94 = vector.extract_strided_slice %93 {offsets = [0, 0], sizes = [1, 32], strides = [1, 1]} : vector<1x64xf32> to vector<1x32xf32>
    %95 = vector.extract_strided_slice %93 {offsets = [0, 32], sizes = [1, 32], strides = [1, 1]} : vector<1x64xf32> to vector<1x32xf32>
    %96 = arith.maximumf %94, %95 : vector<1x32xf32>
    %cst_54 = arith.constant dense<0.000000e+00> : vector<1x256xf32>
    %97 = tpu.matmul %96, %36, %cst_54 {dimension_numbers = #tpu.dot_dimension_numbers<[1], [0], [0], [1], [0, 0, 1, 1], [], []>} : vector<1x32xf32>, vector<32x256xf32>, vector<1x256xf32> -> vector<1x256xf32>
    %cst_55 = arith.constant dense<0xFF800000> : vector<1xf32>
    %98 = vector.multi_reduction <maximumf>, %97, %cst_55 [1] : vector<1x256xf32> to vector<1xf32>
    %99 = vector.shape_cast %98 : vector<1xf32> to vector<1x1xf32>
    %100 = vector.broadcast %99 : vector<1x1xf32> to vector<1x256xf32>
    %101 = arith.subf %97, %100 : vector<1x256xf32>
    %102 = math.exp %101 : vector<1x256xf32>
    %cst_56 = arith.constant dense<0.000000e+00> : vector<1xf32>
    %103 = vector.multi_reduction <add>, %102, %cst_56 [1] : vector<1x256xf32> to vector<1xf32>
    %104 = vector.shape_cast %103 : vector<1xf32> to vector<1x1xf32>
    %105 = vector.broadcast %104 : vector<1x1xf32> to vector<1x256xf32>
    %106 = arith.divf %102, %105 : vector<1x256xf32>
    %c0_57 = arith.constant 0 : index
    %c0_58 = arith.constant 0 : index
    %107 = vector.load %arg17[%c0_57, %c0_58] : memref<8x256xf32, #tpu.memory_space<vmem>>, vector<1x256xf32>
    tpu.vector_store %arg17[%c0_57, %c0_58], %106 {strides = array<i32>} : memref<8x256xf32, #tpu.memory_space<vmem>>, vector<1x256xf32>,
    %108 = vector.extract_strided_slice %88 {offsets = [0, 0], sizes = [1, 64], strides = [1, 1]} : vector<1x128xf32> to vector<1x64xf32>
    %109 = vector.extract_strided_slice %88 {offsets = [0, 64], sizes = [1, 64], strides = [1, 1]} : vector<1x128xf32> to vector<1x64xf32>
    %110 = tpu.concatenate %108, %109 in 0 : vector<1x64xf32>, vector<1x64xf32> -> vector<2x64xf32>
    %cst_59 = arith.constant dense<0.000000e+00> : vector<2x64xf32>
    %111 = tpu.matmul %110, %29, %cst_59 {dimension_numbers = #tpu.dot_dimension_numbers<[1], [0], [0], [1], [0, 0, 1, 1], [], []>} : vector<2x64xf32>, vector<64x64xf32>, vector<2x64xf32> -> vector<2x64xf32>
    %112 = vector.broadcast %8 : vector<1x64xf32> to vector<2x64xf32>
    %113 = arith.addf %111, %112 : vector<2x64xf32>
    %114 = math.tanh %113 : vector<2x64xf32>
    %cst_60 = arith.constant dense<0.000000e+00> : vector<2x1xf32>
    %115 = tpu.matmul %114, %30, %cst_60 {dimension_numbers = #tpu.dot_dimension_numbers<[1], [0], [0], [1], [0, 0, 1, 1], [], []>} : vector<2x64xf32>, vector<64x1xf32>, vector<2x1xf32> -> vector<2x1xf32>
    %cst_61 = arith.constant dense<0xFF800000> : vector<1xf32>
    %116 = vector.multi_reduction <maximumf>, %115, %cst_61 [0] : vector<2x1xf32> to vector<1xf32>
    %117 = vector.shape_cast %116 : vector<1xf32> to vector<1x1xf32>
    %118 = vector.broadcast %117 : vector<1x1xf32> to vector<2x1xf32>
    %119 = arith.subf %115, %118 : vector<2x1xf32>
    %120 = math.exp %119 : vector<2x1xf32>
    %cst_62 = arith.constant dense<0.000000e+00> : vector<1xf32>
    %121 = vector.multi_reduction <add>, %120, %cst_62 [0] : vector<2x1xf32> to vector<1xf32>
    %122 = vector.shape_cast %121 : vector<1xf32> to vector<1x1xf32>
    %123 = vector.broadcast %122 : vector<1x1xf32> to vector<2x1xf32>
    %124 = arith.divf %120, %123 : vector<2x1xf32>
    %125 = vector.broadcast %124 : vector<2x1xf32> to vector<2x64xf32>
    %126 = arith.mulf %125, %110 : vector<2x64xf32>
    %cst_63 = arith.constant dense<0.000000e+00> : vector<64xf32>
    %127 = vector.multi_reduction <add>, %126, %cst_63 [0] : vector<2x64xf32> to vector<64xf32>
    %128 = vector.shape_cast %127 : vector<64xf32> to vector<1x64xf32>
    %129 = vector.extract_strided_slice %14 {offsets = [1, 0], sizes = [1, 384], strides = [1, 1]} : vector<8x384xf32> to vector<1x384xf32>
    %cst_64 = arith.constant dense<0.000000e+00> : vector<1x384xf32>
    %130 = tpu.matmul %128, %31, %cst_64 {dimension_numbers = #tpu.dot_dimension_numbers<[1], [0], [0], [1], [0, 0, 1, 1], [], []>} : vector<1x64xf32>, vector<64x384xf32>, vector<1x384xf32> -> vector<1x384xf32>
    %131 = arith.addf %129, %130 : vector<1x384xf32>
    %cst_65 = arith.constant dense<0.000000e+00> : vector<1x384xf32>
    %132 = tpu.matmul %88, %32, %cst_65 {dimension_numbers = #tpu.dot_dimension_numbers<[1], [0], [0], [1], [0, 0, 1, 1], [], []>} : vector<1x128xf32>, vector<128x384xf32>, vector<1x384xf32> -> vector<1x384xf32>
    %133 = arith.addf %132, %33 : vector<1x384xf32>
    %134 = vector.extract_strided_slice %131 {offsets = [0, 0], sizes = [1, 128], strides = [1, 1]} : vector<1x384xf32> to vector<1x128xf32>
    %135 = vector.extract_strided_slice %133 {offsets = [0, 0], sizes = [1, 128], strides = [1, 1]} : vector<1x384xf32> to vector<1x128xf32>
    %136 = arith.addf %134, %135 : vector<1x128xf32>
    %137 = arith.negf %136 : vector<1x128xf32>
    %138 = math.exp %137 : vector<1x128xf32>
    %cst_66 = arith.constant 1.000000e+00 : f32
    %139 = vector.broadcast %cst_66 : f32 to vector<1x128xf32>
    %140 = arith.addf %139, %138 : vector<1x128xf32>
    %141 = arith.divf %139, %140 : vector<1x128xf32>
    %142 = vector.extract_strided_slice %131 {offsets = [0, 128], sizes = [1, 128], strides = [1, 1]} : vector<1x384xf32> to vector<1x128xf32>
    %143 = vector.extract_strided_slice %133 {offsets = [0, 128], sizes = [1, 128], strides = [1, 1]} : vector<1x384xf32> to vector<1x128xf32>
    %144 = arith.addf %142, %143 : vector<1x128xf32>
    %145 = arith.negf %144 : vector<1x128xf32>
    %146 = math.exp %145 : vector<1x128xf32>
    %cst_67 = arith.constant 1.000000e+00 : f32
    %147 = vector.broadcast %cst_67 : f32 to vector<1x128xf32>
    %148 = arith.addf %147, %146 : vector<1x128xf32>
    %149 = arith.divf %147, %148 : vector<1x128xf32>
    %150 = vector.extract_strided_slice %131 {offsets = [0, 256], sizes = [1, 128], strides = [1, 1]} : vector<1x384xf32> to vector<1x128xf32>
    %151 = vector.extract_strided_slice %133 {offsets = [0, 256], sizes = [1, 128], strides = [1, 1]} : vector<1x384xf32> to vector<1x128xf32>
    %152 = arith.mulf %141, %151 : vector<1x128xf32>
    %153 = arith.addf %150, %152 : vector<1x128xf32>
    %154 = math.tanh %153 : vector<1x128xf32>
    %cst_68 = arith.constant 1.000000e+00 : f32
    %155 = vector.broadcast %cst_68 : f32 to vector<1x128xf32>
    %156 = arith.subf %155, %149 : vector<1x128xf32>
    %157 = arith.mulf %156, %154 : vector<1x128xf32>
    %158 = arith.mulf %149, %88 : vector<1x128xf32>
    %159 = arith.addf %157, %158 : vector<1x128xf32>
    %160 = vector.extract_strided_slice %16 {offsets = [1, 0], sizes = [1, 64], strides = [1, 1]} : vector<8x64xf32> to vector<1x64xf32>
    %cst_69 = arith.constant dense<0.000000e+00> : vector<1x64xf32>
    %161 = tpu.matmul %128, %34, %cst_69 {dimension_numbers = #tpu.dot_dimension_numbers<[1], [0], [0], [1], [0, 0, 1, 1], [], []>} : vector<1x64xf32>, vector<64x64xf32>, vector<1x64xf32> -> vector<1x64xf32>
    %162 = arith.addf %160, %161 : vector<1x64xf32>
    %cst_70 = arith.constant dense<0.000000e+00> : vector<1x64xf32>
    %163 = tpu.matmul %159, %35, %cst_70 {dimension_numbers = #tpu.dot_dimension_numbers<[1], [0], [0], [1], [0, 0, 1, 1], [], []>} : vector<1x128xf32>, vector<128x64xf32>, vector<1x64xf32> -> vector<1x64xf32>
    %164 = arith.addf %162, %163 : vector<1x64xf32>
    %165 = vector.extract_strided_slice %164 {offsets = [0, 0], sizes = [1, 32], strides = [1, 1]} : vector<1x64xf32> to vector<1x32xf32>
    %166 = vector.extract_strided_slice %164 {offsets = [0, 32], sizes = [1, 32], strides = [1, 1]} : vector<1x64xf32> to vector<1x32xf32>
    %167 = arith.maximumf %165, %166 : vector<1x32xf32>
    %cst_71 = arith.constant dense<0.000000e+00> : vector<1x256xf32>
    %168 = tpu.matmul %167, %36, %cst_71 {dimension_numbers = #tpu.dot_dimension_numbers<[1], [0], [0], [1], [0, 0, 1, 1], [], []>} : vector<1x32xf32>, vector<32x256xf32>, vector<1x256xf32> -> vector<1x256xf32>
    %cst_72 = arith.constant dense<0xFF800000> : vector<1xf32>
    %169 = vector.multi_reduction <maximumf>, %168, %cst_72 [1] : vector<1x256xf32> to vector<1xf32>
    %170 = vector.shape_cast %169 : vector<1xf32> to vector<1x1xf32>
    %171 = vector.broadcast %170 : vector<1x1xf32> to vector<1x256xf32>
    %172 = arith.subf %168, %171 : vector<1x256xf32>
    %173 = math.exp %172 : vector<1x256xf32>
    %cst_73 = arith.constant dense<0.000000e+00> : vector<1xf32>
    %174 = vector.multi_reduction <add>, %173, %cst_73 [1] : vector<1x256xf32> to vector<1xf32>
    %175 = vector.shape_cast %174 : vector<1xf32> to vector<1x1xf32>
    %176 = vector.broadcast %175 : vector<1x1xf32> to vector<1x256xf32>
    %177 = arith.divf %173, %176 : vector<1x256xf32>
    %c1 = arith.constant 1 : index
    %c0_74 = arith.constant 0 : index
    %178 = vector.load %arg17[%c1, %c0_74] : memref<8x256xf32, #tpu.memory_space<vmem>>, vector<1x256xf32>
    tpu.vector_store %arg17[%c1, %c0_74], %177 {strides = array<i32>} : memref<8x256xf32, #tpu.memory_space<vmem>>, vector<1x256xf32>,
    %179 = vector.extract_strided_slice %159 {offsets = [0, 0], sizes = [1, 64], strides = [1, 1]} : vector<1x128xf32> to vector<1x64xf32>
    %180 = vector.extract_strided_slice %159 {offsets = [0, 64], sizes = [1, 64], strides = [1, 1]} : vector<1x128xf32> to vector<1x64xf32>
    %181 = tpu.concatenate %179, %180 in 0 : vector<1x64xf32>, vector<1x64xf32> -> vector<2x64xf32>
    %cst_75 = arith.constant dense<0.000000e+00> : vector<2x64xf32>
    %182 = tpu.matmul %181, %29, %cst_75 {dimension_numbers = #tpu.dot_dimension_numbers<[1], [0], [0], [1], [0, 0, 1, 1], [], []>} : vector<2x64xf32>, vector<64x64xf32>, vector<2x64xf32> -> vector<2x64xf32>
    %183 = vector.broadcast %8 : vector<1x64xf32> to vector<2x64xf32>
    %184 = arith.addf %182, %183 : vector<2x64xf32>
    %185 = math.tanh %184 : vector<2x64xf32>
    %cst_76 = arith.constant dense<0.000000e+00> : vector<2x1xf32>
    %186 = tpu.matmul %185, %30, %cst_76 {dimension_numbers = #tpu.dot_dimension_numbers<[1], [0], [0], [1], [0, 0, 1, 1], [], []>} : vector<2x64xf32>, vector<64x1xf32>, vector<2x1xf32> -> vector<2x1xf32>
    %cst_77 = arith.constant dense<0xFF800000> : vector<1xf32>
    %187 = vector.multi_reduction <maximumf>, %186, %cst_77 [0] : vector<2x1xf32> to vector<1xf32>
    %188 = vector.shape_cast %187 : vector<1xf32> to vector<1x1xf32>
    %189 = vector.broadcast %188 : vector<1x1xf32> to vector<2x1xf32>
    %190 = arith.subf %186, %189 : vector<2x1xf32>
    %191 = math.exp %190 : vector<2x1xf32>
    %cst_78 = arith.constant dense<0.000000e+00> : vector<1xf32>
    %192 = vector.multi_reduction <add>, %191, %cst_78 [0] : vector<2x1xf32> to vector<1xf32>
    %193 = vector.shape_cast %192 : vector<1xf32> to vector<1x1xf32>
    %194 = vector.broadcast %193 : vector<1x1xf32> to vector<2x1xf32>
    %195 = arith.divf %191, %194 : vector<2x1xf32>
    %196 = vector.broadcast %195 : vector<2x1xf32> to vector<2x64xf32>
    %197 = arith.mulf %196, %181 : vector<2x64xf32>
    %cst_79 = arith.constant dense<0.000000e+00> : vector<64xf32>
    %198 = vector.multi_reduction <add>, %197, %cst_79 [0] : vector<2x64xf32> to vector<64xf32>
    %199 = vector.shape_cast %198 : vector<64xf32> to vector<1x64xf32>
    %200 = vector.extract_strided_slice %14 {offsets = [2, 0], sizes = [1, 384], strides = [1, 1]} : vector<8x384xf32> to vector<1x384xf32>
    %cst_80 = arith.constant dense<0.000000e+00> : vector<1x384xf32>
    %201 = tpu.matmul %199, %31, %cst_80 {dimension_numbers = #tpu.dot_dimension_numbers<[1], [0], [0], [1], [0, 0, 1, 1], [], []>} : vector<1x64xf32>, vector<64x384xf32>, vector<1x384xf32> -> vector<1x384xf32>
    %202 = arith.addf %200, %201 : vector<1x384xf32>
    %cst_81 = arith.constant dense<0.000000e+00> : vector<1x384xf32>
    %203 = tpu.matmul %159, %32, %cst_81 {dimension_numbers = #tpu.dot_dimension_numbers<[1], [0], [0], [1], [0, 0, 1, 1], [], []>} : vector<1x128xf32>, vector<128x384xf32>, vector<1x384xf32> -> vector<1x384xf32>
    %204 = arith.addf %203, %33 : vector<1x384xf32>
    %205 = vector.extract_strided_slice %202 {offsets = [0, 0], sizes = [1, 128], strides = [1, 1]} : vector<1x384xf32> to vector<1x128xf32>
    %206 = vector.extract_strided_slice %204 {offsets = [0, 0], sizes = [1, 128], strides = [1, 1]} : vector<1x384xf32> to vector<1x128xf32>
    %207 = arith.addf %205, %206 : vector<1x128xf32>
    %208 = arith.negf %207 : vector<1x128xf32>
    %209 = math.exp %208 : vector<1x128xf32>
    %cst_82 = arith.constant 1.000000e+00 : f32
    %210 = vector.broadcast %cst_82 : f32 to vector<1x128xf32>
    %211 = arith.addf %210, %209 : vector<1x128xf32>
    %212 = arith.divf %210, %211 : vector<1x128xf32>
    %213 = vector.extract_strided_slice %202 {offsets = [0, 128], sizes = [1, 128], strides = [1, 1]} : vector<1x384xf32> to vector<1x128xf32>
    %214 = vector.extract_strided_slice %204 {offsets = [0, 128], sizes = [1, 128], strides = [1, 1]} : vector<1x384xf32> to vector<1x128xf32>
    %215 = arith.addf %213, %214 : vector<1x128xf32>
    %216 = arith.negf %215 : vector<1x128xf32>
    %217 = math.exp %216 : vector<1x128xf32>
    %cst_83 = arith.constant 1.000000e+00 : f32
    %218 = vector.broadcast %cst_83 : f32 to vector<1x128xf32>
    %219 = arith.addf %218, %217 : vector<1x128xf32>
    %220 = arith.divf %218, %219 : vector<1x128xf32>
    %221 = vector.extract_strided_slice %202 {offsets = [0, 256], sizes = [1, 128], strides = [1, 1]} : vector<1x384xf32> to vector<1x128xf32>
    %222 = vector.extract_strided_slice %204 {offsets = [0, 256], sizes = [1, 128], strides = [1, 1]} : vector<1x384xf32> to vector<1x128xf32>
    %223 = arith.mulf %212, %222 : vector<1x128xf32>
    %224 = arith.addf %221, %223 : vector<1x128xf32>
    %225 = math.tanh %224 : vector<1x128xf32>
    %cst_84 = arith.constant 1.000000e+00 : f32
    %226 = vector.broadcast %cst_84 : f32 to vector<1x128xf32>
    %227 = arith.subf %226, %220 : vector<1x128xf32>
    %228 = arith.mulf %227, %225 : vector<1x128xf32>
    %229 = arith.mulf %220, %159 : vector<1x128xf32>
    %230 = arith.addf %228, %229 : vector<1x128xf32>
    %231 = vector.extract_strided_slice %16 {offsets = [2, 0], sizes = [1, 64], strides = [1, 1]} : vector<8x64xf32> to vector<1x64xf32>
    %cst_85 = arith.constant dense<0.000000e+00> : vector<1x64xf32>
    %232 = tpu.matmul %199, %34, %cst_85 {dimension_numbers = #tpu.dot_dimension_numbers<[1], [0], [0], [1], [0, 0, 1, 1], [], []>} : vector<1x64xf32>, vector<64x64xf32>, vector<1x64xf32> -> vector<1x64xf32>
    %233 = arith.addf %231, %232 : vector<1x64xf32>
    %cst_86 = arith.constant dense<0.000000e+00> : vector<1x64xf32>
    %234 = tpu.matmul %230, %35, %cst_86 {dimension_numbers = #tpu.dot_dimension_numbers<[1], [0], [0], [1], [0, 0, 1, 1], [], []>} : vector<1x128xf32>, vector<128x64xf32>, vector<1x64xf32> -> vector<1x64xf32>
    %235 = arith.addf %233, %234 : vector<1x64xf32>
    %236 = vector.extract_strided_slice %235 {offsets = [0, 0], sizes = [1, 32], strides = [1, 1]} : vector<1x64xf32> to vector<1x32xf32>
    %237 = vector.extract_strided_slice %235 {offsets = [0, 32], sizes = [1, 32], strides = [1, 1]} : vector<1x64xf32> to vector<1x32xf32>
    %238 = arith.maximumf %236, %237 : vector<1x32xf32>
    %cst_87 = arith.constant dense<0.000000e+00> : vector<1x256xf32>
    %239 = tpu.matmul %238, %36, %cst_87 {dimension_numbers = #tpu.dot_dimension_numbers<[1], [0], [0], [1], [0, 0, 1, 1], [], []>} : vector<1x32xf32>, vector<32x256xf32>, vector<1x256xf32> -> vector<1x256xf32>
    %cst_88 = arith.constant dense<0xFF800000> : vector<1xf32>
    %240 = vector.multi_reduction <maximumf>, %239, %cst_88 [1] : vector<1x256xf32> to vector<1xf32>
    %241 = vector.shape_cast %240 : vector<1xf32> to vector<1x1xf32>
    %242 = vector.broadcast %241 : vector<1x1xf32> to vector<1x256xf32>
    %243 = arith.subf %239, %242 : vector<1x256xf32>
    %244 = math.exp %243 : vector<1x256xf32>
    %cst_89 = arith.constant dense<0.000000e+00> : vector<1xf32>
    %245 = vector.multi_reduction <add>, %244, %cst_89 [1] : vector<1x256xf32> to vector<1xf32>
    %246 = vector.shape_cast %245 : vector<1xf32> to vector<1x1xf32>
    %247 = vector.broadcast %246 : vector<1x1xf32> to vector<1x256xf32>
    %248 = arith.divf %244, %247 : vector<1x256xf32>
    %c2 = arith.constant 2 : index
    %c0_90 = arith.constant 0 : index
    %249 = vector.load %arg17[%c2, %c0_90] : memref<8x256xf32, #tpu.memory_space<vmem>>, vector<1x256xf32>
    tpu.vector_store %arg17[%c2, %c0_90], %248 {strides = array<i32>} : memref<8x256xf32, #tpu.memory_space<vmem>>, vector<1x256xf32>,
    %250 = vector.extract_strided_slice %230 {offsets = [0, 0], sizes = [1, 64], strides = [1, 1]} : vector<1x128xf32> to vector<1x64xf32>
    %251 = vector.extract_strided_slice %230 {offsets = [0, 64], sizes = [1, 64], strides = [1, 1]} : vector<1x128xf32> to vector<1x64xf32>
    %252 = tpu.concatenate %250, %251 in 0 : vector<1x64xf32>, vector<1x64xf32> -> vector<2x64xf32>
    %cst_91 = arith.constant dense<0.000000e+00> : vector<2x64xf32>
    %253 = tpu.matmul %252, %29, %cst_91 {dimension_numbers = #tpu.dot_dimension_numbers<[1], [0], [0], [1], [0, 0, 1, 1], [], []>} : vector<2x64xf32>, vector<64x64xf32>, vector<2x64xf32> -> vector<2x64xf32>
    %254 = vector.broadcast %8 : vector<1x64xf32> to vector<2x64xf32>
    %255 = arith.addf %253, %254 : vector<2x64xf32>
    %256 = math.tanh %255 : vector<2x64xf32>
    %cst_92 = arith.constant dense<0.000000e+00> : vector<2x1xf32>
    %257 = tpu.matmul %256, %30, %cst_92 {dimension_numbers = #tpu.dot_dimension_numbers<[1], [0], [0], [1], [0, 0, 1, 1], [], []>} : vector<2x64xf32>, vector<64x1xf32>, vector<2x1xf32> -> vector<2x1xf32>
    %cst_93 = arith.constant dense<0xFF800000> : vector<1xf32>
    %258 = vector.multi_reduction <maximumf>, %257, %cst_93 [0] : vector<2x1xf32> to vector<1xf32>
    %259 = vector.shape_cast %258 : vector<1xf32> to vector<1x1xf32>
    %260 = vector.broadcast %259 : vector<1x1xf32> to vector<2x1xf32>
    %261 = arith.subf %257, %260 : vector<2x1xf32>
    %262 = math.exp %261 : vector<2x1xf32>
    %cst_94 = arith.constant dense<0.000000e+00> : vector<1xf32>
    %263 = vector.multi_reduction <add>, %262, %cst_94 [0] : vector<2x1xf32> to vector<1xf32>
    %264 = vector.shape_cast %263 : vector<1xf32> to vector<1x1xf32>
    %265 = vector.broadcast %264 : vector<1x1xf32> to vector<2x1xf32>
    %266 = arith.divf %262, %265 : vector<2x1xf32>
    %267 = vector.broadcast %266 : vector<2x1xf32> to vector<2x64xf32>
    %268 = arith.mulf %267, %252 : vector<2x64xf32>
    %cst_95 = arith.constant dense<0.000000e+00> : vector<64xf32>
    %269 = vector.multi_reduction <add>, %268, %cst_95 [0] : vector<2x64xf32> to vector<64xf32>
    %270 = vector.shape_cast %269 : vector<64xf32> to vector<1x64xf32>
    %271 = vector.extract_strided_slice %14 {offsets = [3, 0], sizes = [1, 384], strides = [1, 1]} : vector<8x384xf32> to vector<1x384xf32>
    %cst_96 = arith.constant dense<0.000000e+00> : vector<1x384xf32>
    %272 = tpu.matmul %270, %31, %cst_96 {dimension_numbers = #tpu.dot_dimension_numbers<[1], [0], [0], [1], [0, 0, 1, 1], [], []>} : vector<1x64xf32>, vector<64x384xf32>, vector<1x384xf32> -> vector<1x384xf32>
    %273 = arith.addf %271, %272 : vector<1x384xf32>
    %cst_97 = arith.constant dense<0.000000e+00> : vector<1x384xf32>
    %274 = tpu.matmul %230, %32, %cst_97 {dimension_numbers = #tpu.dot_dimension_numbers<[1], [0], [0], [1], [0, 0, 1, 1], [], []>} : vector<1x128xf32>, vector<128x384xf32>, vector<1x384xf32> -> vector<1x384xf32>
    %275 = arith.addf %274, %33 : vector<1x384xf32>
    %276 = vector.extract_strided_slice %273 {offsets = [0, 0], sizes = [1, 128], strides = [1, 1]} : vector<1x384xf32> to vector<1x128xf32>
    %277 = vector.extract_strided_slice %275 {offsets = [0, 0], sizes = [1, 128], strides = [1, 1]} : vector<1x384xf32> to vector<1x128xf32>
    %278 = arith.addf %276, %277 : vector<1x128xf32>
    %279 = arith.negf %278 : vector<1x128xf32>
    %280 = math.exp %279 : vector<1x128xf32>
    %cst_98 = arith.constant 1.000000e+00 : f32
    %281 = vector.broadcast %cst_98 : f32 to vector<1x128xf32>
    %282 = arith.addf %281, %280 : vector<1x128xf32>
    %283 = arith.divf %281, %282 : vector<1x128xf32>
    %284 = vector.extract_strided_slice %273 {offsets = [0, 128], sizes = [1, 128], strides = [1, 1]} : vector<1x384xf32> to vector<1x128xf32>
    %285 = vector.extract_strided_slice %275 {offsets = [0, 128], sizes = [1, 128], strides = [1, 1]} : vector<1x384xf32> to vector<1x128xf32>
    %286 = arith.addf %284, %285 : vector<1x128xf32>
    %287 = arith.negf %286 : vector<1x128xf32>
    %288 = math.exp %287 : vector<1x128xf32>
    %cst_99 = arith.constant 1.000000e+00 : f32
    %289 = vector.broadcast %cst_99 : f32 to vector<1x128xf32>
    %290 = arith.addf %289, %288 : vector<1x128xf32>
    %291 = arith.divf %289, %290 : vector<1x128xf32>
    %292 = vector.extract_strided_slice %273 {offsets = [0, 256], sizes = [1, 128], strides = [1, 1]} : vector<1x384xf32> to vector<1x128xf32>
    %293 = vector.extract_strided_slice %275 {offsets = [0, 256], sizes = [1, 128], strides = [1, 1]} : vector<1x384xf32> to vector<1x128xf32>
    %294 = arith.mulf %283, %293 : vector<1x128xf32>
    %295 = arith.addf %292, %294 : vector<1x128xf32>
    %296 = math.tanh %295 : vector<1x128xf32>
    %cst_100 = arith.constant 1.000000e+00 : f32
    %297 = vector.broadcast %cst_100 : f32 to vector<1x128xf32>
    %298 = arith.subf %297, %291 : vector<1x128xf32>
    %299 = arith.mulf %298, %296 : vector<1x128xf32>
    %300 = arith.mulf %291, %230 : vector<1x128xf32>
    %301 = arith.addf %299, %300 : vector<1x128xf32>
    %302 = vector.extract_strided_slice %16 {offsets = [3, 0], sizes = [1, 64], strides = [1, 1]} : vector<8x64xf32> to vector<1x64xf32>
    %cst_101 = arith.constant dense<0.000000e+00> : vector<1x64xf32>
    %303 = tpu.matmul %270, %34, %cst_101 {dimension_numbers = #tpu.dot_dimension_numbers<[1], [0], [0], [1], [0, 0, 1, 1], [], []>} : vector<1x64xf32>, vector<64x64xf32>, vector<1x64xf32> -> vector<1x64xf32>
    %304 = arith.addf %302, %303 : vector<1x64xf32>
    %cst_102 = arith.constant dense<0.000000e+00> : vector<1x64xf32>
    %305 = tpu.matmul %301, %35, %cst_102 {dimension_numbers = #tpu.dot_dimension_numbers<[1], [0], [0], [1], [0, 0, 1, 1], [], []>} : vector<1x128xf32>, vector<128x64xf32>, vector<1x64xf32> -> vector<1x64xf32>
    %306 = arith.addf %304, %305 : vector<1x64xf32>
    %307 = vector.extract_strided_slice %306 {offsets = [0, 0], sizes = [1, 32], strides = [1, 1]} : vector<1x64xf32> to vector<1x32xf32>
    %308 = vector.extract_strided_slice %306 {offsets = [0, 32], sizes = [1, 32], strides = [1, 1]} : vector<1x64xf32> to vector<1x32xf32>
    %309 = arith.maximumf %307, %308 : vector<1x32xf32>
    %cst_103 = arith.constant dense<0.000000e+00> : vector<1x256xf32>
    %310 = tpu.matmul %309, %36, %cst_103 {dimension_numbers = #tpu.dot_dimension_numbers<[1], [0], [0], [1], [0, 0, 1, 1], [], []>} : vector<1x32xf32>, vector<32x256xf32>, vector<1x256xf32> -> vector<1x256xf32>
    %cst_104 = arith.constant dense<0xFF800000> : vector<1xf32>
    %311 = vector.multi_reduction <maximumf>, %310, %cst_104 [1] : vector<1x256xf32> to vector<1xf32>
    %312 = vector.shape_cast %311 : vector<1xf32> to vector<1x1xf32>
    %313 = vector.broadcast %312 : vector<1x1xf32> to vector<1x256xf32>
    %314 = arith.subf %310, %313 : vector<1x256xf32>
    %315 = math.exp %314 : vector<1x256xf32>
    %cst_105 = arith.constant dense<0.000000e+00> : vector<1xf32>
    %316 = vector.multi_reduction <add>, %315, %cst_105 [1] : vector<1x256xf32> to vector<1xf32>
    %317 = vector.shape_cast %316 : vector<1xf32> to vector<1x1xf32>
    %318 = vector.broadcast %317 : vector<1x1xf32> to vector<1x256xf32>
    %319 = arith.divf %315, %318 : vector<1x256xf32>
    %c3 = arith.constant 3 : index
    %c0_106 = arith.constant 0 : index
    %320 = vector.load %arg17[%c3, %c0_106] : memref<8x256xf32, #tpu.memory_space<vmem>>, vector<1x256xf32>
    tpu.vector_store %arg17[%c3, %c0_106], %319 {strides = array<i32>} : memref<8x256xf32, #tpu.memory_space<vmem>>, vector<1x256xf32>,
    %321 = vector.extract_strided_slice %301 {offsets = [0, 0], sizes = [1, 64], strides = [1, 1]} : vector<1x128xf32> to vector<1x64xf32>
    %322 = vector.extract_strided_slice %301 {offsets = [0, 64], sizes = [1, 64], strides = [1, 1]} : vector<1x128xf32> to vector<1x64xf32>
    %323 = tpu.concatenate %321, %322 in 0 : vector<1x64xf32>, vector<1x64xf32> -> vector<2x64xf32>
    %cst_107 = arith.constant dense<0.000000e+00> : vector<2x64xf32>
    %324 = tpu.matmul %323, %29, %cst_107 {dimension_numbers = #tpu.dot_dimension_numbers<[1], [0], [0], [1], [0, 0, 1, 1], [], []>} : vector<2x64xf32>, vector<64x64xf32>, vector<2x64xf32> -> vector<2x64xf32>
    %325 = vector.broadcast %8 : vector<1x64xf32> to vector<2x64xf32>
    %326 = arith.addf %324, %325 : vector<2x64xf32>
    %327 = math.tanh %326 : vector<2x64xf32>
    %cst_108 = arith.constant dense<0.000000e+00> : vector<2x1xf32>
    %328 = tpu.matmul %327, %30, %cst_108 {dimension_numbers = #tpu.dot_dimension_numbers<[1], [0], [0], [1], [0, 0, 1, 1], [], []>} : vector<2x64xf32>, vector<64x1xf32>, vector<2x1xf32> -> vector<2x1xf32>
    %cst_109 = arith.constant dense<0xFF800000> : vector<1xf32>
    %329 = vector.multi_reduction <maximumf>, %328, %cst_109 [0] : vector<2x1xf32> to vector<1xf32>
    %330 = vector.shape_cast %329 : vector<1xf32> to vector<1x1xf32>
    %331 = vector.broadcast %330 : vector<1x1xf32> to vector<2x1xf32>
    %332 = arith.subf %328, %331 : vector<2x1xf32>
    %333 = math.exp %332 : vector<2x1xf32>
    %cst_110 = arith.constant dense<0.000000e+00> : vector<1xf32>
    %334 = vector.multi_reduction <add>, %333, %cst_110 [0] : vector<2x1xf32> to vector<1xf32>
    %335 = vector.shape_cast %334 : vector<1xf32> to vector<1x1xf32>
    %336 = vector.broadcast %335 : vector<1x1xf32> to vector<2x1xf32>
    %337 = arith.divf %333, %336 : vector<2x1xf32>
    %338 = vector.broadcast %337 : vector<2x1xf32> to vector<2x64xf32>
    %339 = arith.mulf %338, %323 : vector<2x64xf32>
    %cst_111 = arith.constant dense<0.000000e+00> : vector<64xf32>
    %340 = vector.multi_reduction <add>, %339, %cst_111 [0] : vector<2x64xf32> to vector<64xf32>
    %341 = vector.shape_cast %340 : vector<64xf32> to vector<1x64xf32>
    %342 = vector.extract_strided_slice %14 {offsets = [4, 0], sizes = [1, 384], strides = [1, 1]} : vector<8x384xf32> to vector<1x384xf32>
    %cst_112 = arith.constant dense<0.000000e+00> : vector<1x384xf32>
    %343 = tpu.matmul %341, %31, %cst_112 {dimension_numbers = #tpu.dot_dimension_numbers<[1], [0], [0], [1], [0, 0, 1, 1], [], []>} : vector<1x64xf32>, vector<64x384xf32>, vector<1x384xf32> -> vector<1x384xf32>
    %344 = arith.addf %342, %343 : vector<1x384xf32>
    %cst_113 = arith.constant dense<0.000000e+00> : vector<1x384xf32>
    %345 = tpu.matmul %301, %32, %cst_113 {dimension_numbers = #tpu.dot_dimension_numbers<[1], [0], [0], [1], [0, 0, 1, 1], [], []>} : vector<1x128xf32>, vector<128x384xf32>, vector<1x384xf32> -> vector<1x384xf32>
    %346 = arith.addf %345, %33 : vector<1x384xf32>
    %347 = vector.extract_strided_slice %344 {offsets = [0, 0], sizes = [1, 128], strides = [1, 1]} : vector<1x384xf32> to vector<1x128xf32>
    %348 = vector.extract_strided_slice %346 {offsets = [0, 0], sizes = [1, 128], strides = [1, 1]} : vector<1x384xf32> to vector<1x128xf32>
    %349 = arith.addf %347, %348 : vector<1x128xf32>
    %350 = arith.negf %349 : vector<1x128xf32>
    %351 = math.exp %350 : vector<1x128xf32>
    %cst_114 = arith.constant 1.000000e+00 : f32
    %352 = vector.broadcast %cst_114 : f32 to vector<1x128xf32>
    %353 = arith.addf %352, %351 : vector<1x128xf32>
    %354 = arith.divf %352, %353 : vector<1x128xf32>
    %355 = vector.extract_strided_slice %344 {offsets = [0, 128], sizes = [1, 128], strides = [1, 1]} : vector<1x384xf32> to vector<1x128xf32>
    %356 = vector.extract_strided_slice %346 {offsets = [0, 128], sizes = [1, 128], strides = [1, 1]} : vector<1x384xf32> to vector<1x128xf32>
    %357 = arith.addf %355, %356 : vector<1x128xf32>
    %358 = arith.negf %357 : vector<1x128xf32>
    %359 = math.exp %358 : vector<1x128xf32>
    %cst_115 = arith.constant 1.000000e+00 : f32
    %360 = vector.broadcast %cst_115 : f32 to vector<1x128xf32>
    %361 = arith.addf %360, %359 : vector<1x128xf32>
    %362 = arith.divf %360, %361 : vector<1x128xf32>
    %363 = vector.extract_strided_slice %344 {offsets = [0, 256], sizes = [1, 128], strides = [1, 1]} : vector<1x384xf32> to vector<1x128xf32>
    %364 = vector.extract_strided_slice %346 {offsets = [0, 256], sizes = [1, 128], strides = [1, 1]} : vector<1x384xf32> to vector<1x128xf32>
    %365 = arith.mulf %354, %364 : vector<1x128xf32>
    %366 = arith.addf %363, %365 : vector<1x128xf32>
    %367 = math.tanh %366 : vector<1x128xf32>
    %cst_116 = arith.constant 1.000000e+00 : f32
    %368 = vector.broadcast %cst_116 : f32 to vector<1x128xf32>
    %369 = arith.subf %368, %362 : vector<1x128xf32>
    %370 = arith.mulf %369, %367 : vector<1x128xf32>
    %371 = arith.mulf %362, %301 : vector<1x128xf32>
    %372 = arith.addf %370, %371 : vector<1x128xf32>
    %373 = vector.extract_strided_slice %16 {offsets = [4, 0], sizes = [1, 64], strides = [1, 1]} : vector<8x64xf32> to vector<1x64xf32>
    %cst_117 = arith.constant dense<0.000000e+00> : vector<1x64xf32>
    %374 = tpu.matmul %341, %34, %cst_117 {dimension_numbers = #tpu.dot_dimension_numbers<[1], [0], [0], [1], [0, 0, 1, 1], [], []>} : vector<1x64xf32>, vector<64x64xf32>, vector<1x64xf32> -> vector<1x64xf32>
    %375 = arith.addf %373, %374 : vector<1x64xf32>
    %cst_118 = arith.constant dense<0.000000e+00> : vector<1x64xf32>
    %376 = tpu.matmul %372, %35, %cst_118 {dimension_numbers = #tpu.dot_dimension_numbers<[1], [0], [0], [1], [0, 0, 1, 1], [], []>} : vector<1x128xf32>, vector<128x64xf32>, vector<1x64xf32> -> vector<1x64xf32>
    %377 = arith.addf %375, %376 : vector<1x64xf32>
    %378 = vector.extract_strided_slice %377 {offsets = [0, 0], sizes = [1, 32], strides = [1, 1]} : vector<1x64xf32> to vector<1x32xf32>
    %379 = vector.extract_strided_slice %377 {offsets = [0, 32], sizes = [1, 32], strides = [1, 1]} : vector<1x64xf32> to vector<1x32xf32>
    %380 = arith.maximumf %378, %379 : vector<1x32xf32>
    %cst_119 = arith.constant dense<0.000000e+00> : vector<1x256xf32>
    %381 = tpu.matmul %380, %36, %cst_119 {dimension_numbers = #tpu.dot_dimension_numbers<[1], [0], [0], [1], [0, 0, 1, 1], [], []>} : vector<1x32xf32>, vector<32x256xf32>, vector<1x256xf32> -> vector<1x256xf32>
    %cst_120 = arith.constant dense<0xFF800000> : vector<1xf32>
    %382 = vector.multi_reduction <maximumf>, %381, %cst_120 [1] : vector<1x256xf32> to vector<1xf32>
    %383 = vector.shape_cast %382 : vector<1xf32> to vector<1x1xf32>
    %384 = vector.broadcast %383 : vector<1x1xf32> to vector<1x256xf32>
    %385 = arith.subf %381, %384 : vector<1x256xf32>
    %386 = math.exp %385 : vector<1x256xf32>
    %cst_121 = arith.constant dense<0.000000e+00> : vector<1xf32>
    %387 = vector.multi_reduction <add>, %386, %cst_121 [1] : vector<1x256xf32> to vector<1xf32>
    %388 = vector.shape_cast %387 : vector<1xf32> to vector<1x1xf32>
    %389 = vector.broadcast %388 : vector<1x1xf32> to vector<1x256xf32>
    %390 = arith.divf %386, %389 : vector<1x256xf32>
    %c4 = arith.constant 4 : index
    %c0_122 = arith.constant 0 : index
    %391 = vector.load %arg17[%c4, %c0_122] : memref<8x256xf32, #tpu.memory_space<vmem>>, vector<1x256xf32>
    tpu.vector_store %arg17[%c4, %c0_122], %390 {strides = array<i32>} : memref<8x256xf32, #tpu.memory_space<vmem>>, vector<1x256xf32>,
    %392 = vector.extract_strided_slice %372 {offsets = [0, 0], sizes = [1, 64], strides = [1, 1]} : vector<1x128xf32> to vector<1x64xf32>
    %393 = vector.extract_strided_slice %372 {offsets = [0, 64], sizes = [1, 64], strides = [1, 1]} : vector<1x128xf32> to vector<1x64xf32>
    %394 = tpu.concatenate %392, %393 in 0 : vector<1x64xf32>, vector<1x64xf32> -> vector<2x64xf32>
    %cst_123 = arith.constant dense<0.000000e+00> : vector<2x64xf32>
    %395 = tpu.matmul %394, %29, %cst_123 {dimension_numbers = #tpu.dot_dimension_numbers<[1], [0], [0], [1], [0, 0, 1, 1], [], []>} : vector<2x64xf32>, vector<64x64xf32>, vector<2x64xf32> -> vector<2x64xf32>
    %396 = vector.broadcast %8 : vector<1x64xf32> to vector<2x64xf32>
    %397 = arith.addf %395, %396 : vector<2x64xf32>
    %398 = math.tanh %397 : vector<2x64xf32>
    %cst_124 = arith.constant dense<0.000000e+00> : vector<2x1xf32>
    %399 = tpu.matmul %398, %30, %cst_124 {dimension_numbers = #tpu.dot_dimension_numbers<[1], [0], [0], [1], [0, 0, 1, 1], [], []>} : vector<2x64xf32>, vector<64x1xf32>, vector<2x1xf32> -> vector<2x1xf32>
    %cst_125 = arith.constant dense<0xFF800000> : vector<1xf32>
    %400 = vector.multi_reduction <maximumf>, %399, %cst_125 [0] : vector<2x1xf32> to vector<1xf32>
    %401 = vector.shape_cast %400 : vector<1xf32> to vector<1x1xf32>
    %402 = vector.broadcast %401 : vector<1x1xf32> to vector<2x1xf32>
    %403 = arith.subf %399, %402 : vector<2x1xf32>
    %404 = math.exp %403 : vector<2x1xf32>
    %cst_126 = arith.constant dense<0.000000e+00> : vector<1xf32>
    %405 = vector.multi_reduction <add>, %404, %cst_126 [0] : vector<2x1xf32> to vector<1xf32>
    %406 = vector.shape_cast %405 : vector<1xf32> to vector<1x1xf32>
    %407 = vector.broadcast %406 : vector<1x1xf32> to vector<2x1xf32>
    %408 = arith.divf %404, %407 : vector<2x1xf32>
    %409 = vector.broadcast %408 : vector<2x1xf32> to vector<2x64xf32>
    %410 = arith.mulf %409, %394 : vector<2x64xf32>
    %cst_127 = arith.constant dense<0.000000e+00> : vector<64xf32>
    %411 = vector.multi_reduction <add>, %410, %cst_127 [0] : vector<2x64xf32> to vector<64xf32>
    %412 = vector.shape_cast %411 : vector<64xf32> to vector<1x64xf32>
    %413 = vector.extract_strided_slice %14 {offsets = [5, 0], sizes = [1, 384], strides = [1, 1]} : vector<8x384xf32> to vector<1x384xf32>
    %cst_128 = arith.constant dense<0.000000e+00> : vector<1x384xf32>
    %414 = tpu.matmul %412, %31, %cst_128 {dimension_numbers = #tpu.dot_dimension_numbers<[1], [0], [0], [1], [0, 0, 1, 1], [], []>} : vector<1x64xf32>, vector<64x384xf32>, vector<1x384xf32> -> vector<1x384xf32>
    %415 = arith.addf %413, %414 : vector<1x384xf32>
    %cst_129 = arith.constant dense<0.000000e+00> : vector<1x384xf32>
    %416 = tpu.matmul %372, %32, %cst_129 {dimension_numbers = #tpu.dot_dimension_numbers<[1], [0], [0], [1], [0, 0, 1, 1], [], []>} : vector<1x128xf32>, vector<128x384xf32>, vector<1x384xf32> -> vector<1x384xf32>
    %417 = arith.addf %416, %33 : vector<1x384xf32>
    %418 = vector.extract_strided_slice %415 {offsets = [0, 0], sizes = [1, 128], strides = [1, 1]} : vector<1x384xf32> to vector<1x128xf32>
    %419 = vector.extract_strided_slice %417 {offsets = [0, 0], sizes = [1, 128], strides = [1, 1]} : vector<1x384xf32> to vector<1x128xf32>
    %420 = arith.addf %418, %419 : vector<1x128xf32>
    %421 = arith.negf %420 : vector<1x128xf32>
    %422 = math.exp %421 : vector<1x128xf32>
    %cst_130 = arith.constant 1.000000e+00 : f32
    %423 = vector.broadcast %cst_130 : f32 to vector<1x128xf32>
    %424 = arith.addf %423, %422 : vector<1x128xf32>
    %425 = arith.divf %423, %424 : vector<1x128xf32>
    %426 = vector.extract_strided_slice %415 {offsets = [0, 128], sizes = [1, 128], strides = [1, 1]} : vector<1x384xf32> to vector<1x128xf32>
    %427 = vector.extract_strided_slice %417 {offsets = [0, 128], sizes = [1, 128], strides = [1, 1]} : vector<1x384xf32> to vector<1x128xf32>
    %428 = arith.addf %426, %427 : vector<1x128xf32>
    %429 = arith.negf %428 : vector<1x128xf32>
    %430 = math.exp %429 : vector<1x128xf32>
    %cst_131 = arith.constant 1.000000e+00 : f32
    %431 = vector.broadcast %cst_131 : f32 to vector<1x128xf32>
    %432 = arith.addf %431, %430 : vector<1x128xf32>
    %433 = arith.divf %431, %432 : vector<1x128xf32>
    %434 = vector.extract_strided_slice %415 {offsets = [0, 256], sizes = [1, 128], strides = [1, 1]} : vector<1x384xf32> to vector<1x128xf32>
    %435 = vector.extract_strided_slice %417 {offsets = [0, 256], sizes = [1, 128], strides = [1, 1]} : vector<1x384xf32> to vector<1x128xf32>
    %436 = arith.mulf %425, %435 : vector<1x128xf32>
    %437 = arith.addf %434, %436 : vector<1x128xf32>
    %438 = math.tanh %437 : vector<1x128xf32>
    %cst_132 = arith.constant 1.000000e+00 : f32
    %439 = vector.broadcast %cst_132 : f32 to vector<1x128xf32>
    %440 = arith.subf %439, %433 : vector<1x128xf32>
    %441 = arith.mulf %440, %438 : vector<1x128xf32>
    %442 = arith.mulf %433, %372 : vector<1x128xf32>
    %443 = arith.addf %441, %442 : vector<1x128xf32>
    %444 = vector.extract_strided_slice %16 {offsets = [5, 0], sizes = [1, 64], strides = [1, 1]} : vector<8x64xf32> to vector<1x64xf32>
    %cst_133 = arith.constant dense<0.000000e+00> : vector<1x64xf32>
    %445 = tpu.matmul %412, %34, %cst_133 {dimension_numbers = #tpu.dot_dimension_numbers<[1], [0], [0], [1], [0, 0, 1, 1], [], []>} : vector<1x64xf32>, vector<64x64xf32>, vector<1x64xf32> -> vector<1x64xf32>
    %446 = arith.addf %444, %445 : vector<1x64xf32>
    %cst_134 = arith.constant dense<0.000000e+00> : vector<1x64xf32>
    %447 = tpu.matmul %443, %35, %cst_134 {dimension_numbers = #tpu.dot_dimension_numbers<[1], [0], [0], [1], [0, 0, 1, 1], [], []>} : vector<1x128xf32>, vector<128x64xf32>, vector<1x64xf32> -> vector<1x64xf32>
    %448 = arith.addf %446, %447 : vector<1x64xf32>
    %449 = vector.extract_strided_slice %448 {offsets = [0, 0], sizes = [1, 32], strides = [1, 1]} : vector<1x64xf32> to vector<1x32xf32>
    %450 = vector.extract_strided_slice %448 {offsets = [0, 32], sizes = [1, 32], strides = [1, 1]} : vector<1x64xf32> to vector<1x32xf32>
    %451 = arith.maximumf %449, %450 : vector<1x32xf32>
    %cst_135 = arith.constant dense<0.000000e+00> : vector<1x256xf32>
    %452 = tpu.matmul %451, %36, %cst_135 {dimension_numbers = #tpu.dot_dimension_numbers<[1], [0], [0], [1], [0, 0, 1, 1], [], []>} : vector<1x32xf32>, vector<32x256xf32>, vector<1x256xf32> -> vector<1x256xf32>
    %cst_136 = arith.constant dense<0xFF800000> : vector<1xf32>
    %453 = vector.multi_reduction <maximumf>, %452, %cst_136 [1] : vector<1x256xf32> to vector<1xf32>
    %454 = vector.shape_cast %453 : vector<1xf32> to vector<1x1xf32>
    %455 = vector.broadcast %454 : vector<1x1xf32> to vector<1x256xf32>
    %456 = arith.subf %452, %455 : vector<1x256xf32>
    %457 = math.exp %456 : vector<1x256xf32>
    %cst_137 = arith.constant dense<0.000000e+00> : vector<1xf32>
    %458 = vector.multi_reduction <add>, %457, %cst_137 [1] : vector<1x256xf32> to vector<1xf32>
    %459 = vector.shape_cast %458 : vector<1xf32> to vector<1x1xf32>
    %460 = vector.broadcast %459 : vector<1x1xf32> to vector<1x256xf32>
    %461 = arith.divf %457, %460 : vector<1x256xf32>
    %c5 = arith.constant 5 : index
    %c0_138 = arith.constant 0 : index
    %462 = vector.load %arg17[%c5, %c0_138] : memref<8x256xf32, #tpu.memory_space<vmem>>, vector<1x256xf32>
    tpu.vector_store %arg17[%c5, %c0_138], %461 {strides = array<i32>} : memref<8x256xf32, #tpu.memory_space<vmem>>, vector<1x256xf32>,
    %463 = vector.extract_strided_slice %443 {offsets = [0, 0], sizes = [1, 64], strides = [1, 1]} : vector<1x128xf32> to vector<1x64xf32>
    %464 = vector.extract_strided_slice %443 {offsets = [0, 64], sizes = [1, 64], strides = [1, 1]} : vector<1x128xf32> to vector<1x64xf32>
    %465 = tpu.concatenate %463, %464 in 0 : vector<1x64xf32>, vector<1x64xf32> -> vector<2x64xf32>
    %cst_139 = arith.constant dense<0.000000e+00> : vector<2x64xf32>
    %466 = tpu.matmul %465, %29, %cst_139 {dimension_numbers = #tpu.dot_dimension_numbers<[1], [0], [0], [1], [0, 0, 1, 1], [], []>} : vector<2x64xf32>, vector<64x64xf32>, vector<2x64xf32> -> vector<2x64xf32>
    %467 = vector.broadcast %8 : vector<1x64xf32> to vector<2x64xf32>
    %468 = arith.addf %466, %467 : vector<2x64xf32>
    %469 = math.tanh %468 : vector<2x64xf32>
    %cst_140 = arith.constant dense<0.000000e+00> : vector<2x1xf32>
    %470 = tpu.matmul %469, %30, %cst_140 {dimension_numbers = #tpu.dot_dimension_numbers<[1], [0], [0], [1], [0, 0, 1, 1], [], []>} : vector<2x64xf32>, vector<64x1xf32>, vector<2x1xf32> -> vector<2x1xf32>
    %cst_141 = arith.constant dense<0xFF800000> : vector<1xf32>
    %471 = vector.multi_reduction <maximumf>, %470, %cst_141 [0] : vector<2x1xf32> to vector<1xf32>
    %472 = vector.shape_cast %471 : vector<1xf32> to vector<1x1xf32>
    %473 = vector.broadcast %472 : vector<1x1xf32> to vector<2x1xf32>
    %474 = arith.subf %470, %473 : vector<2x1xf32>
    %475 = math.exp %474 : vector<2x1xf32>
    %cst_142 = arith.constant dense<0.000000e+00> : vector<1xf32>
    %476 = vector.multi_reduction <add>, %475, %cst_142 [0] : vector<2x1xf32> to vector<1xf32>
    %477 = vector.shape_cast %476 : vector<1xf32> to vector<1x1xf32>
    %478 = vector.broadcast %477 : vector<1x1xf32> to vector<2x1xf32>
    %479 = arith.divf %475, %478 : vector<2x1xf32>
    %480 = vector.broadcast %479 : vector<2x1xf32> to vector<2x64xf32>
    %481 = arith.mulf %480, %465 : vector<2x64xf32>
    %cst_143 = arith.constant dense<0.000000e+00> : vector<64xf32>
    %482 = vector.multi_reduction <add>, %481, %cst_143 [0] : vector<2x64xf32> to vector<64xf32>
    %483 = vector.shape_cast %482 : vector<64xf32> to vector<1x64xf32>
    %484 = vector.extract_strided_slice %14 {offsets = [6, 0], sizes = [1, 384], strides = [1, 1]} : vector<8x384xf32> to vector<1x384xf32>
    %cst_144 = arith.constant dense<0.000000e+00> : vector<1x384xf32>
    %485 = tpu.matmul %483, %31, %cst_144 {dimension_numbers = #tpu.dot_dimension_numbers<[1], [0], [0], [1], [0, 0, 1, 1], [], []>} : vector<1x64xf32>, vector<64x384xf32>, vector<1x384xf32> -> vector<1x384xf32>
    %486 = arith.addf %484, %485 : vector<1x384xf32>
    %cst_145 = arith.constant dense<0.000000e+00> : vector<1x384xf32>
    %487 = tpu.matmul %443, %32, %cst_145 {dimension_numbers = #tpu.dot_dimension_numbers<[1], [0], [0], [1], [0, 0, 1, 1], [], []>} : vector<1x128xf32>, vector<128x384xf32>, vector<1x384xf32> -> vector<1x384xf32>
    %488 = arith.addf %487, %33 : vector<1x384xf32>
    %489 = vector.extract_strided_slice %486 {offsets = [0, 0], sizes = [1, 128], strides = [1, 1]} : vector<1x384xf32> to vector<1x128xf32>
    %490 = vector.extract_strided_slice %488 {offsets = [0, 0], sizes = [1, 128], strides = [1, 1]} : vector<1x384xf32> to vector<1x128xf32>
    %491 = arith.addf %489, %490 : vector<1x128xf32>
    %492 = arith.negf %491 : vector<1x128xf32>
    %493 = math.exp %492 : vector<1x128xf32>
    %cst_146 = arith.constant 1.000000e+00 : f32
    %494 = vector.broadcast %cst_146 : f32 to vector<1x128xf32>
    %495 = arith.addf %494, %493 : vector<1x128xf32>
    %496 = arith.divf %494, %495 : vector<1x128xf32>
    %497 = vector.extract_strided_slice %486 {offsets = [0, 128], sizes = [1, 128], strides = [1, 1]} : vector<1x384xf32> to vector<1x128xf32>
    %498 = vector.extract_strided_slice %488 {offsets = [0, 128], sizes = [1, 128], strides = [1, 1]} : vector<1x384xf32> to vector<1x128xf32>
    %499 = arith.addf %497, %498 : vector<1x128xf32>
    %500 = arith.negf %499 : vector<1x128xf32>
    %501 = math.exp %500 : vector<1x128xf32>
    %cst_147 = arith.constant 1.000000e+00 : f32
    %502 = vector.broadcast %cst_147 : f32 to vector<1x128xf32>
    %503 = arith.addf %502, %501 : vector<1x128xf32>
    %504 = arith.divf %502, %503 : vector<1x128xf32>
    %505 = vector.extract_strided_slice %486 {offsets = [0, 256], sizes = [1, 128], strides = [1, 1]} : vector<1x384xf32> to vector<1x128xf32>
    %506 = vector.extract_strided_slice %488 {offsets = [0, 256], sizes = [1, 128], strides = [1, 1]} : vector<1x384xf32> to vector<1x128xf32>
    %507 = arith.mulf %496, %506 : vector<1x128xf32>
    %508 = arith.addf %505, %507 : vector<1x128xf32>
    %509 = math.tanh %508 : vector<1x128xf32>
    %cst_148 = arith.constant 1.000000e+00 : f32
    %510 = vector.broadcast %cst_148 : f32 to vector<1x128xf32>
    %511 = arith.subf %510, %504 : vector<1x128xf32>
    %512 = arith.mulf %511, %509 : vector<1x128xf32>
    %513 = arith.mulf %504, %443 : vector<1x128xf32>
    %514 = arith.addf %512, %513 : vector<1x128xf32>
    %515 = vector.extract_strided_slice %16 {offsets = [6, 0], sizes = [1, 64], strides = [1, 1]} : vector<8x64xf32> to vector<1x64xf32>
    %cst_149 = arith.constant dense<0.000000e+00> : vector<1x64xf32>
    %516 = tpu.matmul %483, %34, %cst_149 {dimension_numbers = #tpu.dot_dimension_numbers<[1], [0], [0], [1], [0, 0, 1, 1], [], []>} : vector<1x64xf32>, vector<64x64xf32>, vector<1x64xf32> -> vector<1x64xf32>
    %517 = arith.addf %515, %516 : vector<1x64xf32>
    %cst_150 = arith.constant dense<0.000000e+00> : vector<1x64xf32>
    %518 = tpu.matmul %514, %35, %cst_150 {dimension_numbers = #tpu.dot_dimension_numbers<[1], [0], [0], [1], [0, 0, 1, 1], [], []>} : vector<1x128xf32>, vector<128x64xf32>, vector<1x64xf32> -> vector<1x64xf32>
    %519 = arith.addf %517, %518 : vector<1x64xf32>
    %520 = vector.extract_strided_slice %519 {offsets = [0, 0], sizes = [1, 32], strides = [1, 1]} : vector<1x64xf32> to vector<1x32xf32>
    %521 = vector.extract_strided_slice %519 {offsets = [0, 32], sizes = [1, 32], strides = [1, 1]} : vector<1x64xf32> to vector<1x32xf32>
    %522 = arith.maximumf %520, %521 : vector<1x32xf32>
    %cst_151 = arith.constant dense<0.000000e+00> : vector<1x256xf32>
    %523 = tpu.matmul %522, %36, %cst_151 {dimension_numbers = #tpu.dot_dimension_numbers<[1], [0], [0], [1], [0, 0, 1, 1], [], []>} : vector<1x32xf32>, vector<32x256xf32>, vector<1x256xf32> -> vector<1x256xf32>
    %cst_152 = arith.constant dense<0xFF800000> : vector<1xf32>
    %524 = vector.multi_reduction <maximumf>, %523, %cst_152 [1] : vector<1x256xf32> to vector<1xf32>
    %525 = vector.shape_cast %524 : vector<1xf32> to vector<1x1xf32>
    %526 = vector.broadcast %525 : vector<1x1xf32> to vector<1x256xf32>
    %527 = arith.subf %523, %526 : vector<1x256xf32>
    %528 = math.exp %527 : vector<1x256xf32>
    %cst_153 = arith.constant dense<0.000000e+00> : vector<1xf32>
    %529 = vector.multi_reduction <add>, %528, %cst_153 [1] : vector<1x256xf32> to vector<1xf32>
    %530 = vector.shape_cast %529 : vector<1xf32> to vector<1x1xf32>
    %531 = vector.broadcast %530 : vector<1x1xf32> to vector<1x256xf32>
    %532 = arith.divf %528, %531 : vector<1x256xf32>
    %c6 = arith.constant 6 : index
    %c0_154 = arith.constant 0 : index
    %533 = vector.load %arg17[%c6, %c0_154] : memref<8x256xf32, #tpu.memory_space<vmem>>, vector<1x256xf32>
    tpu.vector_store %arg17[%c6, %c0_154], %532 {strides = array<i32>} : memref<8x256xf32, #tpu.memory_space<vmem>>, vector<1x256xf32>,
    %534 = vector.extract_strided_slice %514 {offsets = [0, 0], sizes = [1, 64], strides = [1, 1]} : vector<1x128xf32> to vector<1x64xf32>
    %535 = vector.extract_strided_slice %514 {offsets = [0, 64], sizes = [1, 64], strides = [1, 1]} : vector<1x128xf32> to vector<1x64xf32>
    %536 = tpu.concatenate %534, %535 in 0 : vector<1x64xf32>, vector<1x64xf32> -> vector<2x64xf32>
    %cst_155 = arith.constant dense<0.000000e+00> : vector<2x64xf32>
    %537 = tpu.matmul %536, %29, %cst_155 {dimension_numbers = #tpu.dot_dimension_numbers<[1], [0], [0], [1], [0, 0, 1, 1], [], []>} : vector<2x64xf32>, vector<64x64xf32>, vector<2x64xf32> -> vector<2x64xf32>
    %538 = vector.broadcast %8 : vector<1x64xf32> to vector<2x64xf32>
    %539 = arith.addf %537, %538 : vector<2x64xf32>
    %540 = math.tanh %539 : vector<2x64xf32>
    %cst_156 = arith.constant dense<0.000000e+00> : vector<2x1xf32>
    %541 = tpu.matmul %540, %30, %cst_156 {dimension_numbers = #tpu.dot_dimension_numbers<[1], [0], [0], [1], [0, 0, 1, 1], [], []>} : vector<2x64xf32>, vector<64x1xf32>, vector<2x1xf32> -> vector<2x1xf32>
    %cst_157 = arith.constant dense<0xFF800000> : vector<1xf32>
    %542 = vector.multi_reduction <maximumf>, %541, %cst_157 [0] : vector<2x1xf32> to vector<1xf32>
    %543 = vector.shape_cast %542 : vector<1xf32> to vector<1x1xf32>
    %544 = vector.broadcast %543 : vector<1x1xf32> to vector<2x1xf32>
    %545 = arith.subf %541, %544 : vector<2x1xf32>
    %546 = math.exp %545 : vector<2x1xf32>
    %cst_158 = arith.constant dense<0.000000e+00> : vector<1xf32>
    %547 = vector.multi_reduction <add>, %546, %cst_158 [0] : vector<2x1xf32> to vector<1xf32>
    %548 = vector.shape_cast %547 : vector<1xf32> to vector<1x1xf32>
    %549 = vector.broadcast %548 : vector<1x1xf32> to vector<2x1xf32>
    %550 = arith.divf %546, %549 : vector<2x1xf32>
    %551 = vector.broadcast %550 : vector<2x1xf32> to vector<2x64xf32>
    %552 = arith.mulf %551, %536 : vector<2x64xf32>
    %cst_159 = arith.constant dense<0.000000e+00> : vector<64xf32>
    %553 = vector.multi_reduction <add>, %552, %cst_159 [0] : vector<2x64xf32> to vector<64xf32>
    %554 = vector.shape_cast %553 : vector<64xf32> to vector<1x64xf32>
    %555 = vector.extract_strided_slice %14 {offsets = [7, 0], sizes = [1, 384], strides = [1, 1]} : vector<8x384xf32> to vector<1x384xf32>
    %cst_160 = arith.constant dense<0.000000e+00> : vector<1x384xf32>
    %556 = tpu.matmul %554, %31, %cst_160 {dimension_numbers = #tpu.dot_dimension_numbers<[1], [0], [0], [1], [0, 0, 1, 1], [], []>} : vector<1x64xf32>, vector<64x384xf32>, vector<1x384xf32> -> vector<1x384xf32>
    %557 = arith.addf %555, %556 : vector<1x384xf32>
    %cst_161 = arith.constant dense<0.000000e+00> : vector<1x384xf32>
    %558 = tpu.matmul %514, %32, %cst_161 {dimension_numbers = #tpu.dot_dimension_numbers<[1], [0], [0], [1], [0, 0, 1, 1], [], []>} : vector<1x128xf32>, vector<128x384xf32>, vector<1x384xf32> -> vector<1x384xf32>
    %559 = arith.addf %558, %33 : vector<1x384xf32>
    %560 = vector.extract_strided_slice %557 {offsets = [0, 0], sizes = [1, 128], strides = [1, 1]} : vector<1x384xf32> to vector<1x128xf32>
    %561 = vector.extract_strided_slice %559 {offsets = [0, 0], sizes = [1, 128], strides = [1, 1]} : vector<1x384xf32> to vector<1x128xf32>
    %562 = arith.addf %560, %561 : vector<1x128xf32>
    %563 = arith.negf %562 : vector<1x128xf32>
    %564 = math.exp %563 : vector<1x128xf32>
    %cst_162 = arith.constant 1.000000e+00 : f32
    %565 = vector.broadcast %cst_162 : f32 to vector<1x128xf32>
    %566 = arith.addf %565, %564 : vector<1x128xf32>
    %567 = arith.divf %565, %566 : vector<1x128xf32>
    %568 = vector.extract_strided_slice %557 {offsets = [0, 128], sizes = [1, 128], strides = [1, 1]} : vector<1x384xf32> to vector<1x128xf32>
    %569 = vector.extract_strided_slice %559 {offsets = [0, 128], sizes = [1, 128], strides = [1, 1]} : vector<1x384xf32> to vector<1x128xf32>
    %570 = arith.addf %568, %569 : vector<1x128xf32>
    %571 = arith.negf %570 : vector<1x128xf32>
    %572 = math.exp %571 : vector<1x128xf32>
    %cst_163 = arith.constant 1.000000e+00 : f32
    %573 = vector.broadcast %cst_163 : f32 to vector<1x128xf32>
    %574 = arith.addf %573, %572 : vector<1x128xf32>
    %575 = arith.divf %573, %574 : vector<1x128xf32>
    %576 = vector.extract_strided_slice %557 {offsets = [0, 256], sizes = [1, 128], strides = [1, 1]} : vector<1x384xf32> to vector<1x128xf32>
    %577 = vector.extract_strided_slice %559 {offsets = [0, 256], sizes = [1, 128], strides = [1, 1]} : vector<1x384xf32> to vector<1x128xf32>
    %578 = arith.mulf %567, %577 : vector<1x128xf32>
    %579 = arith.addf %576, %578 : vector<1x128xf32>
    %580 = math.tanh %579 : vector<1x128xf32>
    %cst_164 = arith.constant 1.000000e+00 : f32
    %581 = vector.broadcast %cst_164 : f32 to vector<1x128xf32>
    %582 = arith.subf %581, %575 : vector<1x128xf32>
    %583 = arith.mulf %582, %580 : vector<1x128xf32>
    %584 = arith.mulf %575, %514 : vector<1x128xf32>
    %585 = arith.addf %583, %584 : vector<1x128xf32>
    %586 = vector.extract_strided_slice %16 {offsets = [7, 0], sizes = [1, 64], strides = [1, 1]} : vector<8x64xf32> to vector<1x64xf32>
    %cst_165 = arith.constant dense<0.000000e+00> : vector<1x64xf32>
    %587 = tpu.matmul %554, %34, %cst_165 {dimension_numbers = #tpu.dot_dimension_numbers<[1], [0], [0], [1], [0, 0, 1, 1], [], []>} : vector<1x64xf32>, vector<64x64xf32>, vector<1x64xf32> -> vector<1x64xf32>
    %588 = arith.addf %586, %587 : vector<1x64xf32>
    %cst_166 = arith.constant dense<0.000000e+00> : vector<1x64xf32>
    %589 = tpu.matmul %585, %35, %cst_166 {dimension_numbers = #tpu.dot_dimension_numbers<[1], [0], [0], [1], [0, 0, 1, 1], [], []>} : vector<1x128xf32>, vector<128x64xf32>, vector<1x64xf32> -> vector<1x64xf32>
    %590 = arith.addf %588, %589 : vector<1x64xf32>
    %591 = vector.extract_strided_slice %590 {offsets = [0, 0], sizes = [1, 32], strides = [1, 1]} : vector<1x64xf32> to vector<1x32xf32>
    %592 = vector.extract_strided_slice %590 {offsets = [0, 32], sizes = [1, 32], strides = [1, 1]} : vector<1x64xf32> to vector<1x32xf32>
    %593 = arith.maximumf %591, %592 : vector<1x32xf32>
    %cst_167 = arith.constant dense<0.000000e+00> : vector<1x256xf32>
    %594 = tpu.matmul %593, %36, %cst_167 {dimension_numbers = #tpu.dot_dimension_numbers<[1], [0], [0], [1], [0, 0, 1, 1], [], []>} : vector<1x32xf32>, vector<32x256xf32>, vector<1x256xf32> -> vector<1x256xf32>
    %cst_168 = arith.constant dense<0xFF800000> : vector<1xf32>
    %595 = vector.multi_reduction <maximumf>, %594, %cst_168 [1] : vector<1x256xf32> to vector<1xf32>
    %596 = vector.shape_cast %595 : vector<1xf32> to vector<1x1xf32>
    %597 = vector.broadcast %596 : vector<1x1xf32> to vector<1x256xf32>
    %598 = arith.subf %594, %597 : vector<1x256xf32>
    %599 = math.exp %598 : vector<1x256xf32>
    %cst_169 = arith.constant dense<0.000000e+00> : vector<1xf32>
    %600 = vector.multi_reduction <add>, %599, %cst_169 [1] : vector<1x256xf32> to vector<1xf32>
    %601 = vector.shape_cast %600 : vector<1xf32> to vector<1x1xf32>
    %602 = vector.broadcast %601 : vector<1x1xf32> to vector<1x256xf32>
    %603 = arith.divf %599, %602 : vector<1x256xf32>
    %c7 = arith.constant 7 : index
    %c0_170 = arith.constant 0 : index
    %604 = vector.load %arg17[%c7, %c0_170] : memref<8x256xf32, #tpu.memory_space<vmem>>, vector<1x256xf32>
    tpu.vector_store %arg17[%c7, %c0_170], %603 {strides = array<i32>} : memref<8x256xf32, #tpu.memory_space<vmem>>, vector<1x256xf32>,
    return
  }
}

</mosaic_0001>

<bundles_post_ra>
// kernel: answer_synthesis_forward.1
= control target key start
LH: loop header
LB: loop body
LE: loop exit
PB: predicated region body
PF: predicated region fallthrough
CT: control target
= control target key end

     0   :  { %s12772_s0 = inlined_call_operand.hbm [shape: f32[6,64], index: 0, kind: input, shape index: {}]   ;;  %s12773_s1 = inlined_call_operand.hbm [shape: f32[20,64], index: 1, kind: input, shape index: {}]   ;;  %s12774_s2 = inlined_call_operand.hbm [shape: f32[8,64], index: 2, kind: input, shape index: {}]   ;;  %s12775_s3 = inlined_call_operand.hbm [shape: f32[64,64], index: 3, kind: input, shape index: {}]   ;;  %s12776_s4 = inlined_call_operand.vmem [shape: f32[1,64], index: 4, kind: input, shape index: {}]   ;;  %s12777_s5 = inlined_call_operand.hbm [shape: f32[64,64], index: 5, kind: input, shape index: {}]   ;;  %s12778_s6 = inlined_call_operand.hbm [shape: f32[64,64], index: 6, kind: input, shape index: {}]   ;;  %s12779_s7 = inlined_call_operand.hbm [shape: f32[64,1], index: 7, kind: input, shape index: {}]   ;;  %s12780_s8 = inlined_call_operand.hbm [shape: f32[64,384], index: 8, kind: input, shape index: {}]   ;;  %s12781_s9 = inlined_call_operand.hbm [shape: f32[64,384], index: 9, kind: input, shape index: {}]   ;;  %s12782_s10 = inlined_call_operand.hbm [shape: f32[128,384], index: 10, kind: input, shape index: {}]   ;;  %s12783_s11 = inlined_call_operand.vmem [shape: f32[1,384], index: 11, kind: input, shape index: {}]   ;;  %s12784_s12 = inlined_call_operand.vmem [shape: f32[1,384], index: 12, kind: input, shape index: {}]   ;;  %s12785_s13 = inlined_call_operand.hbm [shape: f32[64,64], index: 13, kind: input, shape index: {}]   ;;  %s12786_s14 = inlined_call_operand.hbm [shape: f32[64,64], index: 14, kind: input, shape index: {}]   ;;  %s12787_s15 = inlined_call_operand.hbm [shape: f32[128,64], index: 15, kind: input, shape index: {}]   ;;  %s12788_s16 = inlined_call_operand.hbm [shape: f32[32,256], index: 16, kind: input, shape index: {}]   ;;  %s12789_s17 = inlined_call_operand.hbm [shape: f32[8,256], index: 17, kind: output, shape index: {}]  }
   0x1   :  { %12902 = sst [smem:[#allocation89_spill]] %s12772_s0 }
   0x2   :  { %12903 = sst [smem:[#allocation90_spill]] %s12773_s1 }
   0x3   :  { %12904 = sst [smem:[#allocation91_spill]] %s12784_s12 }
   0x4   :  { %12905 = sst [smem:[#allocation92_spill]] %s12789_s17 }
   0x5   :  { %22 = vsyncpa [#allocation3], 0 }
   0x6   :  { %23 = vsyncpa [#allocation6], 0 }
   0x7   :  { %24 = vsyncpa [#allocation9], 0 }
   0x8   :  { %25 = vsyncpa [#allocation12], 0 }
   0x9   :  { %26 = vsyncpa [#allocation15], 0 }
   0xa   :  { %27 = vsyncpa [#allocation18], 0 }
   0xb   :  { %28 = vsyncpa [#allocation21], 0 }
   0xc   :  { %29 = vsyncpa [#allocation24], 0 }
   0xd   :  { %30 = vsyncpa [#allocation4], 0  ;;  %s10882_s24 = smov [#allocation5]   ;;  %s12906_s28 = sld [smem:[#allocation90_spill]] }
   0xe   :  { %s46_s25 = sshll.u32 %s10882_s24, 4  ;;  %s47_s25 = int_to_ptr.vmem [resolvable:$true] %s46_s25 }
  0x13   :  { %s10534_s29 = scalar_lea.hbm %s12906_s28, 384 }
  0x14   :  { %p10535_p0 = scmp.ne.s32.totalorder %s12906_s28, %s10534_s29  ;;  %p10538_p1 = scmp.lt.u32.totalorder %s10534_s29, %s12906_s28 }
  0x16   :  { %p10540_p2 = pnand %p10538_p1, %p10535_p0 }
  0x18   :  { %10543 = shalt.err (!%p10540_p2)
}
  0x19   :  { %s10544_s1 = scalar_lea.vmem %s47_s25, 384  ;;  %p10549_p4 = scmp.lt.s32.totalorder %s47_s25, %s47_s25 }
  0x1a   :  { %p10545_p3 = scmp.ne.s32.totalorder %s47_s25, %s10544_s1  ;;  %p10550_p5 = scmp.lt.s32.totalorder %s10544_s1, %s10544_s1 }
  0x1c   :  { %p10551_p6 = por %p10550_p5, %p10549_p4 }
  0x1e   :  { %p10552_p7 = pnand %p10551_p6, %p10545_p3 }
  0x20   :  { %10555 = shalt.err (!%p10552_p7)
}
  0x21   :  { %s10883_s20 = smov 128   ;;  %s10884_s21 = smov 8  }
  0x22   :  { %52 = dma.hbm_to_vmem [thread:$0]  %s12906_s28, 384, %s47_s25, [#allocation6], %s10883_s20, %s10883_s20, %s10884_s21  }
  0x23   :  { %s10885_s24 = smov [#allocation8]   ;;  %s10886_s27 = smov [#allocation11]  }
  0x24   :  { %s68_s26 = sshll.u32 %s10885_s24, 4  ;;  %s94_s29 = sshll.u32 %s10886_s27, 4  ;;  %s69_s26 = int_to_ptr.vmem [resolvable:$true] %s68_s26  ;;  %s95_s29 = int_to_ptr.vmem [resolvable:$true] %s94_s29 }
  0x25   :  { %s10556_s18 = scalar_lea.hbm %s12775_s3, 1024 }
  0x26   :  { %p10557_p8 = scmp.ne.s32.totalorder %s12775_s3, %s10556_s18  ;;  %p10560_p9 = scmp.lt.u32.totalorder %s10556_s18, %s12775_s3 }
  0x28   :  { %p10562_p10 = pnand %p10560_p9, %p10557_p8 }
  0x2a   :  { %10565 = shalt.err (!%p10562_p10)
}
  0x2b   :  { %s10566_s25 = scalar_lea.vmem %s69_s26, 1024  ;;  %p10571_p12 = scmp.lt.s32.totalorder %s69_s26, %s69_s26 }
  0x2c   :  { %p10567_p11 = scmp.ne.s32.totalorder %s69_s26, %s10566_s25  ;;  %p10572_p13 = scmp.lt.s32.totalorder %s10566_s25, %s10566_s25 }
  0x2e   :  { %p10573_p0 = por %p10572_p13, %p10571_p12 }
  0x30   :  { %p10574_p1 = pnand %p10573_p0, %p10567_p11 }
  0x32   :  { %10577 = shalt.err (!%p10574_p1)
}
  0x33   :  { %74 = dma.hbm_to_vmem [thread:$0]  %s12775_s3, 1024, %s69_s26, [#allocation9], %s10883_s20, %s10883_s20, %s10884_s21  }
  0x34   :  { %s10578_s17 = scalar_lea.hbm %s12778_s6, 1024 }
  0x35   :  { %p10579_p2 = scmp.ne.s32.totalorder %s12778_s6, %s10578_s17  ;;  %p10582_p3 = scmp.lt.u32.totalorder %s10578_s17, %s12778_s6 }
  0x37   :  { %p10584_p4 = pnand %p10582_p3, %p10579_p2 }
  0x39   :  { %10587 = shalt.err (!%p10584_p4)
}
  0x3a   :  { %s10588_s18 = scalar_lea.vmem %s95_s29, 1024  ;;  %p10593_p6 = scmp.lt.s32.totalorder %s95_s29, %s95_s29 }
  0x3b   :  { %p10589_p5 = scmp.ne.s32.totalorder %s95_s29, %s10588_s18  ;;  %p10594_p7 = scmp.lt.s32.totalorder %s10588_s18, %s10588_s18 }
  0x3d   :  { %p10595_p8 = por %p10594_p7, %p10593_p6 }
  0x3f   :  { %p10596_p9 = pnand %p10595_p8, %p10589_p5 }
  0x41   :  { %10599 = shalt.err (!%p10596_p9)
}
  0x42   :  { %100 = dma.hbm_to_vmem [thread:$0]  %s12778_s6, 1024, %s95_s29, [#allocation12], %s10883_s20, %s10883_s20, %s10884_s21  }
  0x43   :  { %s10887_s19 = smov [#allocation14]   ;;  %s10600_s22 = scalar_lea.hbm %s12780_s8, 3072 }
  0x44   :  { %s118_s1 = sshll.u32 %s10887_s19, 4  ;;  %p10601_p10 = scmp.ne.s32.totalorder %s12780_s8, %s10600_s22  ;;  %s119_s1 = int_to_ptr.vmem [resolvable:$true] %s118_s1 }
  0x45   :  { %p10604_p11 = scmp.lt.u32.totalorder %s10600_s22, %s12780_s8 }
  0x47   :  { %p10606_p12 = pnand %p10604_p11, %p10601_p10 }
  0x49   :  { %10609 = shalt.err (!%p10606_p12)
}
  0x4a   :  { %s10610_s27 = scalar_lea.vmem %s119_s1, 3072  ;;  %p10615_p0 = scmp.lt.s32.totalorder %s119_s1, %s119_s1 }
  0x4b   :  { %p10611_p13 = scmp.ne.s32.totalorder %s119_s1, %s10610_s27  ;;  %p10616_p1 = scmp.lt.s32.totalorder %s10610_s27, %s10610_s27 }
  0x4d   :  { %p10617_p2 = por %p10616_p1, %p10615_p0 }
  0x4f   :  { %p10618_p3 = pnand %p10617_p2, %p10611_p13 }
  0x51   :  { %10621 = shalt.err (!%p10618_p3)
}
  0x52   :  { %s10888_s6 = smov 384   ;;  %s10889_s29 = smov 24  }
  0x53   :  { %124 = dma.hbm_to_vmem [thread:$0]  %s12780_s8, 3072, %s119_s1, [#allocation15], %s10888_s6, %s10888_s6, %s10889_s29  }
  0x54   :  { %s10890_s18 = smov [#allocation17]   ;;  %s10891_s26 = smov [#allocation20]  }
  0x55   :  { %s142_s3 = sshll.u32 %s10890_s18, 4  ;;  %s170_s19 = sshll.u32 %s10891_s26, 4  ;;  %s143_s3 = int_to_ptr.vmem [resolvable:$true] %s142_s3  ;;  %s11060_s19 = int_to_ptr.vmem [resolvable:$true] %s170_s19 }
  0x56   :  { %s10622_s22 = scalar_lea.hbm %s12782_s10, 6144 }
  0x57   :  { %p10623_p4 = scmp.ne.s32.totalorder %s12782_s10, %s10622_s22  ;;  %p10626_p5 = scmp.lt.u32.totalorder %s10622_s22, %s12782_s10 }
  0x59   :  { %p10628_p6 = pnand %p10626_p5, %p10623_p4 }
  0x5b   :  { %10631 = shalt.err (!%p10628_p6)
}
  0x5c   :  { %s10632_s8 = scalar_lea.vmem %s143_s3, 6144  ;;  %p10637_p8 = scmp.lt.s32.totalorder %s143_s3, %s143_s3 }
  0x5d   :  { %p10633_p7 = scmp.ne.s32.totalorder %s143_s3, %s10632_s8  ;;  %p10638_p9 = scmp.lt.s32.totalorder %s10632_s8, %s10632_s8 }
  0x5f   :  { %p10639_p10 = por %p10638_p9, %p10637_p8 }
  0x61   :  { %p10640_p11 = pnand %p10639_p10, %p10633_p7 }
  0x63   :  { %10643 = shalt.err (!%p10640_p11)
}
  0x64   :  { %148 = dma.hbm_to_vmem [thread:$0]  %s12782_s10, 6144, %s143_s3, [#allocation18], %s10888_s6, %s10888_s6, %s10889_s29  }
  0x65   :  { %s10644_s18 = scalar_lea.hbm %s12786_s14, 1024 }
  0x66   :  { %p10645_p12 = scmp.ne.s32.totalorder %s12786_s14, %s10644_s18  ;;  %p10648_p13 = scmp.lt.u32.totalorder %s10644_s18, %s12786_s14 }
  0x68   :  { %p10650_p0 = pnand %p10648_p13, %p10645_p12 }
  0x6a   :  { %10653 = shalt.err (!%p10650_p0)
}
  0x6b   :  { %s10654_s23 = scalar_lea.vmem %s11060_s19, 1024  ;;  %p10659_p2 = scmp.lt.s32.totalorder %s11060_s19, %s11060_s19 }
  0x6c   :  { %p10655_p1 = scmp.ne.s32.totalorder %s11060_s19, %s10654_s23  ;;  %p10660_p3 = scmp.lt.s32.totalorder %s10654_s23, %s10654_s23 }
  0x6e   :  { %p10661_p4 = por %p10660_p3, %p10659_p2 }
  0x70   :  { %p10662_p5 = pnand %p10661_p4, %p10655_p1 }
  0x72   :  { %10665 = shalt.err (!%p10662_p5)
}
  0x73   :  { %176 = dma.hbm_to_vmem [thread:$0]  %s12786_s14, 1024, %s11060_s19, [#allocation21], %s10883_s20, %s10883_s20, %s10884_s21  }
  0x74   :  { %s10892_s12 = smov [#allocation2]   ;;  %s10893_s24 = smov [#allocation7]  }
  0x75   :  { %s37_s17 = sshll.u32 %s10892_s12, 4  ;;  %s59_s8 = sshll.u32 %s10893_s24, 4  ;;  %s38_s17 = int_to_ptr.vmem [resolvable:$true] %s37_s17  ;;  %s60_s8 = int_to_ptr.vmem [resolvable:$true] %s59_s8 }
  0x76   :  { %s12907_s0 = sld [smem:[#allocation89_spill]] }
  0x7c   :  { %s10666_s30 = scalar_lea.hbm %s12907_s0, 128 }
  0x7d   :  { %p10667_p6 = scmp.ne.s32.totalorder %s12907_s0, %s10666_s30  ;;  %p10670_p7 = scmp.lt.u32.totalorder %s10666_s30, %s12907_s0 }
  0x7f   :  { %p10672_p8 = pnand %p10670_p7, %p10667_p6 }
  0x81   :  { %10675 = shalt.err (!%p10672_p8)
}
  0x82   :  { %s10676_s14 = scalar_lea.vmem %s38_s17, 128  ;;  %p10681_p10 = scmp.lt.s32.totalorder %s38_s17, %s38_s17 }
  0x83   :  { %p10677_p9 = scmp.ne.s32.totalorder %s38_s17, %s10676_s14  ;;  %p10682_p11 = scmp.lt.s32.totalorder %s10676_s14, %s10676_s14 }
  0x85   :  { %p10683_p12 = por %p10682_p11, %p10681_p10 }
  0x87   :  { %p10684_p13 = pnand %p10683_p12, %p10677_p9 }
  0x89   :  { %10687 = shalt.err (!%p10684_p13)
}
  0x8a   :  { %40 = dma.hbm_to_vmem [thread:$0]  %s12907_s0, 128, %s38_s17, [#allocation3]  }
  0x8b   :  { %s10688_s3 = scalar_lea.hbm %s12774_s2, 128 }
  0x8c   :  { %p10689_p0 = scmp.ne.s32.totalorder %s12774_s2, %s10688_s3  ;;  %p10692_p1 = scmp.lt.u32.totalorder %s10688_s3, %s12774_s2 }
  0x8e   :  { %p10694_p2 = pnand %p10692_p1, %p10689_p0 }
  0x90   :  { %10697 = shalt.err (!%p10694_p2)
}
  0x91   :  { %s10698_s30 = scalar_lea.vmem %s60_s8, 128  ;;  %p10703_p4 = scmp.lt.s32.totalorder %s60_s8, %s60_s8 }
  0x92   :  { %p10699_p3 = scmp.ne.s32.totalorder %s60_s8, %s10698_s30  ;;  %p10704_p5 = scmp.lt.s32.totalorder %s10698_s30, %s10698_s30 }
  0x94   :  { %p10705_p6 = por %p10704_p5, %p10703_p4 }
  0x96   :  { %p10706_p7 = pnand %p10705_p6, %p10699_p3 }
  0x98   :  { %10709 = shalt.err (!%p10706_p7)
}
  0x99   :  { %62 = dma.hbm_to_vmem [thread:$0]  %s12774_s2, 128, %s60_s8, [#allocation6]  }
  0x9a   :  { %s10894_s18 = smov [#allocation10]   ;;  %s10895_s25 = smov [#allocation13]  }
  0x9b   :  { %s82_s26 = sshll.u32 %s10894_s18, 4  ;;  %s106_s28 = sshll.u32 %s10895_s25, 4  ;;  %s83_s26 = int_to_ptr.vmem [resolvable:$true] %s82_s26  ;;  %s11121_s28 = int_to_ptr.vmem [resolvable:$true] %s106_s28 }
  0x9c   :  { %s10710_s22 = scalar_lea.hbm %s12777_s5, 1024 }
  0x9d   :  { %p10711_p8 = scmp.ne.s32.totalorder %s12777_s5, %s10710_s22  ;;  %p10714_p9 = scmp.lt.u32.totalorder %s10710_s22, %s12777_s5 }
  0x9f   :  { %p10716_p10 = pnand %p10714_p9, %p10711_p8 }
  0xa1   :  { %10719 = shalt.err (!%p10716_p10)
}
  0xa2   :  { %s10720_s2 = scalar_lea.vmem %s83_s26, 1024  ;;  %p10725_p12 = scmp.lt.s32.totalorder %s83_s26, %s83_s26 }
  0xa3   :  { %p10721_p11 = scmp.ne.s32.totalorder %s83_s26, %s10720_s2  ;;  %p10726_p13 = scmp.lt.s32.totalorder %s10720_s2, %s10720_s2 }
  0xa5   :  { %p10727_p0 = por %p10726_p13, %p10725_p12 }
  0xa7   :  { %p10728_p1 = pnand %p10727_p0, %p10721_p11 }
  0xa9   :  { %10731 = shalt.err (!%p10728_p1)
}
  0xaa   :  { %88 = dma.hbm_to_vmem [thread:$0]  %s12777_s5, 1024, %s83_s26, [#allocation9], %s10883_s20, %s10883_s20, %s10884_s21  }
  0xab   :  { %s10732_s30 = scalar_lea.hbm %s12779_s7, 1024 }
  0xac   :  { %p10733_p2 = scmp.ne.s32.totalorder %s12779_s7, %s10732_s30  ;;  %p10736_p3 = scmp.lt.u32.totalorder %s10732_s30, %s12779_s7 }
  0xae   :  { %p10738_p4 = pnand %p10736_p3, %p10733_p2 }
  0xb0   :  { %10741 = shalt.err (!%p10738_p4)
}
  0xb1   :  { %s10742_s14 = scalar_lea.vmem %s11121_s28, 1024  ;;  %p10747_p6 = scmp.lt.s32.totalorder %s11121_s28, %s11121_s28 }
  0xb2   :  { %p10743_p5 = scmp.ne.s32.totalorder %s11121_s28, %s10742_s14  ;;  %p10748_p7 = scmp.lt.s32.totalorder %s10742_s14, %s10742_s14 }
  0xb4   :  { %p10749_p8 = por %p10748_p7, %p10747_p6 }
  0xb6   :  { %p10750_p9 = pnand %p10749_p8, %p10743_p5 }
  0xb8   :  { %10753 = shalt.err (!%p10750_p9)
}
  0xb9   :  { %112 = dma.hbm_to_vmem [thread:$0]  %s12779_s7, 1024, %s11121_s28, [#allocation12], %s10883_s20, %s10883_s20, %s10884_s21  }
  0xba   :  { %s10896_s19 = smov [#allocation16]   ;;  %s10897_s23 = smov [#allocation19]  }
  0xbb   :  { %s130_s22 = sshll.u32 %s10896_s19, 4  ;;  %s158_s10 = sshll.u32 %s10897_s23, 4  ;;  %s131_s22 = int_to_ptr.vmem [resolvable:$true] %s130_s22  ;;  %s11158_s10 = int_to_ptr.vmem [resolvable:$true] %s158_s10 }
  0xbc   :  { %s10754_s2 = scalar_lea.hbm %s12781_s9, 3072 }
  0xbd   :  { %p10755_p10 = scmp.ne.s32.totalorder %s12781_s9, %s10754_s2  ;;  %p10758_p11 = scmp.lt.u32.totalorder %s10754_s2, %s12781_s9 }
  0xbf   :  { %p10760_p12 = pnand %p10758_p11, %p10755_p10 }
  0xc1   :  { %10763 = shalt.err (!%p10760_p12)
}
  0xc2   :  { %s10764_s7 = scalar_lea.vmem %s131_s22, 3072  ;;  %p10769_p0 = scmp.lt.s32.totalorder %s131_s22, %s131_s22 }
  0xc3   :  { %p10765_p13 = scmp.ne.s32.totalorder %s131_s22, %s10764_s7  ;;  %p10770_p1 = scmp.lt.s32.totalorder %s10764_s7, %s10764_s7 }
  0xc5   :  { %p10771_p2 = por %p10770_p1, %p10769_p0 }
  0xc7   :  { %p10772_p3 = pnand %p10771_p2, %p10765_p13 }
  0xc9   :  { %10775 = shalt.err (!%p10772_p3)
}
  0xca   :  { %136 = dma.hbm_to_vmem [thread:$0]  %s12781_s9, 3072, %s131_s22, [#allocation15], %s10888_s6, %s10888_s6, %s10889_s29  }
  0xcb   :  { %s10776_s18 = scalar_lea.hbm %s12785_s13, 1024 }
  0xcc   :  { %p10777_p4 = scmp.ne.s32.totalorder %s12785_s13, %s10776_s18  ;;  %p10780_p5 = scmp.lt.u32.totalorder %s10776_s18, %s12785_s13 }
  0xce   :  { %p10782_p6 = pnand %p10780_p5, %p10777_p4 }
  0xd0   :  { %10785 = shalt.err (!%p10782_p6)
}
  0xd1   :  { %s10786_s19 = scalar_lea.vmem %s11158_s10, 1024  ;;  %p10791_p8 = scmp.lt.s32.totalorder %s11158_s10, %s11158_s10 }
  0xd2   :  { %p10787_p7 = scmp.ne.s32.totalorder %s11158_s10, %s10786_s19  ;;  %p10792_p9 = scmp.lt.s32.totalorder %s10786_s19, %s10786_s19 }
  0xd4   :  { %p10793_p10 = por %p10792_p9, %p10791_p8 }
  0xd6   :  { %p10794_p11 = pnand %p10793_p10, %p10787_p7 }
  0xd8   :  { %10797 = shalt.err (!%p10794_p11)
}
  0xd9   :  { %164 = dma.hbm_to_vmem [thread:$0]  %s12785_s13, 1024, %s11158_s10, [#allocation18], %s10883_s20, %s10883_s20, %s10884_s21  }
  0xda   :  { %s10898_s29 = smov [#allocation22]   ;;  %s10899_s23 = smov [#allocation23]  }
  0xdb   :  { %s182_s22 = sshll.u32 %s10898_s29, 4  ;;  %s194_s3 = sshll.u32 %s10899_s23, 4  ;;  %s183_s22 = int_to_ptr.vmem [resolvable:$true] %s182_s22  ;;  %s11195_s3 = int_to_ptr.vmem [resolvable:$true] %s194_s3 }
  0xdc   :  { %s10798_s8 = scalar_lea.hbm %s12787_s15, 2048 }
  0xdd   :  { %p10799_p12 = scmp.ne.s32.totalorder %s12787_s15, %s10798_s8  ;;  %p10802_p13 = scmp.lt.u32.totalorder %s10798_s8, %s12787_s15 }
  0xdf   :  { %p10804_p0 = pnand %p10802_p13, %p10799_p12 }
  0xe1   :  { %10807 = shalt.err (!%p10804_p0)
}
  0xe2   :  { %s10808_s13 = scalar_lea.vmem %s183_s22, 2048  ;;  %p10813_p2 = scmp.lt.s32.totalorder %s183_s22, %s183_s22 }
  0xe3   :  { %p10809_p1 = scmp.ne.s32.totalorder %s183_s22, %s10808_s13  ;;  %p10814_p3 = scmp.lt.s32.totalorder %s10808_s13, %s10808_s13 }
  0xe5   :  { %p10815_p4 = por %p10814_p3, %p10813_p2 }
  0xe7   :  { %p10816_p5 = pnand %p10815_p4, %p10809_p1 }
  0xe9   :  { %10819 = shalt.err (!%p10816_p5)
}
  0xea   :  { %188 = dma.hbm_to_vmem [thread:$0]  %s12787_s15, 2048, %s183_s22, [#allocation21], %s10883_s20, %s10883_s20, %s10884_s21  }
  0xeb   :  { %s10820_s0 = scalar_lea.hbm %s12788_s16, 1024 }
  0xec   :  { %p10821_p6 = scmp.ne.s32.totalorder %s12788_s16, %s10820_s0  ;;  %p10824_p7 = scmp.lt.u32.totalorder %s10820_s0, %s12788_s16 }
  0xee   :  { %p10826_p8 = pnand %p10824_p7, %p10821_p6 }
  0xf0   :  { %10829 = shalt.err (!%p10826_p8)
}
  0xf1   :  { %s10830_s26 = scalar_lea.vmem %s11195_s3, 1024  ;;  %p10835_p10 = scmp.lt.s32.totalorder %s11195_s3, %s11195_s3 }
  0xf2   :  { %p10831_p9 = scmp.ne.s32.totalorder %s11195_s3, %s10830_s26  ;;  %p10836_p11 = scmp.lt.s32.totalorder %s10830_s26, %s10830_s26 }
  0xf4   :  { %p10837_p12 = por %p10836_p11, %p10835_p10 }
  0xf6   :  { %p10838_p13 = pnand %p10837_p12, %p10831_p9 }
  0xf8   :  { %10841 = shalt.err (!%p10838_p13)
}
  0xf9   :  { %s10900_s15 = smov 256   ;;  %s10901_s20 = smov 16  }
  0xfa   :  { %200 = dma.hbm_to_vmem [thread:$0]  %s12788_s16, 1024, %s11195_s3, [#allocation24], %s10900_s15, %s10900_s15, %s10901_s20  }
  0xfb   :  { %10864 = dma.done.wait [#allocation3], 128  }
  0xfc   :  { %10865 = vsyncadd [#allocation3], 4294967168 }
  0xfd   :  { %10866 = dma.done.wait [#allocation6], 512  }
  0xfe   :  { %10867 = vsyncadd [#allocation6], 4294966784 }
  0xff   :  { %10868 = dma.done.wait [#allocation9], 2048  }
 0x100   :  { %10869 = vsyncadd [#allocation9], 4294965248 }
 0x101   :  { %10870 = dma.done.wait [#allocation12], 2048  }
 0x102   :  { %10871 = vsyncadd [#allocation12], 4294965248 }
 0x103   :  { %10872 = dma.done.wait [#allocation15], 6144  }
 0x104   :  { %10873 = vsyncadd [#allocation15], 4294961152 }
 0x105   :  { %10874 = dma.done.wait [#allocation18], 7168  }
 0x106   :  { %10875 = vsyncadd [#allocation18], 4294960128 }
 0x107   :  { %10876 = dma.done.wait [#allocation21], 3072  }
 0x108   :  { %10877 = vsyncadd [#allocation21], 4294964224 }
 0x109   :  { %10878 = dma.done.wait [#allocation24], 1024  }
 0x10a   :  { %10879 = vsyncadd [#allocation24], 4294966272  ;;  %v12812_v0 = vmov 0.0|0.0   ;;  %vm10903_vm0 = vmmov 0   ;;  %v12800_v1 = vmov 0.0   ;;  %v269_v2 = vld [vmem:[#allocation11] sm:$0xff] }
 0x10b   :  { %9037 = vmatprep.subr.bf16.mxu0 %v12812_v0  ;;  %7809 = vmatprep.mubr.msk.f32.mxu0 %vm10903_vm0, %v12800_v1  ;;  %v270_v3 = vld [vmem:[#allocation11 + $0x8] sm:$0xff]  ;;  %v271_v4 = vld [vmem:[#allocation11 + $0x10] sm:$0xff]  ;;  %vm244_vm1 = vcmask 521216   ;;  %v272_v6 = vld [vmem:[#allocation11 + $0x18] sm:$0xff]  ;;  %vm255_vm2 = vcmask 523264   ;;  %vm259_vm3 = vcmask 519168  }
 0x10c   :  { %459 = vmatprep.mubr.f32.mxu1 %v12800_v1  ;;  %v9038_v5 = vpack.c.bf16 %v270_v3, %v269_v2  ;;  %v243_v7 = vld [vmem:[#allocation2] sm:$0x3f]  ;;  %v9041_v8 = vpack.c.bf16 %v272_v6, %v271_v4  ;;  %v252_v10 = vld [vmem:[#allocation5] sm:$0xff]  ;;  %v253_v11 = vld [vmem:[#allocation5 + $0x8] sm:$0xff]  ;;  %vm619_vm4 = vcmask 1040384   ;;  %vm994_vm5 = vcmask 1024  }
 0x10d   :  { %v245_v9 = vsel %vm244_vm1, %v243_v7, 0.0  ;;  %v254_v12 = vld [vmem:[#allocation5 + $0x10] sm:$0xf]  ;;  %v273_v13 = vld [vmem:[#allocation11 + $0x20] sm:$0xff]  ;;  %v274_v14 = vld [vmem:[#allocation11 + $0x28] sm:$0xff]  ;;  %v256_v16 = vsel %vm255_vm2, %v252_v10, 0.0 }
 0x10e   :  { %9039 = vmatpush3.bf16.msra.mxu0 %v9038_v5  ;;  %v246_v15 = vrot.slane %v245_v9, 4  ;;  %v257_v17 = vsel %vm255_vm2, %v253_v11, 0.0  ;;  %v260_v18 = vsel %vm259_vm3, %v254_v12, 0.0  ;;  %v9044_v21 = vpack.c.bf16 %v274_v14, %v273_v13  ;;  %v275_v23 = vld [vmem:[#allocation11 + $0x30] sm:$0xff]  ;;  %v276_v24 = vld [vmem:[#allocation11 + $0x38] sm:$0xff]  ;;  %v356_v36 = vld [vmem:[#allocation14 + $0x28] sm:$0xff] }
 0x10f   :  { %9040 = vmatprep.subr.bf16.mxu0 %v12812_v0  ;;  %v258_v19 = vadd.f32 %v257_v17, %v256_v16  ;;  %v9047_v28 = vpack.c.bf16 %v276_v24, %v275_v23  ;;  %v353_v35 = vld [vmem:[#allocation14 + $0x10] sm:$0xff]  ;;  %v359_v40 = vld [vmem:[#allocation14 + $0x40] sm:$0xff]  ;;  %v362_v41 = vld [vmem:[#allocation14 + $0x58] sm:$0xff]  ;;  %vm1020_vm6 = vcmask 517120   ;;  %s12940_s3 = sld [smem:[#allocation91_spill]]  ;;  %vm1500_vm7 = vcmask 261120  }
 0x110   :  { %v247_v20 = vadd.f32 %v246_v15, %v245_v9  ;;  %v9066_v38 = vpack.c.bf16 %v356_v36, %v353_v35  ;;  %v9069_v42 = vpack.c.bf16 %v362_v41, %v359_v40  ;;  %v365_v43 = vld [vmem:[#allocation14 + $0x70] sm:$0xff]  ;;  %v368_v44 = vld [vmem:[#allocation14 + $0x88] sm:$0xff]  ;;  %v371_v46 = vld [vmem:[#allocation14 + $0xa0] sm:$0xff]  ;;  %s10909_s12 = smov [#allocation25]  }
 0x111   :  { %v261_v22 = vadd.f32 %v260_v18, %v258_v19  ;;  %v9072_v45 = vpack.c.bf16 %v368_v44, %v365_v43  ;;  %v374_v47 = vld [vmem:[#allocation14 + $0xb8] sm:$0xff]  ;;  %v621_v49 = vld [vmem:[#allocation8] sm:$0xff]  ;;  %v622_v50 = vld [vmem:[#allocation8 + $0x8] sm:$0xff]  ;;  %s7111_s2 = sshll.u32 %s10909_s12, 4  ;;  %s7112_s2 = int_to_ptr.vmem [resolvable:$true] %s7111_s2 }
 0x112   :  { %9042 = vmatpush3.bf16.msra.mxu0 %v9041_v8  ;;  %v248_v25 = vrot.slane %v247_v20, 2  ;;  %v9075_v48 = vpack.c.bf16 %v374_v47, %v371_v46  ;;  %v11245_v51 = vld [vmem:[#allocation7] sm:$0xff]  ;;  %v9090_v52 = vpack.c.bf16 %v622_v50, %v621_v49  ;;  %v623_v53 = vld [vmem:[#allocation8 + $0x10] sm:$0xff]  ;;  %v625_v56 = vld [vmem:[#allocation8 + $0x20] sm:$0xff]  ;;  %s10842_s8 = scalar_lea.vmem %s7112_s2, 256  ;;  %p10847_p1 = scmp.lt.s32.totalorder %s7112_s2, %s7112_s2 }
 0x113   :  { %9043 = vmatprep.subr.bf16.mxu0 %v12812_v0  ;;  %v262_v26 = vrot.slane %v261_v22, 4  ;;  %v624_v54 = vld [vmem:[#allocation8 + $0x18] sm:$0xff]  ;;  %v626_v57 = vld [vmem:[#allocation8 + $0x28] sm:$0xff]  ;;  %v627_v59 = vld [vmem:[#allocation8 + $0x30] sm:$0xff]  ;;  %p10843_p0 = scmp.ne.s32.totalorder %s7112_s2, %s10842_s8  ;;  %p10848_p2 = scmp.lt.s32.totalorder %s10842_s8, %s10842_s8 }
 0x114   :  { %v249_v27 = vadd.f32 %v248_v25, %v247_v20  ;;  %v9093_v55 = vpack.c.bf16 %v624_v54, %v623_v53  ;;  %v9096_v58 = vpack.c.bf16 %v626_v57, %v625_v56  ;;  %v628_v60 = vld [vmem:[#allocation8 + $0x38] sm:$0xff]  ;;  %v615_v61 = vld [vmem:[#allocation5] sm:$0x1]  ;;  %v352_v12 = vld [vmem:[#allocation14 + $0x8] sm:$0xff] }
 0x115   :  { %v263_v29 = vadd.f32 %v262_v26, %v261_v22  ;;  %v9099_v62 = vpack.c.bf16 %v628_v60, %v627_v59  ;;  %v617_v63 = vrot.slane %v615_v61, 7  ;;  %v614_v2 = vld [vmem:[#allocation2] sm:$0x1]  ;;  %v355_v13 = vld [vmem:[#allocation14 + $0x20] sm:$0xff]  ;;  %v361_v18 = vld [vmem:[#allocation14 + $0x50] sm:$0xff]  ;;  %p10849_p3 = por %p10848_p2, %p10847_p1 }
 0x116   :  { %9045 = vmatpush3.bf16.msra.mxu0 %v9044_v21  ;;  %v250_v30 = vrot.slane %v249_v27, 1  ;;  %v7131_v8 = vld [vmem:[%s12776_s4] ss:$0 sm:$0xff]  ;;  %v351_v14 = vld [vmem:[#allocation14] sm:$0xff]  ;;  %v9049_v15 = vpack.c.bf16 %v355_v13, %v352_v12  ;;  %v357_v21 = vld [vmem:[#allocation14 + $0x30] sm:$0xff]  ;;  %s10905_s4 = smov 64  }
 0x117   :  { %9046 = vmatprep.subr.bf16.mxu0 %v12812_v0  ;;  %v264_v31 = vrot.slane %v263_v29, 2  ;;  %v620_v3 = vsel %vm619_vm4, %v614_v2, %v617_v63  ;;  %v354_v16 = vld [vmem:[#allocation14 + $0x18] sm:$0xff]  ;;  %v360_v22 = vld [vmem:[#allocation14 + $0x48] sm:$0xff]  ;;  %v367_v24 = vld [vmem:[#allocation14 + $0x80] sm:$0xff]  ;;  %p10850_p4 = pnand %p10849_p3, %p10843_p0 }
 0x118   :  { %v251_v33 = vadd.f32 %v250_v30, %v249_v27  ;;  %v358_v17 = vld [vmem:[#allocation14 + $0x38] sm:$0xff]  ;;  %v9051_v19 = vpack.c.bf16 %v354_v16, %v351_v14  ;;  %v364_v23 = vld [vmem:[#allocation14 + $0x68] sm:$0xff]  ;;  %9050 = vmatprep.subr.bf16.mxu1 %v9049_v15  ;;  %v9055_v25 = vpack.c.bf16 %v360_v22, %v357_v21  ;;  %v363_v27 = vld [vmem:[#allocation14 + $0x60] sm:$0xff] }
 0x119   :  { %v265_v32 = vadd.f32 %v264_v31, %v263_v29  ;;  %v9053_v20 = vpack.c.bf16 %v361_v18, %v358_v17  ;;  %v9057_v26 = vpack.c.bf16 %v367_v24, %v364_v23  ;;  %v370_v29 = vld [vmem:[#allocation14 + $0x98] sm:$0xff]  ;;  %v373_v30 = vld [vmem:[#allocation14 + $0xb0] sm:$0xff]  ;;  %v372_v36 = vld [vmem:[#allocation14 + $0xa8] sm:$0xff]  ;;  %v12793_v23 = vlaneseq }
 0x11a   :  { %9048 = vmatpush3.bf16.msra.mxu0 %v9047_v28  ;;  %9052 = vmatpush1.bf16.msra.mxu1 %v9051_v19  ;;  %v366_v28 = vld [vmem:[#allocation14 + $0x78] sm:$0xff]  ;;  %v369_v35 = vld [vmem:[#allocation14 + $0x90] sm:$0xff]  ;;  %v540_v44 = vld [vmem:[#allocation19 + $0x20] sm:$0xff] }
 0x11b   :  { %9065 = vmatprep.subr.bf16.mxu0 %v12812_v0  ;;  %v266_v34 = vrot.slane %v265_v32, 1  ;;  %9054 = vmatprep.subr.bf16.mxu1 %v9053_v20  ;;  %v538_v41 = vld [vmem:[#allocation19 + $0x10] sm:$0xff]  ;;  %v716_v50 = vld [vmem:[#allocation10] sm:$0xff]  ;;  %v723_v61 = vld [vmem:[#allocation10 + $0x38] sm:$0xff]  ;;  %v11335_v24 = vshrl.u32 %v12793_v23, 7 }
 0x11c   :  { %v542_v47 = vld [vmem:[#allocation19 + $0x30] sm:$0xff]  ;;  %v720_v57 = vld [vmem:[#allocation10 + $0x20] sm:$0xff]  ;;  %v725_v63 = vld [vmem:[#allocation13 + $0x8] sm:$0xff] }
 0x11d   :  { %v267_v37 = vadd.f32 %v266_v34, %v265_v32  ;;  %v9061_v34 = vpack.c.bf16 %v373_v30, %v370_v29  ;;  %v718_v54 = vld [vmem:[#allocation10 + $0x10] sm:$0xff]  ;;  %v727_v15 = vld [vmem:[#allocation13 + $0x18] sm:$0xff]  ;;  %v728_v17 = vld [vmem:[#allocation13 + $0x20] sm:$0xff]  ;;  %12916 = vst [vmem:[#allocation43_spill] sm:$0xff] %v11335_v24 }
 0x11e   :  { %9056 = vmatpush1.bf16.msra.mxu1 %v9055_v25  ;;  %v722_v60 = vld [vmem:[#allocation10 + $0x30] sm:$0xff]  ;;  %v729_v18 = vld [vmem:[#allocation13 + $0x28] sm:$0xff]  ;;  %v731_v21 = vld [vmem:[#allocation13 + $0x38] sm:$0xff]  ;;  %v11338_v25 = vsub.s32 0, %v11335_v24 }
 0x11f   :  { %v268_v39 = vadd.f32 %v267_v37, %v251_v33  ;;  %v9059_v33 = vpack.c.bf16 %v366_v28, %v363_v27  ;;  %9058 = vmatprep.subr.bf16.mxu1 %v9057_v26  ;;  %v9063_v37 = vpack.c.bf16 %v372_v36, %v369_v35  ;;  %v726_v14 = vld [vmem:[#allocation13 + $0x10] sm:$0xff]  ;;  %v11326_v19 = vpack.c.bf16 %v729_v18, %v728_v17  ;;  %v740_v17 = vld [vmem:[#allocation16 + $0x40] sm:$0xff] }
 0x120   :  { %v11322_v16 = vpack.c.bf16 %v727_v15, %v726_v14  ;;  %v730_v20 = vld [vmem:[#allocation13 + $0x30] sm:$0xff]  ;;  %v741_v15 = vld [vmem:[#allocation16 + $0x48] sm:$0xff] }
 0x121   :  { %7810 = vmatmul.mubr.msk.f32.vlgmr.msra.gmra.mrb[0].mxu0 %vm255_vm2, %v268_v39  ;;  %v537_v39 = vld [vmem:[#allocation19 + $0x8] sm:$0xff]  ;;  %12914 = vst [vmem:[#allocation41_spill] sm:$0xff] %v11326_v19  ;;  %v11329_v22 = vpack.c.bf16 %v731_v21, %v730_v20  ;;  %v734_v36 = vld [vmem:[#allocation16 + $0x10] sm:$0xff]  ;;  %v743_v20 = vld [vmem:[#allocation16 + $0x58] sm:$0xff] }
 0x122   :  { %9067 = vmatpush3.bf16.msra.mxu0 %v9066_v38  ;;  %7828 = vmatprep.mubr.msk.f32.mxu0 %vm10903_vm0, %v12800_v1  ;;  %v536_v38 = vld [vmem:[#allocation19] sm:$0xff]  ;;  %12913 = vst [vmem:[#allocation40_spill] sm:$0xff] %v11322_v16  ;;  %v738_v14 = vld [vmem:[#allocation16 + $0x30] sm:$0xff]  ;;  %v11365_v21 = vpack.c.bf16 %v743_v20, %v740_v17 }
 0x123   :  { %9068 = vmatprep.subr.bf16.mxu0 %v12812_v0  ;;  %9060 = vmatpush1.bf16.msra.mxu1 %v9059_v33  ;;  %v9078_v40 = vpack.c.bf16 %v537_v39, %v536_v38  ;;  %12915 = vst [vmem:[#allocation42_spill] sm:$0xff] %v11329_v22  ;;  %v736_v33 = vld [vmem:[#allocation16 + $0x20] sm:$0xff]  ;;  %v11362_v18 = vpack.c.bf16 %v741_v15, %v738_v14  ;;  %v762_v20 = vld [vmem:[#allocation17 + $0x30] sm:$0xff] }
 0x124   :  { %9062 = vmatprep.subr.bf16.mxu1 %v9061_v34  ;;  %v732_v34 = vld [vmem:[#allocation16] sm:$0xff]  ;;  %12920 = vst [vmem:[#allocation47_spill] sm:$0xff] %v11365_v21 }
 0x126   :  { %9070 = vmatpush3.bf16.msra.mxu0 %v9069_v42  ;;  %v539_v42 = vld [vmem:[#allocation19 + $0x18] sm:$0xff] }
 0x127   :  { %9071 = vmatprep.subr.bf16.mxu0 %v12812_v0  ;;  %9064 = vmatpush1.bf16.msra.mxu1 %v9063_v37  ;;  %v9081_v43 = vpack.c.bf16 %v539_v42, %v538_v41  ;;  %v737_v37 = vld [vmem:[#allocation16 + $0x28] sm:$0xff] }
 0x128   :  { %9077 = vmatprep.subr.bf16.mxu1 %v12812_v0  ;;  %v11352_v39 = vpack.c.bf16 %v737_v37, %v734_v36  ;;  %v751_v36 = vld [vmem:[#allocation16 + $0x98] sm:$0xff]  ;;  %v754_v37 = vld [vmem:[#allocation16 + $0xb0] sm:$0xff] }
 0x12a   :  { %9073 = vmatpush3.bf16.msra.mxu0 %v9072_v45  ;;  %7128 = vmatmul.mubr.msk.f32.vlgmr.msra.gmra.mrb[0].mxu1 %vm255_vm2, %v11245_v51  ;;  %v541_v45 = vld [vmem:[#allocation19 + $0x28] sm:$0xff]  ;;  %12919 = vst [vmem:[#allocation46_spill] sm:$0xff] %v11352_v39 }
 0x12b   :  { %9074 = vmatprep.subr.bf16.mxu0 %v12812_v0  ;;  %9079 = vmatpush3.bf16.msra.mxu1 %v9078_v40  ;;  %v9084_v46 = vpack.c.bf16 %v541_v45, %v540_v44 }
 0x12c   :  { %7847 = vmatprep.mubr.msk.f32.mxu1 %vm10903_vm0, %v12800_v1  ;;  %9080 = vmatprep.subr.bf16.mxu1 %v12812_v0 }
 0x12e   :  { %9076 = vmatpush3.bf16.msra.mxu0 %v9075_v48  ;;  %v543_v48 = vld [vmem:[#allocation19 + $0x38] sm:$0xff] }
 0x12f   :  { %9089 = vmatprep.subr.bf16.mxu0 %v12812_v0  ;;  %9082 = vmatpush3.bf16.msra.mxu1 %v9081_v43  ;;  %v9087_v49 = vpack.c.bf16 %v543_v48, %v542_v47 }
 0x130   :  { %9083 = vmatprep.subr.bf16.mxu1 %v12812_v0 }
 0x131   :  { %7829 = vmatmul.mubr.msk.f32.vlgmr.msra.gmra.mrb[2].mxu0 %vm255_vm2, %v11245_v51 }
 0x132   :  { %9091 = vmatpush3.bf16.msra.mxu0 %v9090_v52  ;;  %7866 = vmatprep.mubr.msk.f32.mxu0 %vm10903_vm0, %v12800_v1  ;;  %v717_v52 = vld [vmem:[#allocation10 + $0x8] sm:$0xff] }
 0x133   :  { %9092 = vmatprep.subr.bf16.mxu0 %v12812_v0  ;;  %9085 = vmatpush3.bf16.msra.mxu1 %v9084_v46  ;;  %v11279_v53 = vpack.c.bf16 %v717_v52, %v716_v50 }
 0x134   :  { %9086 = vmatprep.subr.bf16.mxu1 %v12812_v0 }
 0x135   :  { %12908 = vst [vmem:[#allocation35_spill] sm:$0xff] %v11279_v53 }
 0x136   :  { %9094 = vmatpush3.bf16.msra.mxu0 %v9093_v55  ;;  %v719_v55 = vld [vmem:[#allocation10 + $0x18] sm:$0xff] }
 0x137   :  { %9095 = vmatprep.subr.bf16.mxu0 %v12812_v0  ;;  %9088 = vmatpush3.bf16.msra.mxu1 %v9087_v49  ;;  %v11285_v56 = vpack.c.bf16 %v719_v55, %v718_v54 }
 0x138   :  { %9101 = vmatprep.subr.bf16.mxu1 %v12812_v0 }
 0x139   :  { %12909 = vst [vmem:[#allocation36_spill] sm:$0xff] %v11285_v56 }
 0x13a   :  { %9097 = vmatpush3.bf16.msra.mxu0 %v9096_v58  ;;  %7848 = vmatmul.mubr.msk.f32.vlgmr.msra.gmra.mrb[2].mxu1 %vm255_vm2, %v11245_v51  ;;  %v721_v58 = vld [vmem:[#allocation10 + $0x28] sm:$0xff]  ;;  %v11295_v51 = vpack.c.bf16 %v723_v61, %v722_v60 }
 0x13b   :  { %9098 = vmatprep.subr.bf16.mxu0 %v12812_v0  ;;  %9103 = vmatpush3.bf16.msra.mxu1 %v11279_v53  ;;  %v11291_v59 = vpack.c.bf16 %v721_v58, %v720_v57 }
 0x13c   :  { %7885 = vmatprep.mubr.msk.f32.mxu1 %vm10903_vm0, %v12800_v1  ;;  %9104 = vmatprep.subr.bf16.mxu1 %v12812_v0  ;;  %12911 = vst [vmem:[#allocation38_spill] sm:$0xff] %v11295_v51 }
 0x13d   :  { %12910 = vst [vmem:[#allocation37_spill] sm:$0xff] %v11291_v59 }
 0x13e   :  { %9100 = vmatpush3.bf16.msra.mxu0 %v9099_v62  ;;  %v724_v62 = vld [vmem:[#allocation13] sm:$0xff] }
 0x13f   :  { %9113 = vmatprep.subr.bf16.mxu0 %v12812_v0  ;;  %9106 = vmatpush3.bf16.msra.mxu1 %v11285_v56  ;;  %v11299_v2 = vpack.c.bf16 %v725_v63, %v724_v62 }
 0x140   :  { %9107 = vmatprep.subr.bf16.mxu1 %v12812_v0 }
 0x141   :  { %7867 = vmatmul.mubr.msk.f32.vlgmr.msra.gmra.mrb[4].mxu0 %vm255_vm2, %v620_v3  ;;  %12912 = vst [vmem:[#allocation39_spill] sm:$0xff] %v11299_v2 }
 0x142   :  { %7904 = vmatprep.mubr.msk.f32.mxu0 %vm10903_vm0, %v12800_v1  ;;  %9115 = vmatpush3.bf16.msra.mxu0 %v11299_v2 }
 0x143   :  { %9109 = vmatpush3.bf16.msra.mxu1 %v11291_v59  ;;  %9116 = vmatprep.subr.bf16.mxu0 %v12812_v0 }
 0x144   :  { %9110 = vmatprep.subr.bf16.mxu1 %v12812_v0 }
 0x146   :  { %9118 = vmatpush3.bf16.msra.mxu0 %v11322_v16 }
 0x147   :  { %9112 = vmatpush3.bf16.msra.mxu1 %v11295_v51  ;;  %9119 = vmatprep.subr.bf16.mxu0 %v12812_v0 }
 0x14a   :  { %9121 = vmatpush3.bf16.msra.mxu0 %v11326_v19 }
 0x14b   :  { %9122 = vmatprep.subr.bf16.mxu0 %v12812_v0 }
 0x14e   :  { %9124 = vmatpush3.bf16.msra.mxu0 %v11329_v22 }
 0x14f   :  { %9141 = vmatprep.subr.bf16.mxu0 %v12812_v0 }
 0x1f4   :  { %v11260_v4 = vpop.f32.mrb[0].mxu0 }
 0x1f5   :  { %v7811_v5 = vpop.f32.mrb[1].mxu0  ;;  %v11342_v26 = vrot.slane %v11260_v4, %v11338_v25  ;;  %v735_v4 = vld [vmem:[#allocation16 + $0x18] sm:$0xff] }
 0x1f6   :  { %v11350_v38 = vpack.c.bf16 %v735_v4, %v732_v34  ;;  %v749_v34 = vld [vmem:[#allocation16 + $0x88] sm:$0xff] }
 0x1f7   :  { %12917 = vst [vmem:[#allocation44_spill] sm:$0xff] %v11342_v26 }
 0x204   :  { %v11262_v6 = vpop.f32.mrb[2].mxu0 }
 0x205   :  { %v7830_v7 = vpop.f32.mrb[3].mxu0 }
 0x214   :  { %v705_v9 = vpop.f32.mrb[4].mxu0 }
 0x215   :  { %v706_v10 = vadd.f32 %v7131_v8, %v705_v9  ;;  %v7868_v11 = vpop.f32.mrb[5].mxu0  ;;  %v11309_v8 = vpop.f32.mrb[0].mxu1 }
 0x216   :  { %v11311_v9 = vpop.f32.mrb[1].mxu1 }
 0x217   :  { %10356 = vtanh.f32 %v706_v10  ;;  %v11320_v12 = vpop.f32.mrb[2].mxu1 }
 0x218   :  { %v7849_v13 = vpop.f32.mrb[3].mxu1 }
 0x221   :  { %v11267_v31 = vpop.eup %10356 }
 0x222   :  { %v711_v32 = vrot.slane %v11267_v31, 1 }
 0x224   :  { %712 = vrot.lane.b32.xlu0 %v711_v32, %s10905_s4  ;;  %v733_v32 = vld [vmem:[#allocation16 + $0x8] sm:$0xff] }
 0x225   :  { %v11348_v35 = vpack.c.bf16 %v736_v33, %v733_v32  ;;  %v746_v32 = vld [vmem:[#allocation16 + $0x70] sm:$0xff] }
 0x226   :  { %v11375_v4 = vpack.c.bf16 %v749_v34, %v746_v32  ;;  %v769_v32 = vld [vmem:[#allocation17 + $0x68] sm:$0xff]  ;;  %v772_v34 = vld [vmem:[#allocation17 + $0x80] sm:$0xff] }
 0x227   :  { %12918 = vst [vmem:[#allocation45_spill] sm:$0xff] %v11348_v35  ;;  %9126 = vmatprep.subr.bf16.mxu1 %v11348_v35 }
 0x228   :  { %12921 = vst [vmem:[#allocation48_spill] sm:$0xff] %v11375_v4 }
 0x296   :  { %v713_v3 = vpop.permute.xlu0 %712 }
 0x297   :  { %v11305_v5 = vsel %vm255_vm2, %v11267_v31, %v713_v3  ;;  %v10906_v31 = vmov 0  }
 0x298   :  { %v838_v7 = vrot.slane %v11305_v5, 7  ;;  %10354 = vset.pattern.permute.xlu1 %v10906_v31  ;;  %10355 = vset.pattern.permute.xlu0 %v10906_v31  ;;  %v747_v31 = vld [vmem:[#allocation16 + $0x78] sm:$0xff] }
 0x29a   :  { %839 = vrot.lane.b32.xlu0 %v838_v7, %s10905_s4  ;;  %v739_v7 = vld [vmem:[#allocation16 + $0x38] sm:$0xff] }
 0x30c   :  { %v840_v10 = vpop.permute.xlu0 %839 }
 0x30d   :  { %v11315_v11 = vsel %vm619_vm4, %v11305_v5, %v840_v10  ;;  %v742_v10 = vld [vmem:[#allocation16 + $0x50] sm:$0xff] }
 0x30e   :  { %7886 = vmatmul.mubr.msk.f32.vlgmr.msra.gmra.mrb[4].mxu1 %vm255_vm2, %v11315_v11  ;;  %v11360_v13 = vpack.c.bf16 %v742_v10, %v739_v7  ;;  %v763_v7 = vld [vmem:[#allocation17 + $0x38] sm:$0xff]  ;;  %v766_v10 = vld [vmem:[#allocation17 + $0x50] sm:$0xff] }
 0x30f   :  { %1095 = vmatprep.mubr.f32.mxu1 %v12800_v1  ;;  %9128 = vmatpush1.bf16.msra.mxu1 %v11350_v38 }
 0x310   :  { %9130 = vmatprep.subr.bf16.mxu1 %v11360_v13 }
 0x313   :  { %9132 = vmatpush1.bf16.msra.mxu1 %v11362_v18 }
 0x3e1   :  { %v916_v27 = vpop.f32.mrb[4].mxu1 }
 0x3e2   :  { %v917_v28 = vadd.f32 %v916_v27, %v11342_v26  ;;  %v7887_v29 = vpop.f32.mrb[5].mxu1  ;;  %v745_v27 = vld [vmem:[#allocation16 + $0x68] sm:$0xff] }
 0x3e4   :  { %10358 = vtanh.f32 %v917_v28  ;;  %v748_v28 = vld [vmem:[#allocation16 + $0x80] sm:$0xff] }
 0x3e5   :  { %v11369_v29 = vpack.c.bf16 %v748_v28, %v745_v27  ;;  %v765_v28 = vld [vmem:[#allocation17 + $0x48] sm:$0xff] }
 0x3e7   :  { %9134 = vmatprep.subr.bf16.mxu1 %v11369_v29 }
 0x3ee   :  { %v10359_v30 = vpop.eup %10358 }
 0x3ef   :  { %7905 = vmatmul.mubr.msk.f32.vlgmr.msra.gmra.mrb[6].mxu0 %vm255_vm2, %v10359_v30  ;;  %v744_v30 = vld [vmem:[#allocation16 + $0x60] sm:$0xff] }
 0x3f0   :  { %7923 = vmatprep.mubr.msk.f32.mxu0 %vm10903_vm0, %v12800_v1  ;;  %9143 = vmatpush3.bf16.msra.mxu0 %v11352_v39  ;;  %v11372_v33 = vpack.c.bf16 %v747_v31, %v744_v30  ;;  %v764_v30 = vld [vmem:[#allocation17 + $0x40] sm:$0xff]  ;;  %v767_v31 = vld [vmem:[#allocation17 + $0x58] sm:$0xff] }
 0x3f1   :  { %9144 = vmatprep.subr.bf16.mxu0 %v12812_v0 }
 0x3f2   :  { %9136 = vmatpush1.bf16.msra.mxu1 %v11372_v33 }
 0x3f4   :  { %9146 = vmatpush3.bf16.msra.mxu0 %v11365_v21 }
 0x3f5   :  { %9147 = vmatprep.subr.bf16.mxu0 %v12812_v0 }
 0x3f8   :  { %9149 = vmatpush3.bf16.msra.mxu0 %v11375_v4 }
 0x3f9   :  { %9150 = vmatprep.subr.bf16.mxu0 %v12812_v0 }
 0x4c2   :  { %v990_v40 = vpop.f32.mrb[6].mxu0 }
 0x4c3   :  { %v995_v41 = vsel %vm994_vm5, %v990_v40, -inf  ;;  %v7906_v42 = vpop.f32.mrb[7].mxu0 }
 0x4c4   :  { %v996_v43 = vrot.slane %v995_v41, 4  ;;  %v753_v42 = vld [vmem:[#allocation16 + $0xa8] sm:$0xff] }
 0x4c6   :  { %v997_v44 = vmax.f32 %v995_v41, %v996_v43  ;;  %v750_v41 = vld [vmem:[#allocation16 + $0x90] sm:$0xff]  ;;  %v752_v43 = vld [vmem:[#allocation16 + $0xa0] sm:$0xff] }
 0x4c8   :  { %v998_v45 = vrot.slane %v997_v44, 2 }
 0x4ca   :  { %v999_v46 = vmax.f32 %v997_v44, %v998_v45  ;;  %v11382_v44 = vpack.c.bf16 %v753_v42, %v750_v41  ;;  %v755_v45 = vld [vmem:[#allocation16 + $0xb8] sm:$0xff]  ;;  %v768_v41 = vld [vmem:[#allocation17 + $0x60] sm:$0xff]  ;;  %v11415_v42 = vpack.c.bf16 %v772_v34, %v769_v32  ;;  %v790_v32 = vld [vmem:[#allocation17 + $0x110] sm:$0xff] }
 0x4cc   :  { %v1000_v47 = vrot.slane %v999_v46, 1 }
 0x4ce   :  { %v1001_v48 = vmax.f32 %v999_v46, %v1000_v47  ;;  %v11385_v46 = vpack.c.bf16 %v755_v45, %v752_v43  ;;  %v757_v47 = vld [vmem:[#allocation17 + $0x8] sm:$0xff]  ;;  %v771_v43 = vld [vmem:[#allocation17 + $0x78] sm:$0xff]  ;;  %v770_v45 = vld [vmem:[#allocation17 + $0x70] sm:$0xff] }
 0x4d0   :  { %v1002_v49 = vsub.f32 %v990_v40, %v1001_v48  ;;  %v11379_v40 = vpack.c.bf16 %v754_v37, %v751_v36  ;;  %12922 = vst [vmem:[#allocation49_spill] sm:$0xff] %v11385_v46  ;;  %v760_v48 = vld [vmem:[#allocation17 + $0x20] sm:$0xff]  ;;  %9152 = vmatpush3.bf16.msra.mxu0 %v11385_v46  ;;  %v11409_v36 = vpack.c.bf16 %v765_v28, %v762_v20  ;;  %v783_v20 = vld [vmem:[#allocation17 + $0xd8] sm:$0xff]  ;;  %v782_v28 = vld [vmem:[#allocation17 + $0xd0] sm:$0xff] }
 0x4d1   :  { %9185 = vmatprep.subr.bf16.mxu0 %v12812_v0  ;;  %v11411_v37 = vpack.c.bf16 %v767_v31, %v764_v30  ;;  %v785_v30 = vld [vmem:[#allocation17 + $0xe8] sm:$0xff]  ;;  %v787_v31 = vld [vmem:[#allocation17 + $0xf8] sm:$0xff] }
 0x4d2   :  { %v1003_v50 = vmul.f32 1.442695, %v1002_v49  ;;  %9138 = vmatprep.subr.bf16.mxu1 %v11379_v40  ;;  %v11389_v49 = vpack.c.bf16 %v760_v48, %v757_v47  ;;  %v773_v47 = vld [vmem:[#allocation17 + $0x88] sm:$0xff]  ;;  %v775_v48 = vld [vmem:[#allocation17 + $0x98] sm:$0xff] }
 0x4d3   :  { %9140 = vmatpush1.bf16.msra.mxu1 %v11382_v44 }
 0x4d4   :  { %10360 = vpow2.f32 %v1003_v50  ;;  %9154 = vmatprep.subr.bf16.mxu1 %v11389_v49 }
 0x4de   :  { %v10361_v52 = vpop.eup %10360 }
 0x4df   :  { %v1005_v54 = vsel %vm994_vm5, %v10361_v52, 0.0 }
 0x4e0   :  { %v1006_v55 = vrot.slane %v1005_v54, 4 }
 0x4e2   :  { %v1007_v57 = vadd.f32 %v1006_v55, %v1005_v54 }
 0x4e4   :  { %v1008_v58 = vrot.slane %v1007_v57, 2 }
 0x4e6   :  { %v1009_v60 = vadd.f32 %v1008_v58, %v1007_v57 }
 0x4e8   :  { %v1010_v61 = vrot.slane %v1009_v60, 1 }
 0x4ea   :  { %v1011_v62 = vadd.f32 %v1010_v61, %v1009_v60  ;;  %v756_v60 = vld [vmem:[#allocation17] sm:$0xff] }
 0x4ec   :  { %10362 = vrcp.f32 %v1011_v62  ;;  %v759_v62 = vld [vmem:[#allocation17 + $0x18] sm:$0xff] }
 0x4ed   :  { %v11395_v15 = vpack.c.bf16 %v759_v62, %v756_v60  ;;  %v776_v60 = vld [vmem:[#allocation17 + $0xa0] sm:$0xff]  ;;  %v781_v62 = vld [vmem:[#allocation17 + $0xc8] sm:$0xff] }
 0x4f6   :  { %v10363_v63 = vpop.eup %10362 }
 0x4f7   :  { %v1013_v3 = vmul.f32 %v10363_v63, %v10361_v52  ;;  %v758_v63 = vld [vmem:[#allocation17 + $0x10] sm:$0xff] }
 0x4f9   :  { %1016 = vperm.xlu1 %10354, %v1013_v3   ;;  %v761_v3 = vld [vmem:[#allocation17 + $0x28] sm:$0xff] }
 0x4fa   :  { %v11397_v17 = vpack.c.bf16 %v761_v3, %v758_v63  ;;  %v784_v63 = vld [vmem:[#allocation17 + $0xe0] sm:$0xff] }
 0x578   :  { %v1017_v50 = vpop.permute.xlu1 %1016 }
 0x579   :  { %v1019_v52 = vmul.f32 %v1017_v50, %v11315_v11  ;;  %v11401_v11 = vpack.c.bf16 %v766_v10, %v763_v7  ;;  %v778_v50 = vld [vmem:[#allocation17 + $0xb0] sm:$0xff]  ;;  %v780_v10 = vld [vmem:[#allocation17 + $0xc0] sm:$0xff] }
 0x57a   :  { %v11442_v34 = vpack.c.bf16 %v783_v20, %v780_v10  ;;  %v795_v10 = vld [vmem:[#allocation17 + $0x138] sm:$0xff]  ;;  %v794_v20 = vld [vmem:[#allocation17 + $0x130] sm:$0xff] }
 0x57b   :  { %v1021_v54 = vsel %vm1020_vm6, %v1019_v52, 0.0  ;;  %v11422_v52 = vpack.c.bf16 %v771_v43, %v768_v41  ;;  %v11444_v41 = vpack.c.bf16 %v785_v30, %v782_v28  ;;  %v786_v43 = vld [vmem:[#allocation17 + $0xf0] sm:$0xff]  ;;  %v797_v28 = vld [vmem:[#allocation17 + $0x148] sm:$0xff]  ;;  %v799_v30 = vld [vmem:[#allocation17 + $0x158] sm:$0xff] }
 0x57c   :  { %v1022_v55 = vrot.slane %v1021_v54, 4 }
 0x57e   :  { %v1023_v57 = vadd.f32 %v1022_v55, %v1021_v54  ;;  %v11424_v54 = vpack.c.bf16 %v773_v47, %v770_v45  ;;  %v774_v55 = vld [vmem:[#allocation17 + $0x90] sm:$0xff]  ;;  %v11448_v45 = vpack.c.bf16 %v790_v32, %v787_v31  ;;  %v789_v47 = vld [vmem:[#allocation17 + $0x108] sm:$0xff] }
 0x57f   :  { %v802_v31 = vld [vmem:[#allocation17 + $0x170] sm:$0xff] }
 0x580   :  { %v1024_v58 = vrot.slane %v1023_v57, 2 }
 0x582   :  { %v1025_v61 = vadd.f32 %v1024_v58, %v1023_v57  ;;  %v11428_v57 = vpack.c.bf16 %v778_v50, %v775_v48  ;;  %v777_v58 = vld [vmem:[#allocation17 + $0xa8] sm:$0xff]  ;;  %v788_v48 = vld [vmem:[#allocation17 + $0x100] sm:$0xff]  ;;  %v791_v50 = vld [vmem:[#allocation17 + $0x118] sm:$0xff] }
 0x583   :  { %v11432_v3 = vpack.c.bf16 %v777_v58, %v774_v55  ;;  %v793_v55 = vld [vmem:[#allocation17 + $0x128] sm:$0xff]  ;;  %v796_v58 = vld [vmem:[#allocation17 + $0x140] sm:$0xff] }
 0x584   :  { %v1026_v14 = vrot.slane %v1025_v61, 1 }
 0x586   :  { %v11399_v27 = vadd.f32 %v1026_v14, %v1025_v61  ;;  %v779_v61 = vld [vmem:[#allocation17 + $0xb8] sm:$0xff]  ;;  %v11438_v14 = vpack.c.bf16 %v784_v63, %v781_v62  ;;  %v792_v62 = vld [vmem:[#allocation17 + $0x120] sm:$0xff]  ;;  %v11458_v63 = vpack.c.bf16 %v796_v58, %v793_v55 }
 0x587   :  { %v11434_v7 = vpack.c.bf16 %v779_v61, %v776_v60  ;;  %v11452_v60 = vpack.c.bf16 %v789_v47, %v786_v43  ;;  %v11454_v61 = vpack.c.bf16 %v791_v50, %v788_v48  ;;  %v11462_v32 = vpack.c.bf16 %v795_v10, %v792_v62  ;;  %v798_v47 = vld [vmem:[#allocation17 + $0x150] sm:$0xff]  ;;  %v801_v50 = vld [vmem:[#allocation17 + $0x168] sm:$0xff]  ;;  %v800_v55 = vld [vmem:[#allocation17 + $0x160] sm:$0xff] }
 0x588   :  { %7135 = vmatmul.mubr.msk.f32.vlgmr.msra.gmra.mrb[6].mxu1 %vm255_vm2, %v11399_v27  ;;  %7924 = vmatmul.mubr.msk.f32.vlgmr.msra.gmra.mrb[8].mxu0 %vm255_vm2, %v11399_v27  ;;  %v11464_v43 = vpack.c.bf16 %v797_v28, %v794_v20  ;;  %v11468_v48 = vpack.c.bf16 %v802_v31, %v799_v30  ;;  %v803_v58 = vld [vmem:[#allocation17 + $0x178] sm:$0xff]  ;;  %v11472_v23 = vpack.c.bf16 %v801_v50, %v798_v47  ;;  %v805_v10 = vld [vmem:[#allocation20] sm:$0xff]  ;;  %v806_v20 = vld [vmem:[#allocation20 + $0x8] sm:$0xff] }
 0x589   :  { %9156 = vmatpush1.bf16.msra.mxu1 %v11395_v15  ;;  %9187 = vmatpush3.bf16.msra.mxu0 %v11397_v17  ;;  %12923 = vst [vmem:[#allocation50_spill] sm:$0xff] %v11462_v32  ;;  %v11474_v62 = vpack.c.bf16 %v803_v58, %v800_v55  ;;  %v11480_v28 = vpack.c.bf16 %v806_v20, %v805_v10  ;;  %v807_v30 = vld [vmem:[#allocation20 + $0x10] sm:$0xff]  ;;  %v808_v31 = vld [vmem:[#allocation20 + $0x18] sm:$0xff]  ;;  %v809_v50 = vld [vmem:[#allocation20 + $0x20] sm:$0xff] }
 0x58a   :  { %9158 = vmatprep.subr.bf16.mxu1 %v11401_v11  ;;  %9188 = vmatprep.subr.bf16.mxu0 %v12812_v0  ;;  %12924 = vst [vmem:[#allocation51_spill] sm:$0xff] %v11464_v43  ;;  %12925 = vst [vmem:[#allocation52_spill] sm:$0xff] %v11468_v48  ;;  %v11486_v47 = vpack.c.bf16 %v808_v31, %v807_v30  ;;  %v810_v55 = vld [vmem:[#allocation20 + $0x28] sm:$0xff]  ;;  %v811_v10 = vld [vmem:[#allocation20 + $0x30] sm:$0xff] }
 0x58b   :  { %1255 = vmatprep.mubr.f32.mxu1 %v12800_v1  ;;  %7958 = vmatprep.mubr.msk.f32.mxu0 %vm10903_vm0, %v12800_v1  ;;  %12926 = vst [vmem:[#allocation53_spill] sm:$0xff] %v11472_v23  ;;  %12927 = vst [vmem:[#allocation54_spill] sm:$0xff] %v11474_v62  ;;  %v11493_v58 = vpack.c.bf16 %v810_v55, %v809_v50  ;;  %v812_v20 = vld [vmem:[#allocation20 + $0x38] sm:$0xff]  ;;  %v813_v31 = vld [vmem:[#allocation22] sm:$0xff] }
 0x58c   :  { %12928 = vst [vmem:[#allocation55_spill] sm:$0xff] %v11480_v28  ;;  %12929 = vst [vmem:[#allocation56_spill] sm:$0xff] %v11486_v47  ;;  %v11497_v30 = vpack.c.bf16 %v812_v20, %v811_v10  ;;  %v814_v50 = vld [vmem:[#allocation22 + $0x8] sm:$0xff]  ;;  %v815_v10 = vld [vmem:[#allocation22 + $0x10] sm:$0xff] }
 0x58d   :  { %9160 = vmatpush1.bf16.msra.mxu1 %v11409_v36  ;;  %9190 = vmatpush3.bf16.msra.mxu0 %v11411_v37  ;;  %12930 = vst [vmem:[#allocation57_spill] sm:$0xff] %v11493_v58  ;;  %v11506_v55 = vpack.c.bf16 %v814_v50, %v813_v31  ;;  %v816_v20 = vld [vmem:[#allocation22 + $0x18] sm:$0xff]  ;;  %v819_v31 = vld [vmem:[#allocation22 + $0x30] sm:$0xff] }
 0x58e   :  { %9162 = vmatprep.subr.bf16.mxu1 %v11415_v42  ;;  %9191 = vmatprep.subr.bf16.mxu0 %v12812_v0  ;;  %12931 = vst [vmem:[#allocation58_spill] sm:$0xff] %v11497_v30  ;;  %v820_v50 = vld [vmem:[#allocation22 + $0x38] sm:$0xff] }
 0x58f   :  { %12932 = vst [vmem:[#allocation59_spill] sm:$0xff] %v11506_v55 }
 0x591   :  { %9164 = vmatpush1.bf16.msra.mxu1 %v11422_v52  ;;  %9193 = vmatpush3.bf16.msra.mxu0 %v11424_v54 }
 0x592   :  { %9166 = vmatprep.subr.bf16.mxu1 %v11428_v57  ;;  %9194 = vmatprep.subr.bf16.mxu0 %v12812_v0 }
 0x595   :  { %9168 = vmatpush1.bf16.msra.mxu1 %v11432_v3  ;;  %9196 = vmatpush3.bf16.msra.mxu0 %v11434_v7 }
 0x596   :  { %9170 = vmatprep.subr.bf16.mxu1 %v11438_v14  ;;  %9197 = vmatprep.subr.bf16.mxu0 %v12812_v0 }
 0x599   :  { %9172 = vmatpush1.bf16.msra.mxu1 %v11442_v34  ;;  %9199 = vmatpush3.bf16.msra.mxu0 %v11444_v41 }
 0x59a   :  { %9174 = vmatprep.subr.bf16.mxu1 %v11448_v45  ;;  %9200 = vmatprep.subr.bf16.mxu0 %v12812_v0 }
 0x59d   :  { %9176 = vmatpush1.bf16.msra.mxu1 %v11452_v60  ;;  %9202 = vmatpush3.bf16.msra.mxu0 %v11454_v61 }
 0x59e   :  { %9178 = vmatprep.subr.bf16.mxu1 %v11458_v63  ;;  %9203 = vmatprep.subr.bf16.mxu0 %v12812_v0 }
 0x5a1   :  { %9180 = vmatpush1.bf16.msra.mxu1 %v11462_v32  ;;  %9205 = vmatpush3.bf16.msra.mxu0 %v11464_v43 }
 0x5a2   :  { %9182 = vmatprep.subr.bf16.mxu1 %v11468_v48  ;;  %9206 = vmatprep.subr.bf16.mxu0 %v12812_v0 }
 0x5a5   :  { %9184 = vmatpush1.bf16.msra.mxu1 %v11472_v23  ;;  %9208 = vmatpush3.bf16.msra.mxu0 %v11474_v62 }
 0x5a6   :  { %9209 = vmatprep.subr.bf16.mxu1 %v12812_v0 }
 0x5a8   :  { %1256 = vmatmul.mubr.f32.vlgmr.msra.gmra.mrb[6].mxu1 %v11305_v5  ;;  %7959 = vmatmul.mubr.f32.vlgmr.msra.gmra.mrb[10].mxu0 %v11305_v5 }
 0x5a9   :  { %9211 = vmatpush3.bf16.msra.mxu1 %v11480_v28  ;;  %7977 = vmatprep.mubr.msk.f32.mxu1 %vm10903_vm0, %v12800_v1  ;;  %v826_v28 = vld [vmem:[#allocation22 + $0x68] sm:$0xff] }
 0x5aa   :  { %9212 = vmatprep.subr.bf16.mxu1 %v12812_v0  ;;  %1568 = vmatprep.mubr.f32.mxu0 %v12800_v1 }
 0x5ad   :  { %9214 = vmatpush3.bf16.msra.mxu1 %v11486_v47 }
 0x5ae   :  { %9215 = vmatprep.subr.bf16.mxu1 %v12812_v0 }
 0x5b1   :  { %9217 = vmatpush3.bf16.msra.mxu1 %v11493_v58  ;;  %v11510_v58 = vpack.c.bf16 %v816_v20, %v815_v10  ;;  %v821_v10 = vld [vmem:[#allocation22 + $0x40] sm:$0xff]  ;;  %v822_v20 = vld [vmem:[#allocation22 + $0x48] sm:$0xff] }
 0x5b2   :  { %9218 = vmatprep.subr.bf16.mxu1 %v12812_v0 }
 0x5b3   :  { %12933 = vst [vmem:[#allocation60_spill] sm:$0xff] %v11510_v58 }
 0x5b5   :  { %9220 = vmatpush3.bf16.msra.mxu1 %v11497_v30  ;;  %v818_v30 = vld [vmem:[#allocation22 + $0x28] sm:$0xff] }
 0x5b6   :  { %9221 = vmatprep.subr.bf16.mxu1 %v12812_v0 }
 0x5b8   :  { %7978 = vmatmul.mubr.msk.f32.vlgmr.msra.gmra.mrb[8].mxu1 %vm255_vm2, %v11399_v27  ;;  %v817_v27 = vld [vmem:[#allocation22 + $0x20] sm:$0xff] }
 0x5b9   :  { %8012 = vmatprep.mubr.msk.f32.mxu1 %vm10903_vm0, %v12800_v1  ;;  %9223 = vmatpush3.bf16.msra.mxu1 %v11506_v55  ;;  %v11514_v47 = vpack.c.bf16 %v818_v30, %v817_v27  ;;  %v11518_v1 = vpack.c.bf16 %v820_v50, %v819_v31  ;;  %v823_v30 = vld [vmem:[#allocation22 + $0x50] sm:$0xff]  ;;  %v824_v27 = vld [vmem:[#allocation22 + $0x58] sm:$0xff]  ;;  %v825_v55 = vld [vmem:[#allocation22 + $0x60] sm:$0xff] }
 0x5ba   :  { %9224 = vmatprep.subr.bf16.mxu1 %v12812_v0  ;;  %v11529_v31 = vpack.c.bf16 %v826_v28, %v825_v55  ;;  %v827_v50 = vld [vmem:[#allocation22 + $0x70] sm:$0xff]  ;;  %v375_v28 = vld [vmem:[%s12783_s11] sm:$0x7]  ;;  %v383_v55 = vsub.s32 1, %v11335_v24  ;;  %s10907_s11 = smov 96  }
 0x5bb   :  { %12934 = vst [vmem:[#allocation61_spill] sm:$0xff] %v11514_v47  ;;  %12935 = vst [vmem:[#allocation62_spill] sm:$0xff] %v11518_v1 }
 0x5bc   :  { %12938 = vst [vmem:[#allocation65_spill] sm:$0xff] %v11529_v31 }
 0x5bd   :  { %9226 = vmatpush3.bf16.msra.mxu1 %v11510_v58  ;;  %v11522_v58 = vpack.c.bf16 %v822_v20, %v821_v10 }
 0x5be   :  { %9227 = vmatprep.subr.bf16.mxu1 %v12812_v0 }
 0x5bf   :  { %12936 = vst [vmem:[#allocation63_spill] sm:$0xff] %v11522_v58 }
 0x5c1   :  { %9229 = vmatpush3.bf16.msra.mxu1 %v11514_v47  ;;  %v11526_v47 = vpack.c.bf16 %v824_v27, %v823_v30  ;;  %v380_v27 = vrot.slane %v375_v28, %v11338_v25 }
 0x5c2   :  { %9230 = vmatprep.subr.bf16.mxu1 %v12812_v0 }
 0x5c3   :  { %12937 = vst [vmem:[#allocation64_spill] sm:$0xff] %v11526_v47 }
 0x5c5   :  { %9232 = vmatpush3.bf16.msra.mxu1 %v11518_v1  ;;  %v828_v1 = vld [vmem:[#allocation22 + $0x78] sm:$0xff] }
 0x5c6   :  { %9233 = vmatprep.subr.bf16.mxu1 %v12812_v0  ;;  %v11533_v10 = vpack.c.bf16 %v828_v1, %v827_v50  ;;  %v804_v1 = vld [vmem:[%s12940_s3] sm:$0x7]  ;;  %v384_v50 = vrot.slane %v375_v28, %v383_v55 }
 0x5c8   :  { %12939 = vst [vmem:[#allocation66_spill] sm:$0xff] %v11533_v10 }
 0x5c9   :  { %9235 = vmatpush3.bf16.msra.mxu1 %v11522_v58 }
 0x5ca   :  { %9236 = vmatprep.subr.bf16.mxu1 %v12812_v0 }
 0x5cd   :  { %9238 = vmatpush3.bf16.msra.mxu1 %v11526_v47 }
 0x5ce   :  { %9239 = vmatprep.subr.bf16.mxu1 %v12812_v0 }
 0x5d1   :  { %9241 = vmatpush3.bf16.msra.mxu1 %v11529_v31 }
 0x5d2   :  { %9242 = vmatprep.subr.bf16.mxu1 %v12812_v0  ;;  %v11547_v0 = vrot.slane %v804_v1, %v11338_v25 }
 0x5d4   :  { %12941 = vst [vmem:[#allocation67_spill] sm:$0xff] %v11547_v0 }
 0x5d5   :  { %9244 = vmatpush3.bf16.msra.mxu1 %v11533_v10  ;;  %v11555_v10 = vrot.slane %v804_v1, %v383_v55  ;;  %v387_v55 = vsub.s32 2, %v11335_v24 }
 0x5d6   :  { %9278 = vmatprep.subr.bf16.mxu1 %v11348_v35  ;;  %v11550_v35 = vadd.f32 %v11309_v8, %v380_v27 }
 0x5d7   :  { %12943 = vst [vmem:[#allocation69_spill] sm:$0xff] %v11555_v10 }
 0x5d8   :  { %12942 = vst [vmem:[#allocation68_spill] sm:$0xff] %v11550_v35  ;;  %v10317_v31 = vadd.f32 %v11547_v0, %v11550_v35  ;;  %v388_v35 = vrot.slane %v375_v28, %v387_v55  ;;  %v11562_v0 = vrot.slane %v804_v1, %v387_v55 }
 0x65b   :  { %v1168_v20 = vpop.f32.mrb[8].mxu0 }
 0x65c   :  { %v7925_v30 = vpop.f32.mrb[9].mxu0 }
 0x65d   :  { %v11553_v30 = vadd.f32 %v11311_v9, %v384_v50 }
 0x65f   :  { %v10319_v25 = vadd.f32 %v11555_v10, %v11553_v30 }
 0x67b   :  { %v1257_v47 = vpop.f32.mrb[6].mxu1  ;;  %v1328_v58 = vpop.f32.mrb[10].mxu0 }
 0x67c   :  { %v10318_v62 = vadd.f32 %v10317_v31, %v1257_v47  ;;  %v1259_v23 = vpop.f32.mrb[7].mxu1  ;;  %v7960_v48 = vpop.f32.mrb[11].mxu0  ;;  %v1329_v31 = vadd.f32 %v1328_v58, %v11562_v0  ;;  %v832_v58 = vld [vmem:[#allocation23 + $0x18] sm:$0xff] }
 0x67d   :  { %v10320_v32 = vadd.f32 %v10319_v25, %v1259_v23  ;;  %v11565_v48 = vadd.f32 %v11262_v6, %v388_v35  ;;  %v12944_v35 = vmov 0.0  }
 0x67e   :  { %v7137_v43 = vmul.f32 -1.442695, %v10318_v62 }
 0x67f   :  { %v7138_v8 = vmul.f32 -1.442695, %v10320_v32  ;;  %v1174_v23 = vadd.f32 %v1168_v20, %v11565_v48  ;;  %v829_v20 = vld [vmem:[#allocation23] sm:$0xff] }
 0x680   :  { %10364 = vpow2.f32 %v7137_v43 }
 0x681   :  { %10366 = vpow2.f32 %v7138_v8 }
 0x68a   :  { %v10365_v9 = vpop.eup %10364 }
 0x68b   :  { %v1336_v27 = vadd.f32 1.0, %v10365_v9  ;;  %v10367_v50 = vpop.eup %10366 }
 0x68c   :  { %v1343_v47 = vadd.f32 1.0, %v10367_v50  ;;  %v831_v50 = vld [vmem:[#allocation23 + $0x10] sm:$0xff] }
 0x68d   :  { %10368 = vrcp.f32 %v1336_v27 }
 0x68e   :  { %10370 = vrcp.f32 %v1343_v47  ;;  %v834_v47 = vld [vmem:[#allocation23 + $0x28] sm:$0xff] }
 0x697   :  { %v10369_v62 = vpop.eup %10368 }
 0x698   :  { %v1346_v32 = vmul.f32 %v10369_v62, %v1329_v31  ;;  %v10371_v25 = vpop.eup %10370  ;;  %v836_v31 = vld [vmem:[#allocation23 + $0x38] sm:$0xff]  ;;  %v11588_v62 = vpack.c.bf16 %v831_v50, %v829_v20 }
 0x699   :  { %v1349_v8 = vsub.f32 1.0, %v10371_v25  ;;  %v1351_v28 = vmul.f32 %v10371_v25, %v11305_v5  ;;  %v830_v5 = vld [vmem:[#allocation23 + $0x8] sm:$0xff] }
 0x69a   :  { %v1347_v43 = vadd.f32 %v1346_v32, %v1174_v23  ;;  %v11586_v55 = vpack.c.bf16 %v832_v58, %v830_v5  ;;  %12946 = vst [vmem:[#allocation71_spill] sm:$0xff] %v11588_v62  ;;  %v11590_v23 = vpack.c.bf16 %v836_v31, %v834_v47  ;;  %v833_v32 = vld [vmem:[#allocation23 + $0x20] sm:$0xff] }
 0x69c   :  { %10372 = vtanh.f32 %v1347_v43  ;;  %12945 = vst [vmem:[#allocation70_spill] sm:$0xff] %v11586_v55  ;;  %12947 = vst [vmem:[#allocation72_spill] sm:$0xff] %v11590_v23  ;;  %v835_v43 = vld [vmem:[#allocation23 + $0x30] sm:$0xff]  ;;  %9246 = vmatprep.subr.bf16.mxu0 %v11586_v55 }
 0x69d   :  { %9248 = vmatpush1.bf16.msra.mxu0 %v11588_v62  ;;  %v11594_v25 = vpack.c.bf16 %v835_v43, %v833_v32 }
 0x69e   :  { %9250 = vmatprep.subr.bf16.mxu0 %v11590_v23 }
 0x69f   :  { %12948 = vst [vmem:[#allocation73_spill] sm:$0xff] %v11594_v25 }
 0x6a1   :  { %9252 = vmatpush1.bf16.msra.mxu0 %v11594_v25 }
 0x6a6   :  { %v10373_v9 = vpop.eup %10372 }
 0x6a7   :  { %v1350_v27 = vmul.f32 %v10373_v9, %v1349_v8  ;;  %v12949_v8 = vmov 0.0|0.0  }
 0x6a8   :  { %9253 = vmatprep.subr.bf16.mxu0 %v12949_v8 }
 0x6a9   :  { %v11570_v1 = vadd.f32 %v1351_v28, %v1350_v27 }
 0x6ab   :  { %8013 = vmatmul.mubr.f32.vlgmr.msra.gmra.mrb[8].mxu1 %v11570_v1  ;;  %v12838_v6 = vrot.slane %v11570_v1, 7 }
 0x6ac   :  { %9280 = vmatpush1.bf16.msra.mxu1 %v11350_v38  ;;  %1870 = vmatprep.mubr.f32.mxu1 %v12944_v35 }
 0x6ad   :  { %1620 = vrot.lane.b32.xlu0 %v12838_v6, %s10905_s4  ;;  %9282 = vmatprep.subr.bf16.mxu1 %v11360_v13 }
 0x6b0   :  { %9284 = vmatpush1.bf16.msra.mxu1 %v11362_v18 }
 0x6b1   :  { %9286 = vmatprep.subr.bf16.mxu1 %v11369_v29 }
 0x6b4   :  { %9288 = vmatpush1.bf16.msra.mxu1 %v11372_v33 }
 0x6b5   :  { %9290 = vmatprep.subr.bf16.mxu1 %v11379_v40 }
 0x6b8   :  { %9292 = vmatpush1.bf16.msra.mxu1 %v11382_v44 }
 0x6b9   :  { %9306 = vmatprep.subr.bf16.mxu1 %v11389_v49 }
 0x71f   :  { %v1621_v20 = vpop.permute.xlu0 %1620 }
 0x720   :  { %v1623_v50 = vsel %vm619_vm4, %v11570_v1, %v1621_v20 }
 0x77e   :  { %v1490_v9 = vpop.f32.mrb[8].mxu1 }
 0x77f   :  { %v10321_v27 = vadd.f32 %v1490_v9, %v11320_v12  ;;  %v8014_v28 = vpop.f32.mrb[9].mxu1 }
 0x781   :  { %1496 = vrot.lane.b32.xlu1 %v10321_v27, %s10907_s11 }
 0x7f3   :  { %v1497_v5 = vpop.permute.xlu1 %1496 }
 0x7f4   :  { %v1499_v58 = vmax.f32 %v10321_v27, %v1497_v5 }
 0x7f6   :  { %7140 = vmatmul.mubr.msk.f32.vlgmr.msra.gmra.mrb[12].mxu0 %vm1500_vm7, %v1499_v58 }
 0x7f7   :  { %9255 = vmatpush3.bf16.msra.mxu0 %v11279_v53  ;;  %8031 = vmatprep.mubr.msk.f32.mxu0 %vm10903_vm0, %v12944_v35 }
 0x7f8   :  { %9256 = vmatprep.subr.bf16.mxu0 %v12949_v8 }
 0x7fb   :  { %9258 = vmatpush3.bf16.msra.mxu0 %v11285_v56 }
 0x7fc   :  { %9259 = vmatprep.subr.bf16.mxu0 %v12949_v8 }
 0x7ff   :  { %9261 = vmatpush3.bf16.msra.mxu0 %v11291_v59 }
 0x800   :  { %9262 = vmatprep.subr.bf16.mxu0 %v12949_v8 }
 0x803   :  { %9264 = vmatpush3.bf16.msra.mxu0 %v11295_v51 }
 0x804   :  { %9265 = vmatprep.subr.bf16.mxu0 %v12949_v8 }
 0x806   :  { %8032 = vmatmul.mubr.msk.f32.vlgmr.msra.gmra.mrb[14].mxu0 %vm255_vm2, %v1623_v50 }
 0x807   :  { %9267 = vmatpush3.bf16.msra.mxu0 %v11299_v2  ;;  %8050 = vmatprep.mubr.msk.f32.mxu0 %vm10903_vm0, %v12944_v35 }
 0x808   :  { %9268 = vmatprep.subr.bf16.mxu0 %v12949_v8 }
 0x80b   :  { %9270 = vmatpush3.bf16.msra.mxu0 %v11322_v16 }
 0x80c   :  { %9271 = vmatprep.subr.bf16.mxu0 %v12949_v8 }
 0x80f   :  { %9273 = vmatpush3.bf16.msra.mxu0 %v11326_v19 }
 0x810   :  { %9274 = vmatprep.subr.bf16.mxu0 %v12949_v8 }
 0x813   :  { %9276 = vmatpush3.bf16.msra.mxu0 %v11329_v22 }
 0x814   :  { %9293 = vmatprep.subr.bf16.mxu0 %v12949_v8 }
 0x8c9   :  { %v11625_v47 = vpop.f32.mrb[12].mxu0 }
 0x8ca   :  { %12950 = vst [vmem:[#allocation74_spill] sm:$0xff] %v11625_v47  ;;  %v11629_v31 = vsel %vm619_vm4, %v11625_v47, -inf  ;;  %v11631_v32 = vpop.f32.mrb[13].mxu0 }
 0x8cb   :  { %12951 = vst [vmem:[#allocation75_spill] sm:$0xff] %v11629_v31  ;;  %12952 = vst [vmem:[#allocation76_spill] sm:$0xff] %v11631_v32  ;;  %v11635_v43 = vsel %vm619_vm4, %v11631_v32, -inf }
 0x8cc   :  { %12953 = vst [vmem:[#allocation77_spill] sm:$0xff] %v11635_v43 }
 0x8d9   :  { %v1693_v27 = vpop.f32.mrb[14].mxu0 }
 0x8da   :  { %v1694_v28 = vadd.f32 %v1693_v27, %v11342_v26  ;;  %v8033_v5 = vpop.f32.mrb[15].mxu0 }
 0x8dc   :  { %10374 = vtanh.f32 %v1694_v28 }
 0x8e6   :  { %v10375_v58 = vpop.eup %10374 }
 0x8e7   :  { %8051 = vmatmul.mubr.msk.f32.vlgmr.msra.gmra.mrb[16].mxu0 %vm255_vm2, %v10375_v58 }
 0x8e8   :  { %9295 = vmatpush3.bf16.msra.mxu0 %v11352_v39  ;;  %8069 = vmatprep.mubr.msk.f32.mxu0 %vm10903_vm0, %v12944_v35 }
 0x8e9   :  { %9296 = vmatprep.subr.bf16.mxu0 %v12949_v8 }
 0x8ec   :  { %9298 = vmatpush3.bf16.msra.mxu0 %v11365_v21 }
 0x8ed   :  { %9299 = vmatprep.subr.bf16.mxu0 %v12949_v8 }
 0x8f0   :  { %9301 = vmatpush3.bf16.msra.mxu0 %v11375_v4 }
 0x8f1   :  { %9302 = vmatprep.subr.bf16.mxu0 %v12949_v8 }
 0x8f4   :  { %9304 = vmatpush3.bf16.msra.mxu0 %v11385_v46 }
 0x8f5   :  { %9337 = vmatprep.subr.bf16.mxu0 %v12949_v8 }
 0x9ba   :  { %v1767_v20 = vpop.f32.mrb[16].mxu0 }
 0x9bb   :  { %v1771_v27 = vsel %vm994_vm5, %v1767_v20, -inf  ;;  %v8052_v28 = vpop.f32.mrb[17].mxu0 }
 0x9bc   :  { %v1772_v5 = vrot.slane %v1771_v27, 4 }
 0x9be   :  { %v1773_v58 = vmax.f32 %v1771_v27, %v1772_v5 }
 0x9c0   :  { %v1774_v9 = vrot.slane %v1773_v58, 2 }
 0x9c2   :  { %v1775_v6 = vmax.f32 %v1773_v58, %v1774_v9  ;;  %v12964_v58 = vld [vmem:[#allocation61_spill] sm:$0xff] }
 0x9c4   :  { %v1776_v24 = vrot.slane %v1775_v6, 1 }
 0x9c6   :  { %v1777_v32 = vmax.f32 %v1775_v6, %v1776_v24 }
 0x9c8   :  { %v1778_v47 = vsub.f32 %v1767_v20, %v1777_v32 }
 0x9ca   :  { %v1779_v43 = vmul.f32 1.442695, %v1778_v47 }
 0x9cc   :  { %10376 = vpow2.f32 %v1779_v43 }
 0x9d6   :  { %v10377_v31 = vpop.eup %10376 }
 0x9d7   :  { %v1781_v4 = vsel %vm994_vm5, %v10377_v31, 0.0 }
 0x9d8   :  { %v1782_v21 = vrot.slane %v1781_v4, 4 }
 0x9da   :  { %v1783_v46 = vadd.f32 %v1782_v21, %v1781_v4  ;;  %v12959_v21 = vld [vmem:[#allocation55_spill] sm:$0xff] }
 0x9db   :  { %v12960_v4 = vld [vmem:[#allocation59_spill] sm:$0xff] }
 0x9dc   :  { %v1784_v39 = vrot.slane %v1783_v46, 2 }
 0x9de   :  { %v1785_v22 = vadd.f32 %v1784_v39, %v1783_v46  ;;  %v12958_v39 = vld [vmem:[#allocation54_spill] sm:$0xff]  ;;  %v12961_v46 = vld [vmem:[#allocation56_spill] sm:$0xff] }
 0x9e0   :  { %v1786_v19 = vrot.slane %v1785_v22, 1 }
 0x9e2   :  { %v1787_v16 = vadd.f32 %v1786_v19, %v1785_v22  ;;  %v12956_v19 = vld [vmem:[#allocation52_spill] sm:$0xff]  ;;  %v12957_v22 = vld [vmem:[#allocation53_spill] sm:$0xff] }
 0x9e4   :  { %10378 = vrcp.f32 %v1787_v16  ;;  %v12955_v16 = vld [vmem:[#allocation51_spill] sm:$0xff] }
 0x9ee   :  { %v10379_v28 = vpop.eup %10378 }
 0x9ef   :  { %v1789_v2 = vmul.f32 %v10379_v28, %v10377_v31  ;;  %v12963_v31 = vld [vmem:[#allocation57_spill] sm:$0xff]  ;;  %v12965_v28 = vld [vmem:[#allocation58_spill] sm:$0xff] }
 0x9f1   :  { %1792 = vperm.xlu1 %10354, %v1789_v2   ;;  %v12954_v2 = vld [vmem:[#allocation50_spill] sm:$0xff] }
 0xa70   :  { %v1793_v27 = vpop.permute.xlu1 %1792 }
 0xa71   :  { %v1795_v9 = vmul.f32 %v1793_v27, %v1623_v50  ;;  %v12962_v50 = vld [vmem:[#allocation60_spill] sm:$0xff]  ;;  %v12966_v27 = vld [vmem:[#allocation62_spill] sm:$0xff] }
 0xa73   :  { %v1796_v24 = vsel %vm1020_vm6, %v1795_v9, 0.0  ;;  %v12967_v9 = vld [vmem:[#allocation63_spill] sm:$0xff] }
 0xa74   :  { %v1797_v6 = vrot.slane %v1796_v24, 4 }
 0xa76   :  { %v1798_v47 = vadd.f32 %v1797_v6, %v1796_v24  ;;  %v12968_v24 = vld [vmem:[#allocation64_spill] sm:$0xff]  ;;  %v12969_v6 = vld [vmem:[#allocation65_spill] sm:$0xff] }
 0xa78   :  { %v1799_v32 = vrot.slane %v1798_v47, 2 }
 0xa7a   :  { %v1800_v43 = vadd.f32 %v1799_v32, %v1798_v47  ;;  %v12970_v47 = vld [vmem:[#allocation66_spill] sm:$0xff]  ;;  %v12971_v32 = vld [vmem:[#allocation45_spill] sm:$0xff] }
 0xa7c   :  { %v1801_v20 = vrot.slane %v1800_v43, 1 }
 0xa7e   :  { %v1802_v5 = vadd.f32 %v1801_v20, %v1800_v43 }
 0xa80   :  { %7143 = vmatmul.mubr.msk.f32.vlgmr.msra.gmra.mrb[10].mxu1 %vm255_vm2, %v1802_v5  ;;  %8070 = vmatmul.mubr.msk.f32.vlgmr.msra.gmra.mrb[18].mxu0 %vm255_vm2, %v1802_v5 }
 0xa81   :  { %9308 = vmatpush1.bf16.msra.mxu1 %v11395_v15  ;;  %9339 = vmatpush3.bf16.msra.mxu0 %v11397_v17 }
 0xa82   :  { %9310 = vmatprep.subr.bf16.mxu1 %v11401_v11  ;;  %9340 = vmatprep.subr.bf16.mxu0 %v12949_v8 }
 0xa83   :  { %2023 = vmatprep.mubr.f32.mxu1 %v12944_v35  ;;  %8104 = vmatprep.mubr.msk.f32.mxu0 %vm10903_vm0, %v12944_v35 }
 0xa85   :  { %9312 = vmatpush1.bf16.msra.mxu1 %v11409_v36  ;;  %9342 = vmatpush3.bf16.msra.mxu0 %v11411_v37 }
 0xa86   :  { %9314 = vmatprep.subr.bf16.mxu1 %v11415_v42  ;;  %9343 = vmatprep.subr.bf16.mxu0 %v12949_v8 }
 0xa89   :  { %9316 = vmatpush1.bf16.msra.mxu1 %v11422_v52  ;;  %9345 = vmatpush3.bf16.msra.mxu0 %v11424_v54 }
 0xa8a   :  { %9318 = vmatprep.subr.bf16.mxu1 %v11428_v57  ;;  %9346 = vmatprep.subr.bf16.mxu0 %v12949_v8 }
 0xa8d   :  { %9320 = vmatpush1.bf16.msra.mxu1 %v11432_v3  ;;  %9348 = vmatpush3.bf16.msra.mxu0 %v11434_v7 }
 0xa8e   :  { %9322 = vmatprep.subr.bf16.mxu1 %v11438_v14  ;;  %9349 = vmatprep.subr.bf16.mxu0 %v12949_v8 }
 0xa91   :  { %9324 = vmatpush1.bf16.msra.mxu1 %v11442_v34  ;;  %9351 = vmatpush3.bf16.msra.mxu0 %v11444_v41 }
 0xa92   :  { %9326 = vmatprep.subr.bf16.mxu1 %v11448_v45  ;;  %9352 = vmatprep.subr.bf16.mxu0 %v12949_v8 }
 0xa95   :  { %9328 = vmatpush1.bf16.msra.mxu1 %v11452_v60  ;;  %9354 = vmatpush3.bf16.msra.mxu0 %v11454_v61 }
 0xa96   :  { %9330 = vmatprep.subr.bf16.mxu1 %v11458_v63  ;;  %9355 = vmatprep.subr.bf16.mxu0 %v12949_v8 }
 0xa99   :  { %9332 = vmatpush1.bf16.msra.mxu1 %v12954_v2  ;;  %9357 = vmatpush3.bf16.msra.mxu0 %v12955_v16 }
 0xa9a   :  { %9334 = vmatprep.subr.bf16.mxu1 %v12956_v19  ;;  %9358 = vmatprep.subr.bf16.mxu0 %v12949_v8 }
 0xa9d   :  { %9336 = vmatpush1.bf16.msra.mxu1 %v12957_v22  ;;  %9360 = vmatpush3.bf16.msra.mxu0 %v12958_v39 }
 0xa9e   :  { %9361 = vmatprep.subr.bf16.mxu1 %v12949_v8  ;;  %9373 = vmatprep.subr.bf16.mxu0 %v12949_v8 }
 0xaa0   :  { %2024 = vmatmul.mubr.f32.vlgmr.msra.gmra.mrb[12].mxu1 %v11570_v1  ;;  %8105 = vmatmul.mubr.f32.vlgmr.msra.gmra.mrb[20].mxu0 %v11570_v1 }
 0xaa1   :  { %9363 = vmatpush3.bf16.msra.mxu1 %v12959_v21  ;;  %8123 = vmatprep.mubr.msk.f32.mxu1 %vm10903_vm0, %v12944_v35 }
 0xaa2   :  { %9364 = vmatprep.subr.bf16.mxu1 %v12949_v8  ;;  %9375 = vmatpush3.bf16.msra.mxu0 %v12960_v4 }
 0xaa3   :  { %9376 = vmatprep.subr.bf16.mxu0 %v12949_v8  ;;  %8158 = vmatprep.mubr.msk.f32.mxu0 %vm10903_vm0, %v12944_v35 }
 0xaa5   :  { %9366 = vmatpush3.bf16.msra.mxu1 %v12961_v46 }
 0xaa6   :  { %9367 = vmatprep.subr.bf16.mxu1 %v12949_v8  ;;  %9378 = vmatpush3.bf16.msra.mxu0 %v12962_v50 }
 0xaa7   :  { %9379 = vmatprep.subr.bf16.mxu0 %v12949_v8 }
 0xaa9   :  { %9369 = vmatpush3.bf16.msra.mxu1 %v12963_v31  ;;  %v12973_v31 = vld [vmem:[#allocation68_spill] sm:$0xff] }
 0xaaa   :  { %9370 = vmatprep.subr.bf16.mxu1 %v12949_v8  ;;  %9381 = vmatpush3.bf16.msra.mxu0 %v12964_v58 }
 0xaab   :  { %9382 = vmatprep.subr.bf16.mxu0 %v12949_v8 }
 0xaad   :  { %9372 = vmatpush3.bf16.msra.mxu1 %v12965_v28 }
 0xaae   :  { %9384 = vmatpush3.bf16.msra.mxu0 %v12966_v27  ;;  %9405 = vmatprep.subr.bf16.mxu1 %v12949_v8 }
 0xaaf   :  { %9385 = vmatprep.subr.bf16.mxu0 %v12949_v8 }
 0xab0   :  { %8124 = vmatmul.mubr.msk.f32.vlgmr.msra.gmra.mrb[14].mxu1 %vm255_vm2, %v1802_v5 }
 0xab1   :  { %9407 = vmatpush3.bf16.msra.mxu1 %v11279_v53  ;;  %8177 = vmatprep.mubr.msk.f32.mxu1 %vm10903_vm0, %v12944_v35 }
 0xab2   :  { %9387 = vmatpush3.bf16.msra.mxu0 %v12967_v9  ;;  %9408 = vmatprep.subr.bf16.mxu1 %v12949_v8  ;;  %v12972_v9 = vld [vmem:[#allocation67_spill] sm:$0xff] }
 0xab3   :  { %9388 = vmatprep.subr.bf16.mxu0 %v12949_v8 }
 0xab5   :  { %9410 = vmatpush3.bf16.msra.mxu1 %v11285_v56 }
 0xab6   :  { %9390 = vmatpush3.bf16.msra.mxu0 %v12968_v24  ;;  %9411 = vmatprep.subr.bf16.mxu1 %v12949_v8 }
 0xab7   :  { %9391 = vmatprep.subr.bf16.mxu0 %v12949_v8 }
 0xab9   :  { %9413 = vmatpush3.bf16.msra.mxu1 %v11291_v59 }
 0xaba   :  { %9393 = vmatpush3.bf16.msra.mxu0 %v12969_v6  ;;  %9414 = vmatprep.subr.bf16.mxu1 %v12949_v8 }
 0xabb   :  { %9394 = vmatprep.subr.bf16.mxu0 %v12949_v8 }
 0xabd   :  { %9416 = vmatpush3.bf16.msra.mxu1 %v11295_v51 }
 0xabe   :  { %9396 = vmatpush3.bf16.msra.mxu0 %v12970_v47  ;;  %9430 = vmatprep.subr.bf16.mxu1 %v12971_v32 }
 0xabf   :  { %9398 = vmatprep.subr.bf16.mxu0 %v11586_v55 }
 0xb53   :  { %v1872_v43 = vpop.f32.mrb[10].mxu1  ;;  %v1943_v20 = vpop.f32.mrb[18].mxu0 }
 0xb54   :  { %v1874_v5 = vpop.f32.mrb[11].mxu1  ;;  %v8071_v56 = vpop.f32.mrb[19].mxu0  ;;  %v1950_v53 = vrot.slane %v1872_v43, 7 }
 0xb55   :  { %v1951_v59 = vrot.slane %v1874_v5, 7 }
 0xb56   :  { %v1956_v47 = vadd.f32 %v1950_v53, %v12973_v31 }
 0xb57   :  { %v1957_v32 = vadd.f32 %v1951_v59, %v11553_v30 }
 0xb73   :  { %v2025_v24 = vpop.f32.mrb[12].mxu1  ;;  %v2096_v6 = vpop.f32.mrb[20].mxu0 }
 0xb74   :  { %v2026_v27 = vadd.f32 %v2025_v24, %v12972_v9  ;;  %v2027_v28 = vpop.f32.mrb[13].mxu1  ;;  %v8106_v58 = vpop.f32.mrb[21].mxu0  ;;  %v2097_v53 = vadd.f32 %v2096_v6, %v11562_v0 }
 0xb75   :  { %v2028_v51 = vadd.f32 %v2027_v28, %v11555_v10 }
 0xb76   :  { %v2101_v50 = vrot.slane %v2026_v27, 7  ;;  %v1952_v27 = vrot.slane %v1943_v20, 7 }
 0xb77   :  { %v2111_v55 = vrot.slane %v2028_v51, 7  ;;  %v2121_v51 = vrot.slane %v2097_v53, 7 }
 0xb78   :  { %v2103_v46 = vadd.f32 %v2101_v50, %v1956_v47 }
 0xb79   :  { %v2113_v4 = vadd.f32 %v2111_v55, %v1957_v32  ;;  %v1958_v55 = vadd.f32 %v1952_v27, %v11565_v48 }
 0xb7a   :  { %v7145_v21 = vmul.f32 -1.442695, %v2103_v46 }
 0xb7b   :  { %v7146_v56 = vmul.f32 -1.442695, %v2113_v4 }
 0xb7c   :  { %10380 = vpow2.f32 %v7145_v21 }
 0xb7d   :  { %10382 = vpow2.f32 %v7146_v56  ;;  %v12974_v56 = vrot.slane %v11570_v1, 7 }
 0xb83   :  { %v2197_v43 = vpop.f32.mrb[14].mxu1 }
 0xb84   :  { %v2202_v5 = vrot.slane %v2197_v43, 7  ;;  %v8125_v39 = vpop.f32.mrb[15].mxu1 }
 0xb86   :  { %v10381_v24 = vpop.eup %10380  ;;  %v2204_v58 = vadd.f32 %v2202_v5, %v11320_v12 }
 0xb87   :  { %v2107_v9 = vadd.f32 1.0, %v10381_v24  ;;  %v10383_v28 = vpop.eup %10382 }
 0xb88   :  { %v2117_v59 = vadd.f32 1.0, %v10383_v28 }
 0xb89   :  { %10384 = vrcp.f32 %v2107_v9 }
 0xb8a   :  { %10386 = vrcp.f32 %v2117_v59 }
 0xb93   :  { %v10385_v50 = vpop.eup %10384 }
 0xb94   :  { %v2123_v21 = vmul.f32 %v10385_v50, %v2121_v51  ;;  %v10387_v46 = vpop.eup %10386 }
 0xb95   :  { %v2126_v39 = vsub.f32 1.0, %v10387_v46  ;;  %v2129_v9 = vmul.f32 %v10387_v46, %v12974_v56  ;;  %v12977_v46 = vld [vmem:[#allocation41_spill] sm:$0xff]  ;;  %v12980_v56 = vld [vmem:[#allocation47_spill] sm:$0xff] }
 0xb96   :  { %v2124_v4 = vadd.f32 %v2123_v21, %v1958_v55 }
 0xb98   :  { %10388 = vtanh.f32 %v2124_v4  ;;  %v12975_v4 = vld [vmem:[#allocation39_spill] sm:$0xff] }
 0xba2   :  { %v10389_v47 = vpop.eup %10388 }
 0xba3   :  { %v2127_v32 = vmul.f32 %v10389_v47, %v2126_v39  ;;  %v12978_v39 = vld [vmem:[#allocation42_spill] sm:$0xff] }
 0xba5   :  { %v11741_v43 = vadd.f32 %v2129_v9, %v2127_v32  ;;  %v12979_v32 = vld [vmem:[#allocation46_spill] sm:$0xff]  ;;  %v12981_v9 = vld [vmem:[#allocation48_spill] sm:$0xff] }
 0xba7   :  { %2402 = vrot.lane.b32.xlu0 %v11741_v43, %s10905_s4  ;;  %v11746_v6 = vrot.slane %v11741_v43, 1 }
 0xba9   :  { %8159 = vmatmul.mubr.f32.vlgmr.msra.gmra.mrb[22].mxu0 %v11746_v6 }
 0xbaa   :  { %9400 = vmatpush1.bf16.msra.mxu0 %v11588_v62  ;;  %2355 = vmatprep.mubr.f32.mxu0 %v12944_v35 }
 0xbab   :  { %9402 = vmatprep.subr.bf16.mxu0 %v11590_v23 }
 0xbae   :  { %9404 = vmatpush1.bf16.msra.mxu0 %v11594_v25 }
 0xbaf   :  { %9417 = vmatprep.subr.bf16.mxu0 %v12949_v8 }
 0xc19   :  { %v2403_v1 = vpop.permute.xlu0 %2402 }
 0xc1a   :  { %v11756_v20 = vsel %vm619_vm4, %v11746_v6, %v2403_v1  ;;  %v12982_v1 = vld [vmem:[#allocation49_spill] sm:$0xff] }
 0xc1b   :  { %8178 = vmatmul.mubr.msk.f32.vlgmr.msra.gmra.mrb[16].mxu1 %vm255_vm2, %v11756_v20 }
 0xc1c   :  { %9432 = vmatpush1.bf16.msra.mxu1 %v11350_v38  ;;  %2652 = vmatprep.mubr.f32.mxu1 %v12944_v35 }
 0xc1d   :  { %9434 = vmatprep.subr.bf16.mxu1 %v11360_v13 }
 0xc20   :  { %9436 = vmatpush1.bf16.msra.mxu1 %v11362_v18 }
 0xc21   :  { %9438 = vmatprep.subr.bf16.mxu1 %v11369_v29 }
 0xc24   :  { %9440 = vmatpush1.bf16.msra.mxu1 %v11372_v33 }
 0xc25   :  { %9442 = vmatprep.subr.bf16.mxu1 %v11379_v40 }
 0xc28   :  { %9444 = vmatpush1.bf16.msra.mxu1 %v11382_v44 }
 0xc29   :  { %9458 = vmatprep.subr.bf16.mxu1 %v11389_v49 }
 0xc7c   :  { %v2274_v5 = vpop.f32.mrb[22].mxu0 }
 0xc7d   :  { %v2279_v24 = vrot.slane %v2274_v5, 7  ;;  %v8160_v28 = vpop.f32.mrb[23].mxu0 }
 0xc7f   :  { %v2281_v53 = vadd.f32 %v2279_v24, %v2204_v58  ;;  %v12976_v58 = vld [vmem:[#allocation40_spill] sm:$0xff] }
 0xc81   :  { %2283 = vrot.lane.b32.xlu1 %v2281_v53, %s10907_s11 }
 0xcee   :  { %v2475_v27 = vpop.f32.mrb[16].mxu1 }
 0xcef   :  { %v8179_v59 = vpop.f32.mrb[17].mxu1  ;;  %v2476_v21 = vadd.f32 %v2475_v27, %v11342_v26 }
 0xcf1   :  { %10390 = vtanh.f32 %v2476_v21 }
 0xcf3   :  { %v2284_v51 = vpop.permute.xlu1 %2283 }
 0xcf4   :  { %v2286_v50 = vmax.f32 %v2281_v53, %v2284_v51 }
 0xcf6   :  { %v2288_v55 = vrot.slane %v2286_v50, 1 }
 0xcf8   :  { %7148 = vmatmul.mubr.msk.f32.vlgmr.msra.gmra.mrb[24].mxu0 %vm1500_vm7, %v2288_v55 }
 0xcf9   :  { %9419 = vmatpush3.bf16.msra.mxu0 %v12975_v4  ;;  %8196 = vmatprep.mubr.msk.f32.mxu0 %vm10903_vm0, %v12944_v35 }
 0xcfa   :  { %9420 = vmatprep.subr.bf16.mxu0 %v12949_v8 }
 0xcfb   :  { %v10391_v47 = vpop.eup %10390 }
 0xcfd   :  { %9422 = vmatpush3.bf16.msra.mxu0 %v12976_v58 }
 0xcfe   :  { %9423 = vmatprep.subr.bf16.mxu0 %v12949_v8 }
 0xd01   :  { %9425 = vmatpush3.bf16.msra.mxu0 %v12977_v46 }
 0xd02   :  { %9426 = vmatprep.subr.bf16.mxu0 %v12949_v8 }
 0xd05   :  { %9428 = vmatpush3.bf16.msra.mxu0 %v12978_v39 }
 0xd06   :  { %9445 = vmatprep.subr.bf16.mxu0 %v12949_v8 }
 0xd08   :  { %8197 = vmatmul.mubr.msk.f32.vlgmr.msra.gmra.mrb[26].mxu0 %vm255_vm2, %v10391_v47 }
 0xd09   :  { %9447 = vmatpush3.bf16.msra.mxu0 %v12979_v32  ;;  %8215 = vmatprep.mubr.msk.f32.mxu0 %vm10903_vm0, %v12944_v35 }
 0xd0a   :  { %9448 = vmatprep.subr.bf16.mxu0 %v12949_v8 }
 0xd0d   :  { %9450 = vmatpush3.bf16.msra.mxu0 %v12980_v56 }
 0xd0e   :  { %9451 = vmatprep.subr.bf16.mxu0 %v12949_v8 }
 0xd11   :  { %9453 = vmatpush3.bf16.msra.mxu0 %v12981_v9 }
 0xd12   :  { %9454 = vmatprep.subr.bf16.mxu0 %v12949_v8 }
 0xd15   :  { %9456 = vmatpush3.bf16.msra.mxu0 %v12982_v1 }
 0xd16   :  { %9489 = vmatprep.subr.bf16.mxu0 %v12949_v8 }
 0xdcb   :  { %v11793_v5 = vpop.f32.mrb[24].mxu0 }
 0xdcc   :  { %12983 = vst [vmem:[#allocation50_spill] sm:$0xff] %v11793_v5  ;;  %v11797_v24 = vsel %vm619_vm4, %v11793_v5, -inf  ;;  %v11799_v28 = vpop.f32.mrb[25].mxu0 }
 0xdcd   :  { %12984 = vst [vmem:[#allocation51_spill] sm:$0xff] %v11797_v24  ;;  %12985 = vst [vmem:[#allocation52_spill] sm:$0xff] %v11799_v28  ;;  %v11803_v53 = vsel %vm619_vm4, %v11799_v28, -inf }
 0xdce   :  { %12986 = vst [vmem:[#allocation53_spill] sm:$0xff] %v11803_v53 }
 0xddb   :  { %v2549_v59 = vpop.f32.mrb[26].mxu0 }
 0xddc   :  { %v2553_v51 = vsel %vm994_vm5, %v2549_v59, -inf  ;;  %v8198_v50 = vpop.f32.mrb[27].mxu0 }
 0xddd   :  { %v2554_v55 = vrot.slane %v2553_v51, 4 }
 0xddf   :  { %v2555_v21 = vmax.f32 %v2553_v51, %v2554_v55 }
 0xde1   :  { %v2556_v47 = vrot.slane %v2555_v21, 2 }
 0xde3   :  { %v2557_v1 = vmax.f32 %v2555_v21, %v2556_v47  ;;  %v12998_v47 = vld [vmem:[#allocation64_spill] sm:$0xff] }
 0xde5   :  { %v2558_v9 = vrot.slane %v2557_v1, 1 }
 0xde7   :  { %v2559_v5 = vmax.f32 %v2557_v1, %v2558_v9 }
 0xde9   :  { %v2560_v56 = vsub.f32 %v2549_v59, %v2559_v5 }
 0xdeb   :  { %v2561_v32 = vmul.f32 1.442695, %v2560_v56 }
 0xded   :  { %10392 = vpow2.f32 %v2561_v32 }
 0xdf7   :  { %v10393_v26 = vpop.eup %10392 }
 0xdf8   :  { %v2563_v28 = vsel %vm994_vm5, %v10393_v26, 0.0 }
 0xdf9   :  { %v2564_v39 = vrot.slane %v2563_v28, 4 }
 0xdfb   :  { %v2565_v46 = vadd.f32 %v2564_v39, %v2563_v28  ;;  %v12993_v39 = vld [vmem:[#allocation61_spill] sm:$0xff]  ;;  %v12995_v28 = vld [vmem:[#allocation62_spill] sm:$0xff] }
 0xdfd   :  { %v2566_v58 = vrot.slane %v2565_v46, 2 }
 0xdff   :  { %v2567_v27 = vadd.f32 %v2566_v58, %v2565_v46  ;;  %v12990_v58 = vld [vmem:[#allocation56_spill] sm:$0xff] }
 0xe00   :  { %v12991_v46 = vld [vmem:[#allocation60_spill] sm:$0xff] }
 0xe01   :  { %v2568_v53 = vrot.slane %v2567_v27, 1 }
 0xe03   :  { %v2569_v24 = vadd.f32 %v2568_v53, %v2567_v27  ;;  %v12996_v53 = vld [vmem:[#allocation70_spill] sm:$0xff]  ;;  %v12997_v27 = vld [vmem:[#allocation63_spill] sm:$0xff] }
 0xe05   :  { %10394 = vrcp.f32 %v2569_v24  ;;  %v12994_v24 = vld [vmem:[#allocation58_spill] sm:$0xff] }
 0xe0f   :  { %v10395_v50 = vpop.eup %10394 }
 0xe10   :  { %v2571_v4 = vmul.f32 %v10395_v50, %v10393_v26  ;;  %v12987_v26 = vld [vmem:[#allocation54_spill] sm:$0xff]  ;;  %v12999_v50 = vld [vmem:[#allocation65_spill] sm:$0xff] }
 0xe12   :  { %2574 = vperm.xlu0 %10355, %v2571_v4   ;;  %v12989_v4 = vld [vmem:[#allocation59_spill] sm:$0xff] }
 0xe91   :  { %v2575_v51 = vpop.permute.xlu0 %2574 }
 0xe92   :  { %v2577_v55 = vmul.f32 %v2575_v51, %v11756_v20  ;;  %v12988_v20 = vld [vmem:[#allocation55_spill] sm:$0xff]  ;;  %v13000_v51 = vld [vmem:[#allocation66_spill] sm:$0xff] }
 0xe94   :  { %v2578_v9 = vsel %vm1020_vm6, %v2577_v55, 0.0  ;;  %v13001_v55 = vld [vmem:[#allocation45_spill] sm:$0xff] }
 0xe95   :  { %v2579_v56 = vrot.slane %v2578_v9, 4 }
 0xe97   :  { %v2580_v32 = vadd.f32 %v2579_v56, %v2578_v9 }
 0xe99   :  { %v2581_v1 = vrot.slane %v2580_v32, 2 }
 0xe9b   :  { %v2582_v5 = vadd.f32 %v2581_v1, %v2580_v32 }
 0xe9d   :  { %v2583_v59 = vrot.slane %v2582_v5, 1 }
 0xe9f   :  { %v2584_v21 = vadd.f32 %v2583_v59, %v2582_v5 }
 0xea1   :  { %7151 = vmatmul.mubr.msk.f32.vlgmr.msra.gmra.mrb[18].mxu1 %vm255_vm2, %v2584_v21  ;;  %8216 = vmatmul.mubr.msk.f32.vlgmr.msra.gmra.mrb[28].mxu0 %vm255_vm2, %v2584_v21 }
 0xea2   :  { %9460 = vmatpush1.bf16.msra.mxu1 %v11395_v15  ;;  %9491 = vmatpush3.bf16.msra.mxu0 %v11397_v17 }
 0xea3   :  { %9462 = vmatprep.subr.bf16.mxu1 %v11401_v11  ;;  %9492 = vmatprep.subr.bf16.mxu0 %v12949_v8 }
 0xea4   :  { %2805 = vmatprep.mubr.f32.mxu1 %v12944_v35  ;;  %8250 = vmatprep.mubr.msk.f32.mxu0 %vm10903_vm0, %v12944_v35 }
 0xea6   :  { %9464 = vmatpush1.bf16.msra.mxu1 %v11409_v36  ;;  %9494 = vmatpush3.bf16.msra.mxu0 %v11411_v37 }
 0xea7   :  { %9466 = vmatprep.subr.bf16.mxu1 %v11415_v42  ;;  %9495 = vmatprep.subr.bf16.mxu0 %v12949_v8 }
 0xeaa   :  { %9468 = vmatpush1.bf16.msra.mxu1 %v11422_v52  ;;  %9497 = vmatpush3.bf16.msra.mxu0 %v11424_v54 }
 0xeab   :  { %9470 = vmatprep.subr.bf16.mxu1 %v11428_v57  ;;  %9498 = vmatprep.subr.bf16.mxu0 %v12949_v8 }
 0xeae   :  { %9472 = vmatpush1.bf16.msra.mxu1 %v11432_v3  ;;  %9500 = vmatpush3.bf16.msra.mxu0 %v11434_v7 }
 0xeaf   :  { %9474 = vmatprep.subr.bf16.mxu1 %v11438_v14  ;;  %9501 = vmatprep.subr.bf16.mxu0 %v12949_v8 }
 0xeb2   :  { %9476 = vmatpush1.bf16.msra.mxu1 %v11442_v34  ;;  %9503 = vmatpush3.bf16.msra.mxu0 %v11444_v41 }
 0xeb3   :  { %9478 = vmatprep.subr.bf16.mxu1 %v11448_v45  ;;  %9504 = vmatprep.subr.bf16.mxu0 %v12949_v8 }
 0xeb6   :  { %9480 = vmatpush1.bf16.msra.mxu1 %v11452_v60  ;;  %9506 = vmatpush3.bf16.msra.mxu0 %v11454_v61 }
 0xeb7   :  { %9482 = vmatprep.subr.bf16.mxu1 %v11458_v63  ;;  %9507 = vmatprep.subr.bf16.mxu0 %v12949_v8 }
 0xeba   :  { %9484 = vmatpush1.bf16.msra.mxu1 %v12954_v2  ;;  %9509 = vmatpush3.bf16.msra.mxu0 %v12955_v16 }
 0xebb   :  { %9486 = vmatprep.subr.bf16.mxu1 %v12956_v19  ;;  %9510 = vmatprep.subr.bf16.mxu0 %v12949_v8 }
 0xebe   :  { %9488 = vmatpush1.bf16.msra.mxu1 %v12957_v22  ;;  %9512 = vmatpush3.bf16.msra.mxu0 %v12987_v26 }
 0xebf   :  { %9513 = vmatprep.subr.bf16.mxu1 %v12949_v8  ;;  %9525 = vmatprep.subr.bf16.mxu0 %v12949_v8 }
 0xec1   :  { %2806 = vmatmul.mubr.f32.vlgmr.msra.gmra.mrb[20].mxu1 %v11746_v6  ;;  %8251 = vmatmul.mubr.f32.vlgmr.msra.gmra.mrb[30].mxu0 %v11746_v6  ;;  %v12992_v6 = vld [vmem:[#allocation57_spill] sm:$0xff] }
 0xec2   :  { %9515 = vmatpush3.bf16.msra.mxu1 %v12988_v20  ;;  %8269 = vmatprep.mubr.msk.f32.mxu1 %vm10903_vm0, %v12944_v35 }
 0xec3   :  { %9516 = vmatprep.subr.bf16.mxu1 %v12949_v8  ;;  %9527 = vmatpush3.bf16.msra.mxu0 %v12989_v4 }
 0xec4   :  { %9528 = vmatprep.subr.bf16.mxu0 %v12949_v8  ;;  %8304 = vmatprep.mubr.msk.f32.mxu0 %vm10903_vm0, %v12944_v35 }
 0xec6   :  { %9518 = vmatpush3.bf16.msra.mxu1 %v12990_v58 }
 0xec7   :  { %9519 = vmatprep.subr.bf16.mxu1 %v12949_v8  ;;  %9530 = vmatpush3.bf16.msra.mxu0 %v12991_v46 }
 0xec8   :  { %9531 = vmatprep.subr.bf16.mxu0 %v12949_v8 }
 0xeca   :  { %9521 = vmatpush3.bf16.msra.mxu1 %v12992_v6 }
 0xecb   :  { %9522 = vmatprep.subr.bf16.mxu1 %v12949_v8  ;;  %9533 = vmatpush3.bf16.msra.mxu0 %v12993_v39 }
 0xecc   :  { %9534 = vmatprep.subr.bf16.mxu0 %v12949_v8 }
 0xece   :  { %9524 = vmatpush3.bf16.msra.mxu1 %v12994_v24 }
 0xecf   :  { %9536 = vmatpush3.bf16.msra.mxu0 %v12995_v28  ;;  %9550 = vmatprep.subr.bf16.mxu1 %v12996_v53 }
 0xed0   :  { %9537 = vmatprep.subr.bf16.mxu0 %v12949_v8 }
 0xed1   :  { %8270 = vmatmul.mubr.msk.f32.vlgmr.msra.gmra.mrb[22].mxu1 %vm255_vm2, %v2584_v21 }
 0xed2   :  { %9552 = vmatpush1.bf16.msra.mxu1 %v11588_v62  ;;  %3138 = vmatprep.mubr.f32.mxu1 %v12944_v35 }
 0xed3   :  { %9539 = vmatpush3.bf16.msra.mxu0 %v12997_v27  ;;  %9554 = vmatprep.subr.bf16.mxu1 %v11590_v23 }
 0xed4   :  { %9540 = vmatprep.subr.bf16.mxu0 %v12949_v8 }
 0xed6   :  { %9556 = vmatpush1.bf16.msra.mxu1 %v11594_v25  ;;  %v13002_v25 = vld [vmem:[#allocation67_spill] sm:$0xff] }
 0xed7   :  { %9542 = vmatpush3.bf16.msra.mxu0 %v12998_v47  ;;  %9557 = vmatprep.subr.bf16.mxu1 %v12949_v8 }
 0xed8   :  { %9543 = vmatprep.subr.bf16.mxu0 %v12949_v8 }
 0xedb   :  { %9545 = vmatpush3.bf16.msra.mxu0 %v12999_v50 }
 0xedc   :  { %9546 = vmatprep.subr.bf16.mxu0 %v12949_v8 }
 0xedf   :  { %9548 = vmatpush3.bf16.msra.mxu0 %v13000_v51 }
 0xee0   :  { %9582 = vmatprep.subr.bf16.mxu0 %v13001_v55 }
 0xf74   :  { %v2654_v9 = vpop.f32.mrb[18].mxu1  ;;  %v2725_v56 = vpop.f32.mrb[28].mxu0 }
 0xf75   :  { %v2656_v32 = vpop.f32.mrb[19].mxu1  ;;  %v8217_v1 = vpop.f32.mrb[29].mxu0  ;;  %v2732_v5 = vrot.slane %v2654_v9, 6 }
 0xf76   :  { %v2733_v59 = vrot.slane %v2656_v32, 6 }
 0xf77   :  { %v2738_v53 = vadd.f32 %v2732_v5, %v12973_v31 }
 0xf78   :  { %v2739_v51 = vadd.f32 %v2733_v59, %v11553_v30 }
 0xf94   :  { %v2807_v21 = vpop.f32.mrb[20].mxu1  ;;  %v2878_v47 = vpop.f32.mrb[30].mxu0 }
 0xf95   :  { %v2808_v23 = vadd.f32 %v2807_v21, %v13002_v25  ;;  %v2809_v27 = vpop.f32.mrb[21].mxu1  ;;  %v8252_v62 = vpop.f32.mrb[31].mxu0 }
 0xf96   :  { %v2810_v50 = vadd.f32 %v2809_v27, %v11555_v10 }
 0xf97   :  { %v2883_v28 = vrot.slane %v2808_v23, 6  ;;  %v2879_v23 = vadd.f32 %v2878_v47, %v11562_v0 }
 0xf98   :  { %v2893_v55 = vrot.slane %v2810_v50, 6  ;;  %v2734_v50 = vrot.slane %v2725_v56, 6 }
 0xf99   :  { %v2885_v24 = vadd.f32 %v2883_v28, %v2738_v53  ;;  %v2903_v28 = vrot.slane %v2879_v23, 6 }
 0xf9a   :  { %v2895_v39 = vadd.f32 %v2893_v55, %v2739_v51 }
 0xf9b   :  { %v7153_v6 = vmul.f32 -1.442695, %v2885_v24  ;;  %v2740_v24 = vadd.f32 %v2734_v50, %v11565_v48  ;;  %v13003_v50 = vld [vmem:[#allocation35_spill] sm:$0xff] }
 0xf9c   :  { %v7154_v1 = vmul.f32 -1.442695, %v2895_v39  ;;  %v2910_v39 = vrot.slane %v11741_v43, 7 }
 0xf9d   :  { %10396 = vpow2.f32 %v7153_v6 }
 0xf9e   :  { %10398 = vpow2.f32 %v7154_v1 }
 0xfa4   :  { %v2980_v9 = vpop.f32.mrb[22].mxu1 }
 0xfa5   :  { %v2985_v32 = vrot.slane %v2980_v9, 6  ;;  %v8271_v46 = vpop.f32.mrb[23].mxu1 }
 0xfa7   :  { %v10397_v21 = vpop.eup %10396  ;;  %v2987_v62 = vadd.f32 %v2985_v32, %v11320_v12 }
 0xfa8   :  { %v10399_v25 = vpop.eup %10398  ;;  %v2889_v27 = vadd.f32 1.0, %v10397_v21 }
 0xfa9   :  { %v2899_v10 = vadd.f32 1.0, %v10399_v25 }
 0xfaa   :  { %10400 = vrcp.f32 %v2889_v27 }
 0xfab   :  { %10402 = vrcp.f32 %v2899_v10 }
 0xfb4   :  { %v10401_v53 = vpop.eup %10400 }
 0xfb5   :  { %v10403_v6 = vpop.eup %10402  ;;  %v2905_v51 = vmul.f32 %v10401_v53, %v2903_v28  ;;  %v13004_v28 = vld [vmem:[#allocation36_spill] sm:$0xff] }
 0xfb6   :  { %v2912_v46 = vmul.f32 %v10403_v6, %v2910_v39  ;;  %v2908_v5 = vsub.f32 1.0, %v10403_v6  ;;  %v13006_v39 = vld [vmem:[#allocation38_spill] sm:$0xff] }
 0xfb7   :  { %v2906_v55 = vadd.f32 %v2905_v51, %v2740_v24  ;;  %v13007_v24 = vld [vmem:[#allocation39_spill] sm:$0xff]  ;;  %v13008_v51 = vld [vmem:[#allocation40_spill] sm:$0xff] }
 0xfb9   :  { %10404 = vtanh.f32 %v2906_v55  ;;  %v13010_v55 = vld [vmem:[#allocation42_spill] sm:$0xff] }
 0xfc3   :  { %v10405_v59 = vpop.eup %10404 }
 0xfc4   :  { %v2909_v1 = vmul.f32 %v10405_v59, %v2908_v5 }
 0xfc6   :  { %v11892_v25 = vadd.f32 %v2912_v46, %v2909_v1  ;;  %v13009_v46 = vld [vmem:[#allocation41_spill] sm:$0xff] }
 0xfc8   :  { %v11895_v10 = vrot.slane %v11892_v25, 2  ;;  %v3185_v32 = vrot.slane %v11892_v25, 1 }
 0xfca   :  { %8305 = vmatmul.mubr.f32.vlgmr.msra.gmra.mrb[32].mxu0 %v11895_v10 }
 0xfcb   :  { %9584 = vmatpush1.bf16.msra.mxu0 %v11350_v38  ;;  %3436 = vmatprep.mubr.f32.mxu0 %v12944_v35 }
 0xfcc   :  { %9586 = vmatprep.subr.bf16.mxu0 %v11360_v13 }
 0xfcf   :  { %9588 = vmatpush1.bf16.msra.mxu0 %v11362_v18 }
 0xfd0   :  { %9590 = vmatprep.subr.bf16.mxu0 %v11369_v29 }
 0xfd3   :  { %9592 = vmatpush1.bf16.msra.mxu0 %v11372_v33 }
 0xfd4   :  { %9594 = vmatprep.subr.bf16.mxu0 %v11379_v40 }
 0xfd7   :  { %9596 = vmatpush1.bf16.msra.mxu0 %v11382_v44 }
 0xfd8   :  { %9610 = vmatprep.subr.bf16.mxu0 %v11389_v49 }
0x109d   :  { %v3057_v43 = vpop.f32.mrb[32].mxu0 }
0x109e   :  { %v3062_v47 = vrot.slane %v3057_v43, 6  ;;  %v8306_v56 = vpop.f32.mrb[33].mxu0 }
0x10a0   :  { %v3064_v9 = vadd.f32 %v3062_v47, %v2987_v62  ;;  %v13005_v62 = vld [vmem:[#allocation37_spill] sm:$0xff]  ;;  %v13018_v47 = vld [vmem:[#allocation48_spill] sm:$0xff] }
0x10a2   :  { %3066 = vrot.lane.b32.xlu1 %v3064_v9, %s10907_s11 }
0x10a6   :  { %3186 = vrot.lane.b32.xlu1 %v3185_v32, %s10905_s4 }
0x1114   :  { %v3067_v21 = vpop.permute.xlu1 %3066 }
0x1115   :  { %v3069_v27 = vmax.f32 %v3064_v9, %v3067_v21  ;;  %v13015_v9 = vld [vmem:[#allocation44_spill] sm:$0xff] }
0x1117   :  { %v3071_v23 = vrot.slane %v3069_v27, 2 }
0x1118   :  { %v3187_v53 = vpop.permute.xlu1 %3186 }
0x1119   :  { %7156 = vmatmul.mubr.msk.f32.vlgmr.msra.gmra.mrb[24].mxu1 %vm1500_vm7, %v3071_v23  ;;  %v3189_v6 = vsel %vm619_vm4, %v11895_v10, %v3187_v53  ;;  %v13016_v23 = vld [vmem:[#allocation46_spill] sm:$0xff]  ;;  %v13017_v53 = vld [vmem:[#allocation47_spill] sm:$0xff] }
0x111a   :  { %9559 = vmatpush3.bf16.msra.mxu1 %v13003_v50  ;;  %8323 = vmatprep.mubr.msk.f32.mxu1 %vm10903_vm0, %v12944_v35 }
0x111b   :  { %9560 = vmatprep.subr.bf16.mxu1 %v12949_v8 }
0x111e   :  { %9562 = vmatpush3.bf16.msra.mxu1 %v13004_v28 }
0x111f   :  { %9563 = vmatprep.subr.bf16.mxu1 %v12949_v8 }
0x1122   :  { %9565 = vmatpush3.bf16.msra.mxu1 %v13005_v62 }
0x1123   :  { %9566 = vmatprep.subr.bf16.mxu1 %v12949_v8 }
0x1126   :  { %9568 = vmatpush3.bf16.msra.mxu1 %v13006_v39 }
0x1127   :  { %9569 = vmatprep.subr.bf16.mxu1 %v12949_v8 }
0x1129   :  { %8324 = vmatmul.mubr.msk.f32.vlgmr.msra.gmra.mrb[26].mxu1 %vm255_vm2, %v3189_v6 }
0x112a   :  { %9571 = vmatpush3.bf16.msra.mxu1 %v13007_v24  ;;  %8342 = vmatprep.mubr.msk.f32.mxu1 %vm10903_vm0, %v12944_v35 }
0x112b   :  { %9572 = vmatprep.subr.bf16.mxu1 %v12949_v8 }
0x112e   :  { %9574 = vmatpush3.bf16.msra.mxu1 %v13008_v51 }
0x112f   :  { %9575 = vmatprep.subr.bf16.mxu1 %v12949_v8 }
0x1132   :  { %9577 = vmatpush3.bf16.msra.mxu1 %v13009_v46 }
0x1133   :  { %9578 = vmatprep.subr.bf16.mxu1 %v12949_v8 }
0x1136   :  { %9580 = vmatpush3.bf16.msra.mxu1 %v13010_v55 }
0x1137   :  { %9597 = vmatprep.subr.bf16.mxu1 %v12949_v8 }
0x11ec   :  { %v11934_v5 = vpop.f32.mrb[24].mxu1 }
0x11ed   :  { %13011 = vst [vmem:[#allocation68_spill] sm:$0xff] %v11934_v5  ;;  %v11938_v59 = vsel %vm619_vm4, %v11934_v5, -inf  ;;  %v11940_v1 = vpop.f32.mrb[25].mxu1 }
0x11ee   :  { %13012 = vst [vmem:[#allocation54_spill] sm:$0xff] %v11938_v59  ;;  %13013 = vst [vmem:[#allocation55_spill] sm:$0xff] %v11940_v1  ;;  %v11944_v43 = vsel %vm619_vm4, %v11940_v1, -inf }
0x11ef   :  { %13014 = vst [vmem:[#allocation59_spill] sm:$0xff] %v11944_v43 }
0x11fc   :  { %v3259_v56 = vpop.f32.mrb[26].mxu1 }
0x11fd   :  { %v3260_v32 = vadd.f32 %v3259_v56, %v13015_v9  ;;  %v8325_v21 = vpop.f32.mrb[27].mxu1  ;;  %v13019_v56 = vld [vmem:[#allocation49_spill] sm:$0xff] }
0x11ff   :  { %10406 = vtanh.f32 %v3260_v32 }
0x1209   :  { %v10407_v27 = vpop.eup %10406 }
0x120a   :  { %8343 = vmatmul.mubr.msk.f32.vlgmr.msra.gmra.mrb[28].mxu1 %vm255_vm2, %v10407_v27 }
0x120b   :  { %9599 = vmatpush3.bf16.msra.mxu1 %v13016_v23  ;;  %8361 = vmatprep.mubr.msk.f32.mxu1 %vm10903_vm0, %v12944_v35 }
0x120c   :  { %9600 = vmatprep.subr.bf16.mxu1 %v12949_v8 }
0x120f   :  { %9602 = vmatpush3.bf16.msra.mxu1 %v13017_v53 }
0x1210   :  { %9603 = vmatprep.subr.bf16.mxu1 %v12949_v8 }
0x1213   :  { %9605 = vmatpush3.bf16.msra.mxu1 %v13018_v47 }
0x1214   :  { %9606 = vmatprep.subr.bf16.mxu1 %v12949_v8 }
0x1217   :  { %9608 = vmatpush3.bf16.msra.mxu1 %v13019_v56 }
0x1218   :  { %9641 = vmatprep.subr.bf16.mxu1 %v12949_v8 }
0x12dd   :  { %v3333_v32 = vpop.f32.mrb[28].mxu1 }
0x12de   :  { %v3337_v21 = vsel %vm994_vm5, %v3333_v32, -inf  ;;  %v8344_v27 = vpop.f32.mrb[29].mxu1 }
0x12df   :  { %v3338_v1 = vrot.slane %v3337_v21, 4 }
0x12e1   :  { %v3339_v5 = vmax.f32 %v3337_v21, %v3338_v1  ;;  %v13031_v21 = vld [vmem:[#allocation65_spill] sm:$0xff] }
0x12e3   :  { %v3340_v43 = vrot.slane %v3339_v5, 2 }
0x12e5   :  { %v3341_v59 = vmax.f32 %v3339_v5, %v3340_v43 }
0x12e7   :  { %v3342_v23 = vrot.slane %v3341_v59, 1 }
0x12e9   :  { %v3343_v53 = vmax.f32 %v3341_v59, %v3342_v23 }
0x12eb   :  { %v3344_v9 = vsub.f32 %v3333_v32, %v3343_v53 }
0x12ed   :  { %v3345_v55 = vmul.f32 1.442695, %v3344_v9 }
0x12ef   :  { %10408 = vpow2.f32 %v3345_v55 }
0x12f9   :  { %v10409_v47 = vpop.eup %10408 }
0x12fa   :  { %v3347_v46 = vsel %vm994_vm5, %v10409_v47, 0.0 }
0x12fb   :  { %v3348_v51 = vrot.slane %v3347_v46, 4 }
0x12fd   :  { %v3349_v56 = vadd.f32 %v3348_v51, %v3347_v46  ;;  %v13027_v51 = vld [vmem:[#allocation63_spill] sm:$0xff]  ;;  %v13028_v46 = vld [vmem:[#allocation72_spill] sm:$0xff] }
0x12ff   :  { %v3350_v24 = vrot.slane %v3349_v56, 2 }
0x1301   :  { %v3351_v39 = vadd.f32 %v3350_v24, %v3349_v56  ;;  %v13026_v24 = vld [vmem:[#allocation71_spill] sm:$0xff]  ;;  %v13030_v56 = vld [vmem:[#allocation64_spill] sm:$0xff] }
0x1303   :  { %v3352_v62 = vrot.slane %v3351_v39, 1 }
0x1305   :  { %v3353_v28 = vadd.f32 %v3352_v62, %v3351_v39  ;;  %v13023_v62 = vld [vmem:[#allocation58_spill] sm:$0xff] }
0x1306   :  { %v13024_v39 = vld [vmem:[#allocation62_spill] sm:$0xff] }
0x1307   :  { %10410 = vrcp.f32 %v3353_v28  ;;  %v13022_v28 = vld [vmem:[#allocation61_spill] sm:$0xff] }
0x1311   :  { %v10411_v27 = vpop.eup %10410 }
0x1312   :  { %v3355_v50 = vmul.f32 %v10411_v27, %v10409_v47  ;;  %v13029_v47 = vld [vmem:[#allocation73_spill] sm:$0xff]  ;;  %v13032_v27 = vld [vmem:[#allocation66_spill] sm:$0xff] }
0x1314   :  { %3358 = vperm.xlu0 %10355, %v3355_v50   ;;  %v13020_v50 = vld [vmem:[#allocation60_spill] sm:$0xff] }
0x1393   :  { %v3359_v1 = vpop.permute.xlu0 %3358 }
0x1394   :  { %v3361_v5 = vmul.f32 %v3359_v1, %v3189_v6  ;;  %v13025_v6 = vld [vmem:[#allocation70_spill] sm:$0xff]  ;;  %v13033_v1 = vld [vmem:[#allocation45_spill] sm:$0xff] }
0x1396   :  { %v3362_v59 = vsel %vm1020_vm6, %v3361_v5, 0.0 }
0x1397   :  { %v3363_v43 = vrot.slane %v3362_v59, 4 }
0x1399   :  { %v3364_v9 = vadd.f32 %v3363_v43, %v3362_v59 }
0x139b   :  { %v3365_v55 = vrot.slane %v3364_v9, 2 }
0x139d   :  { %v3366_v23 = vadd.f32 %v3365_v55, %v3364_v9 }
0x139f   :  { %v3367_v53 = vrot.slane %v3366_v23, 1 }
0x13a1   :  { %v3368_v32 = vadd.f32 %v3367_v53, %v3366_v23 }
0x13a3   :  { %7159 = vmatmul.mubr.msk.f32.vlgmr.msra.gmra.mrb[34].mxu0 %vm255_vm2, %v3368_v32  ;;  %8362 = vmatmul.mubr.msk.f32.vlgmr.msra.gmra.mrb[30].mxu1 %vm255_vm2, %v3368_v32 }
0x13a4   :  { %9612 = vmatpush1.bf16.msra.mxu0 %v11395_v15  ;;  %9643 = vmatpush3.bf16.msra.mxu1 %v11397_v17 }
0x13a5   :  { %9614 = vmatprep.subr.bf16.mxu0 %v11401_v11  ;;  %9644 = vmatprep.subr.bf16.mxu1 %v12949_v8 }
0x13a6   :  { %3589 = vmatprep.mubr.f32.mxu0 %v12944_v35  ;;  %8396 = vmatprep.mubr.msk.f32.mxu1 %vm10903_vm0, %v12944_v35 }
0x13a8   :  { %9616 = vmatpush1.bf16.msra.mxu0 %v11409_v36  ;;  %9646 = vmatpush3.bf16.msra.mxu1 %v11411_v37 }
0x13a9   :  { %9618 = vmatprep.subr.bf16.mxu0 %v11415_v42  ;;  %9647 = vmatprep.subr.bf16.mxu1 %v12949_v8 }
0x13ac   :  { %9620 = vmatpush1.bf16.msra.mxu0 %v11422_v52  ;;  %9649 = vmatpush3.bf16.msra.mxu1 %v11424_v54 }
0x13ad   :  { %9622 = vmatprep.subr.bf16.mxu0 %v11428_v57  ;;  %9650 = vmatprep.subr.bf16.mxu1 %v12949_v8 }
0x13b0   :  { %9624 = vmatpush1.bf16.msra.mxu0 %v11432_v3  ;;  %9652 = vmatpush3.bf16.msra.mxu1 %v11434_v7 }
0x13b1   :  { %9626 = vmatprep.subr.bf16.mxu0 %v11438_v14  ;;  %9653 = vmatprep.subr.bf16.mxu1 %v12949_v8 }
0x13b4   :  { %9628 = vmatpush1.bf16.msra.mxu0 %v11442_v34  ;;  %9655 = vmatpush3.bf16.msra.mxu1 %v11444_v41 }
0x13b5   :  { %9630 = vmatprep.subr.bf16.mxu0 %v11448_v45  ;;  %9656 = vmatprep.subr.bf16.mxu1 %v12949_v8 }
0x13b8   :  { %9632 = vmatpush1.bf16.msra.mxu0 %v11452_v60  ;;  %9658 = vmatpush3.bf16.msra.mxu1 %v11454_v61 }
0x13b9   :  { %9634 = vmatprep.subr.bf16.mxu0 %v11458_v63  ;;  %9659 = vmatprep.subr.bf16.mxu1 %v12949_v8 }
0x13bc   :  { %9636 = vmatpush1.bf16.msra.mxu0 %v12954_v2  ;;  %9661 = vmatpush3.bf16.msra.mxu1 %v12955_v16 }
0x13bd   :  { %9638 = vmatprep.subr.bf16.mxu0 %v12956_v19  ;;  %9662 = vmatprep.subr.bf16.mxu1 %v12949_v8 }
0x13c0   :  { %9640 = vmatpush1.bf16.msra.mxu0 %v12957_v22  ;;  %9664 = vmatpush3.bf16.msra.mxu1 %v12987_v26 }
0x13c1   :  { %9665 = vmatprep.subr.bf16.mxu0 %v12949_v8  ;;  %9677 = vmatprep.subr.bf16.mxu1 %v12949_v8 }
0x13c3   :  { %3590 = vmatmul.mubr.f32.vlgmr.msra.gmra.mrb[36].mxu0 %v11895_v10  ;;  %8397 = vmatmul.mubr.f32.vlgmr.msra.gmra.mrb[32].mxu1 %v11895_v10  ;;  %v13021_v10 = vld [vmem:[#allocation57_spill] sm:$0xff] }
0x13c4   :  { %9667 = vmatpush3.bf16.msra.mxu0 %v12988_v20  ;;  %8415 = vmatprep.mubr.msk.f32.mxu0 %vm10903_vm0, %v12944_v35 }
0x13c5   :  { %9668 = vmatprep.subr.bf16.mxu0 %v12949_v8  ;;  %9679 = vmatpush3.bf16.msra.mxu1 %v12989_v4 }
0x13c6   :  { %9680 = vmatprep.subr.bf16.mxu1 %v12949_v8  ;;  %8450 = vmatprep.mubr.msk.f32.mxu1 %vm10903_vm0, %v12944_v35 }
0x13c8   :  { %9670 = vmatpush3.bf16.msra.mxu0 %v12990_v58 }
0x13c9   :  { %9671 = vmatprep.subr.bf16.mxu0 %v12949_v8  ;;  %9682 = vmatpush3.bf16.msra.mxu1 %v13020_v50 }
0x13ca   :  { %9683 = vmatprep.subr.bf16.mxu1 %v12949_v8 }
0x13cc   :  { %9673 = vmatpush3.bf16.msra.mxu0 %v13021_v10 }
0x13cd   :  { %9674 = vmatprep.subr.bf16.mxu0 %v12949_v8  ;;  %9685 = vmatpush3.bf16.msra.mxu1 %v13022_v28 }
0x13ce   :  { %9686 = vmatprep.subr.bf16.mxu1 %v12949_v8 }
0x13d0   :  { %9676 = vmatpush3.bf16.msra.mxu0 %v13023_v62 }
0x13d1   :  { %9688 = vmatpush3.bf16.msra.mxu1 %v13024_v39  ;;  %9702 = vmatprep.subr.bf16.mxu0 %v13025_v6 }
0x13d2   :  { %9689 = vmatprep.subr.bf16.mxu1 %v12949_v8 }
0x13d3   :  { %8416 = vmatmul.mubr.msk.f32.vlgmr.msra.gmra.mrb[38].mxu0 %vm255_vm2, %v3368_v32 }
0x13d4   :  { %9704 = vmatpush1.bf16.msra.mxu0 %v13026_v24  ;;  %3922 = vmatprep.mubr.f32.mxu0 %v12944_v35  ;;  %v13035_v24 = vld [vmem:[#allocation69_spill] sm:$0xff] }
0x13d5   :  { %9691 = vmatpush3.bf16.msra.mxu1 %v13027_v51  ;;  %9706 = vmatprep.subr.bf16.mxu0 %v13028_v46 }
0x13d6   :  { %9692 = vmatprep.subr.bf16.mxu1 %v12949_v8 }
0x13d8   :  { %9708 = vmatpush1.bf16.msra.mxu0 %v13029_v47 }
0x13d9   :  { %9694 = vmatpush3.bf16.msra.mxu1 %v13030_v56  ;;  %9709 = vmatprep.subr.bf16.mxu0 %v12949_v8  ;;  %v13034_v56 = vld [vmem:[#allocation67_spill] sm:$0xff] }
0x13da   :  { %9695 = vmatprep.subr.bf16.mxu1 %v12949_v8 }
0x13dd   :  { %9697 = vmatpush3.bf16.msra.mxu1 %v13031_v21 }
0x13de   :  { %9698 = vmatprep.subr.bf16.mxu1 %v12949_v8 }
0x13e1   :  { %9700 = vmatpush3.bf16.msra.mxu1 %v13032_v27 }
0x13e2   :  { %9734 = vmatprep.subr.bf16.mxu1 %v13033_v1 }
0x1476   :  { %v3438_v5 = vpop.f32.mrb[34].mxu0  ;;  %v3509_v59 = vpop.f32.mrb[30].mxu1 }
0x1477   :  { %v3440_v43 = vpop.f32.mrb[35].mxu0  ;;  %v8363_v9 = vpop.f32.mrb[31].mxu1  ;;  %v3516_v55 = vrot.slane %v3438_v5, 5 }
0x1478   :  { %v3517_v23 = vrot.slane %v3440_v43, 5 }
0x1479   :  { %v3522_v6 = vadd.f32 %v3516_v55, %v12973_v31 }
0x147a   :  { %v3523_v27 = vadd.f32 %v3517_v23, %v11553_v30 }
0x1496   :  { %v3591_v53 = vpop.f32.mrb[36].mxu0  ;;  %v3662_v32 = vpop.f32.mrb[32].mxu1 }
0x1497   :  { %v3592_v47 = vadd.f32 %v3591_v53, %v13034_v56  ;;  %v3593_v46 = vpop.f32.mrb[37].mxu0  ;;  %v8398_v51 = vpop.f32.mrb[33].mxu1 }
0x1498   :  { %v3594_v21 = vadd.f32 %v3593_v46, %v13035_v24 }
0x1499   :  { %v3667_v39 = vrot.slane %v3592_v47, 5  ;;  %v3663_v47 = vadd.f32 %v3662_v32, %v11562_v0 }
0x149a   :  { %v3677_v1 = vrot.slane %v3594_v21, 5  ;;  %v3518_v21 = vrot.slane %v3509_v59, 5 }
0x149b   :  { %v3669_v62 = vadd.f32 %v3667_v39, %v3522_v6  ;;  %v3687_v39 = vrot.slane %v3663_v47, 5 }
0x149c   :  { %v3679_v28 = vadd.f32 %v3677_v1, %v3523_v27 }
0x149d   :  { %v7161_v10 = vmul.f32 -1.442695, %v3669_v62  ;;  %v3524_v62 = vadd.f32 %v3518_v21, %v11565_v48  ;;  %v13036_v21 = vld [vmem:[#allocation35_spill] sm:$0xff] }
0x149e   :  { %v7162_v9 = vmul.f32 -1.442695, %v3679_v28  ;;  %v3694_v28 = vrot.slane %v11892_v25, 7 }
0x149f   :  { %10412 = vpow2.f32 %v7161_v10 }
0x14a0   :  { %10414 = vpow2.f32 %v7162_v9 }
0x14a6   :  { %v3764_v5 = vpop.f32.mrb[38].mxu0 }
0x14a7   :  { %v3769_v43 = vrot.slane %v3764_v5, 5  ;;  %v8417_v50 = vpop.f32.mrb[39].mxu0 }
0x14a9   :  { %v10413_v53 = vpop.eup %10412  ;;  %v3771_v51 = vadd.f32 %v3769_v43, %v11320_v12 }
0x14aa   :  { %v10415_v56 = vpop.eup %10414  ;;  %v3673_v46 = vadd.f32 1.0, %v10413_v53 }
0x14ab   :  { %v3683_v24 = vadd.f32 1.0, %v10415_v56 }
0x14ac   :  { %10416 = vrcp.f32 %v3673_v46 }
0x14ad   :  { %10418 = vrcp.f32 %v3683_v24 }
0x14b6   :  { %v10417_v6 = vpop.eup %10416 }
0x14b7   :  { %v10419_v10 = vpop.eup %10418  ;;  %v3689_v27 = vmul.f32 %v10417_v6, %v3687_v39  ;;  %v13037_v39 = vld [vmem:[#allocation36_spill] sm:$0xff]  ;;  %v13038_v6 = vld [vmem:[#allocation37_spill] sm:$0xff] }
0x14b8   :  { %v3696_v50 = vmul.f32 %v10419_v10, %v3694_v28  ;;  %v3692_v55 = vsub.f32 1.0, %v10419_v10  ;;  %v13039_v28 = vld [vmem:[#allocation38_spill] sm:$0xff] }
0x14b9   :  { %v3690_v1 = vadd.f32 %v3689_v27, %v3524_v62  ;;  %v13040_v62 = vld [vmem:[#allocation39_spill] sm:$0xff]  ;;  %v13041_v27 = vld [vmem:[#allocation40_spill] sm:$0xff] }
0x14bb   :  { %10420 = vtanh.f32 %v3690_v1  ;;  %v13043_v1 = vld [vmem:[#allocation42_spill] sm:$0xff] }
0x14c5   :  { %v10421_v23 = vpop.eup %10420 }
0x14c6   :  { %v3693_v9 = vmul.f32 %v10421_v23, %v3692_v55 }
0x14c8   :  { %v12044_v56 = vadd.f32 %v3696_v50, %v3693_v9  ;;  %v13042_v50 = vld [vmem:[#allocation41_spill] sm:$0xff] }
0x14ca   :  { %v3969_v24 = vrot.slane %v12044_v56, 2  ;;  %v12048_v59 = vrot.slane %v12044_v56, 3 }
0x14cc   :  { %3970 = vrot.lane.b32.xlu0 %v3969_v24, %s10905_s4  ;;  %8451 = vmatmul.mubr.f32.vlgmr.msra.gmra.mrb[34].mxu1 %v12048_v59 }
0x14cd   :  { %9736 = vmatpush1.bf16.msra.mxu1 %v11350_v38  ;;  %4220 = vmatprep.mubr.f32.mxu1 %v12944_v35 }
0x14ce   :  { %9738 = vmatprep.subr.bf16.mxu1 %v11360_v13 }
0x14d1   :  { %9740 = vmatpush1.bf16.msra.mxu1 %v11362_v18 }
0x14d2   :  { %9742 = vmatprep.subr.bf16.mxu1 %v11369_v29 }
0x14d5   :  { %9744 = vmatpush1.bf16.msra.mxu1 %v11372_v33 }
0x14d6   :  { %9746 = vmatprep.subr.bf16.mxu1 %v11379_v40 }
0x14d9   :  { %9748 = vmatpush1.bf16.msra.mxu1 %v11382_v44 }
0x14da   :  { %9762 = vmatprep.subr.bf16.mxu1 %v11389_v49 }
0x159f   :  { %v3841_v25 = vpop.f32.mrb[34].mxu1 }
0x15a0   :  { %v3846_v32 = vrot.slane %v3841_v25, 5  ;;  %v8452_v5 = vpop.f32.mrb[35].mxu1  ;;  %v13051_v25 = vld [vmem:[#allocation48_spill] sm:$0xff] }
0x15a1   :  { %v13048_v5 = vld [vmem:[#allocation44_spill] sm:$0xff] }
0x15a2   :  { %v3848_v43 = vadd.f32 %v3846_v32, %v3771_v51  ;;  %v3971_v51 = vpop.permute.xlu0 %3970 }
0x15a3   :  { %v3973_v10 = vsel %vm619_vm4, %v12048_v59, %v3971_v51  ;;  %v13050_v51 = vld [vmem:[#allocation47_spill] sm:$0xff] }
0x15a4   :  { %3850 = vrot.lane.b32.xlu1 %v3848_v43, %s10907_s11 }
0x1616   :  { %v3851_v53 = vpop.permute.xlu1 %3850 }
0x1617   :  { %v3853_v46 = vmax.f32 %v3848_v43, %v3851_v53 }
0x1619   :  { %v3855_v47 = vrot.slane %v3853_v46, 3 }
0x161b   :  { %7164 = vmatmul.mubr.msk.f32.vlgmr.msra.gmra.mrb[40].mxu0 %vm1500_vm7, %v3855_v47  ;;  %v13049_v47 = vld [vmem:[#allocation46_spill] sm:$0xff] }
0x161c   :  { %9711 = vmatpush3.bf16.msra.mxu0 %v13036_v21  ;;  %8469 = vmatprep.mubr.msk.f32.mxu0 %vm10903_vm0, %v12944_v35 }
0x161d   :  { %9712 = vmatprep.subr.bf16.mxu0 %v12949_v8 }
0x1620   :  { %9714 = vmatpush3.bf16.msra.mxu0 %v13037_v39 }
0x1621   :  { %9715 = vmatprep.subr.bf16.mxu0 %v12949_v8 }
0x1624   :  { %9717 = vmatpush3.bf16.msra.mxu0 %v13038_v6 }
0x1625   :  { %9718 = vmatprep.subr.bf16.mxu0 %v12949_v8 }
0x1628   :  { %9720 = vmatpush3.bf16.msra.mxu0 %v13039_v28 }
0x1629   :  { %9721 = vmatprep.subr.bf16.mxu0 %v12949_v8 }
0x162b   :  { %8470 = vmatmul.mubr.msk.f32.vlgmr.msra.gmra.mrb[42].mxu0 %vm255_vm2, %v3973_v10 }
0x162c   :  { %9723 = vmatpush3.bf16.msra.mxu0 %v13040_v62  ;;  %8488 = vmatprep.mubr.msk.f32.mxu0 %vm10903_vm0, %v12944_v35 }
0x162d   :  { %9724 = vmatprep.subr.bf16.mxu0 %v12949_v8 }
0x1630   :  { %9726 = vmatpush3.bf16.msra.mxu0 %v13041_v27 }
0x1631   :  { %9727 = vmatprep.subr.bf16.mxu0 %v12949_v8 }
0x1634   :  { %9729 = vmatpush3.bf16.msra.mxu0 %v13042_v50 }
0x1635   :  { %9730 = vmatprep.subr.bf16.mxu0 %v12949_v8 }
0x1638   :  { %9732 = vmatpush3.bf16.msra.mxu0 %v13043_v1 }
0x1639   :  { %9749 = vmatprep.subr.bf16.mxu0 %v12949_v8 }
0x16ee   :  { %v12086_v55 = vpop.f32.mrb[40].mxu0 }
0x16ef   :  { %13044 = vst [vmem:[#allocation56_spill] sm:$0xff] %v12086_v55  ;;  %v12090_v23 = vsel %vm619_vm4, %v12086_v55, -inf  ;;  %v12092_v9 = vpop.f32.mrb[41].mxu0 }
0x16f0   :  { %13045 = vst [vmem:[#allocation78_spill] sm:$0xff] %v12090_v23  ;;  %13046 = vst [vmem:[#allocation79_spill] sm:$0xff] %v12092_v9  ;;  %v12096_v24 = vsel %vm619_vm4, %v12092_v9, -inf }
0x16f1   :  { %13047 = vst [vmem:[#allocation80_spill] sm:$0xff] %v12096_v24 }
0x16fe   :  { %v4043_v32 = vpop.f32.mrb[42].mxu0 }
0x16ff   :  { %v4044_v43 = vadd.f32 %v4043_v32, %v13048_v5  ;;  %v8471_v53 = vpop.f32.mrb[43].mxu0  ;;  %v13052_v32 = vld [vmem:[#allocation49_spill] sm:$0xff] }
0x1701   :  { %10422 = vtanh.f32 %v4044_v43 }
0x170b   :  { %v10423_v46 = vpop.eup %10422 }
0x170c   :  { %8489 = vmatmul.mubr.msk.f32.vlgmr.msra.gmra.mrb[44].mxu0 %vm255_vm2, %v10423_v46 }
0x170d   :  { %9751 = vmatpush3.bf16.msra.mxu0 %v13049_v47  ;;  %8507 = vmatprep.mubr.msk.f32.mxu0 %vm10903_vm0, %v12944_v35 }
0x170e   :  { %9752 = vmatprep.subr.bf16.mxu0 %v12949_v8 }
0x1711   :  { %9754 = vmatpush3.bf16.msra.mxu0 %v13050_v51 }
0x1712   :  { %9755 = vmatprep.subr.bf16.mxu0 %v12949_v8 }
0x1715   :  { %9757 = vmatpush3.bf16.msra.mxu0 %v13051_v25 }
0x1716   :  { %9758 = vmatprep.subr.bf16.mxu0 %v12949_v8 }
0x1719   :  { %9760 = vmatpush3.bf16.msra.mxu0 %v13052_v32 }
0x171a   :  { %9793 = vmatprep.subr.bf16.mxu0 %v12949_v8 }
0x17df   :  { %v4117_v43 = vpop.f32.mrb[44].mxu0 }
0x17e0   :  { %v4121_v53 = vsel %vm994_vm5, %v4117_v43, -inf  ;;  %v8490_v46 = vpop.f32.mrb[45].mxu0 }
0x17e1   :  { %v4122_v9 = vrot.slane %v4121_v53, 4 }
0x17e3   :  { %v4123_v55 = vmax.f32 %v4121_v53, %v4122_v9  ;;  %v13064_v53 = vld [vmem:[#allocation65_spill] sm:$0xff] }
0x17e5   :  { %v4124_v24 = vrot.slane %v4123_v55, 2 }
0x17e7   :  { %v4125_v23 = vmax.f32 %v4123_v55, %v4124_v24 }
0x17e9   :  { %v4126_v47 = vrot.slane %v4125_v23, 1 }
0x17eb   :  { %v4127_v51 = vmax.f32 %v4125_v23, %v4126_v47 }
0x17ed   :  { %v4128_v5 = vsub.f32 %v4117_v43, %v4127_v51 }
0x17ef   :  { %v4129_v1 = vmul.f32 1.442695, %v4128_v5 }
0x17f1   :  { %10424 = vpow2.f32 %v4129_v1 }
0x17fb   :  { %v10425_v25 = vpop.eup %10424 }
0x17fc   :  { %v4131_v50 = vsel %vm994_vm5, %v10425_v25, 0.0 }
0x17fd   :  { %v4132_v27 = vrot.slane %v4131_v50, 4 }
0x17ff   :  { %v4133_v32 = vadd.f32 %v4132_v27, %v4131_v50  ;;  %v13060_v27 = vld [vmem:[#allocation63_spill] sm:$0xff]  ;;  %v13061_v50 = vld [vmem:[#allocation72_spill] sm:$0xff] }
0x1801   :  { %v4134_v62 = vrot.slane %v4133_v32, 2 }
0x1803   :  { %v4135_v28 = vadd.f32 %v4134_v62, %v4133_v32  ;;  %v13059_v62 = vld [vmem:[#allocation71_spill] sm:$0xff]  ;;  %v13063_v32 = vld [vmem:[#allocation64_spill] sm:$0xff] }
0x1805   :  { %v4136_v6 = vrot.slane %v4135_v28, 1 }
0x1807   :  { %v4137_v39 = vadd.f32 %v4136_v6, %v4135_v28  ;;  %v13056_v6 = vld [vmem:[#allocation58_spill] sm:$0xff] }
0x1808   :  { %v13057_v28 = vld [vmem:[#allocation62_spill] sm:$0xff] }
0x1809   :  { %10426 = vrcp.f32 %v4137_v39  ;;  %v13055_v39 = vld [vmem:[#allocation61_spill] sm:$0xff] }
0x1813   :  { %v10427_v46 = vpop.eup %10426 }
0x1814   :  { %v4139_v21 = vmul.f32 %v10427_v46, %v10425_v25  ;;  %v13062_v25 = vld [vmem:[#allocation73_spill] sm:$0xff]  ;;  %v13065_v46 = vld [vmem:[#allocation66_spill] sm:$0xff] }
0x1816   :  { %4142 = vperm.xlu1 %10354, %v4139_v21   ;;  %v13053_v21 = vld [vmem:[#allocation60_spill] sm:$0xff] }
0x1895   :  { %v4143_v9 = vpop.permute.xlu1 %4142 }
0x1896   :  { %v4145_v55 = vmul.f32 %v4143_v9, %v3973_v10  ;;  %v13058_v10 = vld [vmem:[#allocation70_spill] sm:$0xff]  ;;  %v13066_v9 = vld [vmem:[#allocation45_spill] sm:$0xff] }
0x1898   :  { %v4146_v23 = vsel %vm1020_vm6, %v4145_v55, 0.0 }
0x1899   :  { %v4147_v24 = vrot.slane %v4146_v23, 4 }
0x189b   :  { %v4148_v5 = vadd.f32 %v4147_v24, %v4146_v23 }
0x189d   :  { %v4149_v1 = vrot.slane %v4148_v5, 2 }
0x189f   :  { %v4150_v47 = vadd.f32 %v4149_v1, %v4148_v5 }
0x18a1   :  { %v4151_v51 = vrot.slane %v4150_v47, 1 }
0x18a3   :  { %v4152_v43 = vadd.f32 %v4151_v51, %v4150_v47 }
0x18a5   :  { %7167 = vmatmul.mubr.msk.f32.vlgmr.msra.gmra.mrb[36].mxu1 %vm255_vm2, %v4152_v43  ;;  %8508 = vmatmul.mubr.msk.f32.vlgmr.msra.gmra.mrb[46].mxu0 %vm255_vm2, %v4152_v43 }
0x18a6   :  { %9764 = vmatpush1.bf16.msra.mxu1 %v11395_v15  ;;  %9795 = vmatpush3.bf16.msra.mxu0 %v11397_v17 }
0x18a7   :  { %9766 = vmatprep.subr.bf16.mxu1 %v11401_v11  ;;  %9796 = vmatprep.subr.bf16.mxu0 %v12949_v8 }
0x18a8   :  { %4373 = vmatprep.mubr.f32.mxu1 %v12944_v35  ;;  %8542 = vmatprep.mubr.msk.f32.mxu0 %vm10903_vm0, %v12944_v35 }
0x18aa   :  { %9768 = vmatpush1.bf16.msra.mxu1 %v11409_v36  ;;  %9798 = vmatpush3.bf16.msra.mxu0 %v11411_v37 }
0x18ab   :  { %9770 = vmatprep.subr.bf16.mxu1 %v11415_v42  ;;  %9799 = vmatprep.subr.bf16.mxu0 %v12949_v8 }
0x18ae   :  { %9772 = vmatpush1.bf16.msra.mxu1 %v11422_v52  ;;  %9801 = vmatpush3.bf16.msra.mxu0 %v11424_v54 }
0x18af   :  { %9774 = vmatprep.subr.bf16.mxu1 %v11428_v57  ;;  %9802 = vmatprep.subr.bf16.mxu0 %v12949_v8 }
0x18b2   :  { %9776 = vmatpush1.bf16.msra.mxu1 %v11432_v3  ;;  %9804 = vmatpush3.bf16.msra.mxu0 %v11434_v7 }
0x18b3   :  { %9778 = vmatprep.subr.bf16.mxu1 %v11438_v14  ;;  %9805 = vmatprep.subr.bf16.mxu0 %v12949_v8 }
0x18b6   :  { %9780 = vmatpush1.bf16.msra.mxu1 %v11442_v34  ;;  %9807 = vmatpush3.bf16.msra.mxu0 %v11444_v41 }
0x18b7   :  { %9782 = vmatprep.subr.bf16.mxu1 %v11448_v45  ;;  %9808 = vmatprep.subr.bf16.mxu0 %v12949_v8 }
0x18ba   :  { %9784 = vmatpush1.bf16.msra.mxu1 %v11452_v60  ;;  %9810 = vmatpush3.bf16.msra.mxu0 %v11454_v61 }
0x18bb   :  { %9786 = vmatprep.subr.bf16.mxu1 %v11458_v63  ;;  %9811 = vmatprep.subr.bf16.mxu0 %v12949_v8 }
0x18be   :  { %9788 = vmatpush1.bf16.msra.mxu1 %v12954_v2  ;;  %9813 = vmatpush3.bf16.msra.mxu0 %v12955_v16 }
0x18bf   :  { %9790 = vmatprep.subr.bf16.mxu1 %v12956_v19  ;;  %9814 = vmatprep.subr.bf16.mxu0 %v12949_v8 }
0x18c2   :  { %9792 = vmatpush1.bf16.msra.mxu1 %v12957_v22  ;;  %9816 = vmatpush3.bf16.msra.mxu0 %v12987_v26 }
0x18c3   :  { %9817 = vmatprep.subr.bf16.mxu1 %v12949_v8  ;;  %9829 = vmatprep.subr.bf16.mxu0 %v12949_v8 }
0x18c5   :  { %4374 = vmatmul.mubr.f32.vlgmr.msra.gmra.mrb[38].mxu1 %v12048_v59  ;;  %8543 = vmatmul.mubr.f32.vlgmr.msra.gmra.mrb[48].mxu0 %v12048_v59  ;;  %v13054_v59 = vld [vmem:[#allocation57_spill] sm:$0xff] }
0x18c6   :  { %9819 = vmatpush3.bf16.msra.mxu1 %v12988_v20  ;;  %8561 = vmatprep.mubr.msk.f32.mxu1 %vm10903_vm0, %v12944_v35 }
0x18c7   :  { %9820 = vmatprep.subr.bf16.mxu1 %v12949_v8  ;;  %9831 = vmatpush3.bf16.msra.mxu0 %v12989_v4 }
0x18c8   :  { %9832 = vmatprep.subr.bf16.mxu0 %v12949_v8  ;;  %8596 = vmatprep.mubr.msk.f32.mxu0 %vm10903_vm0, %v12944_v35 }
0x18ca   :  { %9822 = vmatpush3.bf16.msra.mxu1 %v12990_v58 }
0x18cb   :  { %9823 = vmatprep.subr.bf16.mxu1 %v12949_v8  ;;  %9834 = vmatpush3.bf16.msra.mxu0 %v13053_v21 }
0x18cc   :  { %9835 = vmatprep.subr.bf16.mxu0 %v12949_v8 }
0x18ce   :  { %9825 = vmatpush3.bf16.msra.mxu1 %v13054_v59 }
0x18cf   :  { %9826 = vmatprep.subr.bf16.mxu1 %v12949_v8  ;;  %9837 = vmatpush3.bf16.msra.mxu0 %v13055_v39 }
0x18d0   :  { %9838 = vmatprep.subr.bf16.mxu0 %v12949_v8 }
0x18d2   :  { %9828 = vmatpush3.bf16.msra.mxu1 %v13056_v6 }
0x18d3   :  { %9840 = vmatpush3.bf16.msra.mxu0 %v13057_v28  ;;  %9854 = vmatprep.subr.bf16.mxu1 %v13058_v10 }
0x18d4   :  { %9841 = vmatprep.subr.bf16.mxu0 %v12949_v8 }
0x18d5   :  { %8562 = vmatmul.mubr.msk.f32.vlgmr.msra.gmra.mrb[40].mxu1 %vm255_vm2, %v4152_v43 }
0x18d6   :  { %9856 = vmatpush1.bf16.msra.mxu1 %v13059_v62  ;;  %4706 = vmatprep.mubr.f32.mxu1 %v12944_v35  ;;  %v13068_v62 = vld [vmem:[#allocation69_spill] sm:$0xff] }
0x18d7   :  { %9843 = vmatpush3.bf16.msra.mxu0 %v13060_v27  ;;  %9858 = vmatprep.subr.bf16.mxu1 %v13061_v50 }
0x18d8   :  { %9844 = vmatprep.subr.bf16.mxu0 %v12949_v8 }
0x18da   :  { %9860 = vmatpush1.bf16.msra.mxu1 %v13062_v25 }
0x18db   :  { %9846 = vmatpush3.bf16.msra.mxu0 %v13063_v32  ;;  %9861 = vmatprep.subr.bf16.mxu1 %v12949_v8  ;;  %v13067_v32 = vld [vmem:[#allocation67_spill] sm:$0xff] }
0x18dc   :  { %9847 = vmatprep.subr.bf16.mxu0 %v12949_v8 }
0x18df   :  { %9849 = vmatpush3.bf16.msra.mxu0 %v13064_v53 }
0x18e0   :  { %9850 = vmatprep.subr.bf16.mxu0 %v12949_v8 }
0x18e3   :  { %9852 = vmatpush3.bf16.msra.mxu0 %v13065_v46 }
0x18e4   :  { %9886 = vmatprep.subr.bf16.mxu0 %v13066_v9 }
0x1978   :  { %v4222_v55 = vpop.f32.mrb[36].mxu1  ;;  %v4293_v23 = vpop.f32.mrb[46].mxu0 }
0x1979   :  { %v4224_v24 = vpop.f32.mrb[37].mxu1  ;;  %v8509_v5 = vpop.f32.mrb[47].mxu0  ;;  %v4300_v1 = vrot.slane %v4222_v55, 4 }
0x197a   :  { %v4301_v47 = vrot.slane %v4224_v24, 4 }
0x197b   :  { %v4306_v10 = vadd.f32 %v4300_v1, %v12973_v31 }
0x197c   :  { %v4307_v46 = vadd.f32 %v4301_v47, %v11553_v30 }
0x1998   :  { %v4375_v51 = vpop.f32.mrb[38].mxu1  ;;  %v4446_v43 = vpop.f32.mrb[48].mxu0 }
0x1999   :  { %v4376_v25 = vadd.f32 %v4375_v51, %v13067_v32  ;;  %v4377_v50 = vpop.f32.mrb[39].mxu1  ;;  %v8544_v27 = vpop.f32.mrb[49].mxu0 }
0x199a   :  { %v4378_v53 = vadd.f32 %v4377_v50, %v13068_v62 }
0x199b   :  { %v4451_v28 = vrot.slane %v4376_v25, 4  ;;  %v4447_v25 = vadd.f32 %v4446_v43, %v11562_v0 }
0x199c   :  { %v4461_v9 = vrot.slane %v4378_v53, 4  ;;  %v4302_v53 = vrot.slane %v4293_v23, 4 }
0x199d   :  { %v4453_v6 = vadd.f32 %v4451_v28, %v4306_v10  ;;  %v4471_v28 = vrot.slane %v4447_v25, 4 }
0x199e   :  { %v4463_v39 = vadd.f32 %v4461_v9, %v4307_v46 }
0x199f   :  { %v7169_v59 = vmul.f32 -1.442695, %v4453_v6  ;;  %v4308_v6 = vadd.f32 %v4302_v53, %v11565_v48  ;;  %v13069_v53 = vld [vmem:[#allocation35_spill] sm:$0xff] }
0x19a0   :  { %v7170_v5 = vmul.f32 -1.442695, %v4463_v39  ;;  %v4478_v39 = vrot.slane %v12044_v56, 7 }
0x19a1   :  { %10428 = vpow2.f32 %v7169_v59 }
0x19a2   :  { %10430 = vpow2.f32 %v7170_v5 }
0x19a8   :  { %v4548_v55 = vpop.f32.mrb[40].mxu1 }
0x19a9   :  { %v4553_v24 = vrot.slane %v4548_v55, 4  ;;  %v8563_v21 = vpop.f32.mrb[41].mxu1 }
0x19ab   :  { %v10429_v51 = vpop.eup %10428  ;;  %v4555_v27 = vadd.f32 %v4553_v24, %v11320_v12 }
0x19ac   :  { %v10431_v32 = vpop.eup %10430  ;;  %v4457_v50 = vadd.f32 1.0, %v10429_v51 }
0x19ad   :  { %v4467_v62 = vadd.f32 1.0, %v10431_v32 }
0x19ae   :  { %10432 = vrcp.f32 %v4457_v50 }
0x19af   :  { %10434 = vrcp.f32 %v4467_v62 }
0x19b8   :  { %v10433_v10 = vpop.eup %10432 }
0x19b9   :  { %v10435_v59 = vpop.eup %10434  ;;  %v4473_v46 = vmul.f32 %v10433_v10, %v4471_v28  ;;  %v13070_v28 = vld [vmem:[#allocation36_spill] sm:$0xff]  ;;  %v13071_v10 = vld [vmem:[#allocation37_spill] sm:$0xff] }
0x19ba   :  { %v4480_v21 = vmul.f32 %v10435_v59, %v4478_v39  ;;  %v4476_v1 = vsub.f32 1.0, %v10435_v59  ;;  %v13072_v39 = vld [vmem:[#allocation38_spill] sm:$0xff] }
0x19bb   :  { %v4474_v9 = vadd.f32 %v4473_v46, %v4308_v6  ;;  %v13073_v6 = vld [vmem:[#allocation39_spill] sm:$0xff]  ;;  %v13074_v46 = vld [vmem:[#allocation40_spill] sm:$0xff] }
0x19bd   :  { %10436 = vtanh.f32 %v4474_v9  ;;  %v13076_v9 = vld [vmem:[#allocation42_spill] sm:$0xff] }
0x19c7   :  { %v10437_v47 = vpop.eup %10436 }
0x19c8   :  { %v4477_v5 = vmul.f32 %v10437_v47, %v4476_v1 }
0x19ca   :  { %v12196_v32 = vadd.f32 %v4480_v21, %v4477_v5  ;;  %v13075_v21 = vld [vmem:[#allocation41_spill] sm:$0xff] }
0x19cc   :  { %v4753_v62 = vrot.slane %v12196_v32, 3  ;;  %v12200_v23 = vrot.slane %v12196_v32, 4 }
0x19ce   :  { %4754 = vrot.lane.b32.xlu1 %v4753_v62, %s10905_s4  ;;  %8597 = vmatmul.mubr.f32.vlgmr.msra.gmra.mrb[50].mxu0 %v12200_v23 }
0x19cf   :  { %9888 = vmatpush1.bf16.msra.mxu0 %v11350_v38  ;;  %5004 = vmatprep.mubr.f32.mxu0 %v12944_v35 }
0x19d0   :  { %9890 = vmatprep.subr.bf16.mxu0 %v11360_v13 }
0x19d3   :  { %9892 = vmatpush1.bf16.msra.mxu0 %v11362_v18 }
0x19d4   :  { %9894 = vmatprep.subr.bf16.mxu0 %v11369_v29 }
0x19d7   :  { %9896 = vmatpush1.bf16.msra.mxu0 %v11372_v33 }
0x19d8   :  { %9898 = vmatprep.subr.bf16.mxu0 %v11379_v40 }
0x19db   :  { %9900 = vmatpush1.bf16.msra.mxu0 %v11382_v44 }
0x19dc   :  { %9914 = vmatprep.subr.bf16.mxu0 %v11389_v49 }
0x1aa1   :  { %v4625_v56 = vpop.f32.mrb[50].mxu0 }
0x1aa2   :  { %v4630_v43 = vrot.slane %v4625_v56, 4  ;;  %v8598_v55 = vpop.f32.mrb[51].mxu0  ;;  %v13084_v56 = vld [vmem:[#allocation48_spill] sm:$0xff] }
0x1aa3   :  { %v13081_v55 = vld [vmem:[#allocation44_spill] sm:$0xff] }
0x1aa4   :  { %v4632_v24 = vadd.f32 %v4630_v43, %v4555_v27  ;;  %v4755_v27 = vpop.permute.xlu1 %4754 }
0x1aa5   :  { %v4757_v59 = vsel %vm619_vm4, %v12200_v23, %v4755_v27  ;;  %v13083_v27 = vld [vmem:[#allocation47_spill] sm:$0xff] }
0x1aa6   :  { %4634 = vrot.lane.b32.xlu0 %v4632_v24, %s10907_s11 }
0x1b18   :  { %v4635_v51 = vpop.permute.xlu0 %4634 }
0x1b19   :  { %v4637_v50 = vmax.f32 %v4632_v24, %v4635_v51 }
0x1b1b   :  { %v4639_v25 = vrot.slane %v4637_v50, 4 }
0x1b1d   :  { %7172 = vmatmul.mubr.msk.f32.vlgmr.msra.gmra.mrb[42].mxu1 %vm1500_vm7, %v4639_v25  ;;  %v13082_v25 = vld [vmem:[#allocation46_spill] sm:$0xff] }
0x1b1e   :  { %9863 = vmatpush3.bf16.msra.mxu1 %v13069_v53  ;;  %8615 = vmatprep.mubr.msk.f32.mxu1 %vm10903_vm0, %v12944_v35 }
0x1b1f   :  { %9864 = vmatprep.subr.bf16.mxu1 %v12949_v8 }
0x1b22   :  { %9866 = vmatpush3.bf16.msra.mxu1 %v13070_v28 }
0x1b23   :  { %9867 = vmatprep.subr.bf16.mxu1 %v12949_v8 }
0x1b26   :  { %9869 = vmatpush3.bf16.msra.mxu1 %v13071_v10 }
0x1b27   :  { %9870 = vmatprep.subr.bf16.mxu1 %v12949_v8 }
0x1b2a   :  { %9872 = vmatpush3.bf16.msra.mxu1 %v13072_v39 }
0x1b2b   :  { %9873 = vmatprep.subr.bf16.mxu1 %v12949_v8 }
0x1b2d   :  { %8616 = vmatmul.mubr.msk.f32.vlgmr.msra.gmra.mrb[44].mxu1 %vm255_vm2, %v4757_v59 }
0x1b2e   :  { %9875 = vmatpush3.bf16.msra.mxu1 %v13073_v6  ;;  %8634 = vmatprep.mubr.msk.f32.mxu1 %vm10903_vm0, %v12944_v35 }
0x1b2f   :  { %9876 = vmatprep.subr.bf16.mxu1 %v12949_v8 }
0x1b32   :  { %9878 = vmatpush3.bf16.msra.mxu1 %v13074_v46 }
0x1b33   :  { %9879 = vmatprep.subr.bf16.mxu1 %v12949_v8 }
0x1b36   :  { %9881 = vmatpush3.bf16.msra.mxu1 %v13075_v21 }
0x1b37   :  { %9882 = vmatprep.subr.bf16.mxu1 %v12949_v8 }
0x1b3a   :  { %9884 = vmatpush3.bf16.msra.mxu1 %v13076_v9 }
0x1b3b   :  { %9901 = vmatprep.subr.bf16.mxu1 %v12949_v8 }
0x1bf0   :  { %v12238_v1 = vpop.f32.mrb[42].mxu1 }
0x1bf1   :  { %13077 = vst [vmem:[#allocation81_spill] sm:$0xff] %v12238_v1  ;;  %v12242_v47 = vsel %vm619_vm4, %v12238_v1, -inf  ;;  %v12244_v5 = vpop.f32.mrb[43].mxu1 }
0x1bf2   :  { %13078 = vst [vmem:[#allocation82_spill] sm:$0xff] %v12242_v47  ;;  %13079 = vst [vmem:[#allocation83_spill] sm:$0xff] %v12244_v5  ;;  %v12248_v62 = vsel %vm619_vm4, %v12244_v5, -inf }
0x1bf3   :  { %13080 = vst [vmem:[#allocation84_spill] sm:$0xff] %v12248_v62 }
0x1c00   :  { %v4827_v43 = vpop.f32.mrb[44].mxu1 }
0x1c01   :  { %v4828_v24 = vadd.f32 %v4827_v43, %v13081_v55  ;;  %v8617_v51 = vpop.f32.mrb[45].mxu1  ;;  %v13085_v43 = vld [vmem:[#allocation49_spill] sm:$0xff] }
0x1c03   :  { %10438 = vtanh.f32 %v4828_v24 }
0x1c0d   :  { %v10439_v50 = vpop.eup %10438 }
0x1c0e   :  { %8635 = vmatmul.mubr.msk.f32.vlgmr.msra.gmra.mrb[46].mxu1 %vm255_vm2, %v10439_v50 }
0x1c0f   :  { %9903 = vmatpush3.bf16.msra.mxu1 %v13082_v25  ;;  %8653 = vmatprep.mubr.msk.f32.mxu1 %vm10903_vm0, %v12944_v35 }
0x1c10   :  { %9904 = vmatprep.subr.bf16.mxu1 %v12949_v8 }
0x1c13   :  { %9906 = vmatpush3.bf16.msra.mxu1 %v13083_v27 }
0x1c14   :  { %9907 = vmatprep.subr.bf16.mxu1 %v12949_v8 }
0x1c17   :  { %9909 = vmatpush3.bf16.msra.mxu1 %v13084_v56 }
0x1c18   :  { %9910 = vmatprep.subr.bf16.mxu1 %v12949_v8 }
0x1c1b   :  { %9912 = vmatpush3.bf16.msra.mxu1 %v13085_v43 }
0x1c1c   :  { %9945 = vmatprep.subr.bf16.mxu1 %v12949_v8 }
0x1ce1   :  { %v4901_v24 = vpop.f32.mrb[46].mxu1 }
0x1ce2   :  { %v4905_v51 = vsel %vm994_vm5, %v4901_v24, -inf  ;;  %v8636_v50 = vpop.f32.mrb[47].mxu1 }
0x1ce3   :  { %v4906_v5 = vrot.slane %v4905_v51, 4 }
0x1ce5   :  { %v4907_v1 = vmax.f32 %v4905_v51, %v4906_v5  ;;  %v13097_v51 = vld [vmem:[#allocation65_spill] sm:$0xff] }
0x1ce7   :  { %v4908_v62 = vrot.slane %v4907_v1, 2 }
0x1ce9   :  { %v4909_v47 = vmax.f32 %v4907_v1, %v4908_v62 }
0x1ceb   :  { %v4910_v25 = vrot.slane %v4909_v47, 1 }
0x1ced   :  { %v4911_v27 = vmax.f32 %v4909_v47, %v4910_v25 }
0x1cef   :  { %v4912_v55 = vsub.f32 %v4901_v24, %v4911_v27 }
0x1cf1   :  { %v4913_v9 = vmul.f32 1.442695, %v4912_v55 }
0x1cf3   :  { %10440 = vpow2.f32 %v4913_v9 }
0x1cfd   :  { %v10441_v56 = vpop.eup %10440 }
0x1cfe   :  { %v4915_v21 = vsel %vm994_vm5, %v10441_v56, 0.0 }
0x1cff   :  { %v4916_v46 = vrot.slane %v4915_v21, 4 }
0x1d01   :  { %v4917_v43 = vadd.f32 %v4916_v46, %v4915_v21  ;;  %v13093_v46 = vld [vmem:[#allocation63_spill] sm:$0xff]  ;;  %v13094_v21 = vld [vmem:[#allocation72_spill] sm:$0xff] }
0x1d03   :  { %v4918_v6 = vrot.slane %v4917_v43, 2 }
0x1d05   :  { %v4919_v39 = vadd.f32 %v4918_v6, %v4917_v43  ;;  %v13092_v6 = vld [vmem:[#allocation71_spill] sm:$0xff]  ;;  %v13096_v43 = vld [vmem:[#allocation64_spill] sm:$0xff] }
0x1d07   :  { %v4920_v10 = vrot.slane %v4919_v39, 1 }
0x1d09   :  { %v4921_v28 = vadd.f32 %v4920_v10, %v4919_v39  ;;  %v13089_v10 = vld [vmem:[#allocation58_spill] sm:$0xff] }
0x1d0a   :  { %v13090_v39 = vld [vmem:[#allocation62_spill] sm:$0xff] }
0x1d0b   :  { %10442 = vrcp.f32 %v4921_v28  ;;  %v13088_v28 = vld [vmem:[#allocation61_spill] sm:$0xff] }
0x1d15   :  { %v10443_v50 = vpop.eup %10442 }
0x1d16   :  { %v4923_v53 = vmul.f32 %v10443_v50, %v10441_v56  ;;  %v13095_v56 = vld [vmem:[#allocation73_spill] sm:$0xff]  ;;  %v13098_v50 = vld [vmem:[#allocation66_spill] sm:$0xff] }
0x1d18   :  { %4926 = vperm.xlu0 %10355, %v4923_v53   ;;  %v13086_v53 = vld [vmem:[#allocation60_spill] sm:$0xff] }
0x1d97   :  { %v4927_v5 = vpop.permute.xlu0 %4926 }
0x1d98   :  { %v4929_v1 = vmul.f32 %v4927_v5, %v4757_v59  ;;  %v13091_v59 = vld [vmem:[#allocation70_spill] sm:$0xff]  ;;  %v13099_v5 = vld [vmem:[#allocation45_spill] sm:$0xff] }
0x1d9a   :  { %v4930_v47 = vsel %vm1020_vm6, %v4929_v1, 0.0 }
0x1d9b   :  { %v4931_v62 = vrot.slane %v4930_v47, 4 }
0x1d9d   :  { %v4932_v55 = vadd.f32 %v4931_v62, %v4930_v47 }
0x1d9f   :  { %v4933_v9 = vrot.slane %v4932_v55, 2 }
0x1da1   :  { %v4934_v25 = vadd.f32 %v4933_v9, %v4932_v55 }
0x1da3   :  { %v4935_v27 = vrot.slane %v4934_v25, 1 }
0x1da5   :  { %v4936_v24 = vadd.f32 %v4935_v27, %v4934_v25 }
0x1da7   :  { %7175 = vmatmul.mubr.msk.f32.vlgmr.msra.gmra.mrb[52].mxu0 %vm255_vm2, %v4936_v24  ;;  %8654 = vmatmul.mubr.msk.f32.vlgmr.msra.gmra.mrb[48].mxu1 %vm255_vm2, %v4936_v24 }
0x1da8   :  { %9916 = vmatpush1.bf16.msra.mxu0 %v11395_v15  ;;  %9947 = vmatpush3.bf16.msra.mxu1 %v11397_v17 }
0x1da9   :  { %9918 = vmatprep.subr.bf16.mxu0 %v11401_v11  ;;  %9948 = vmatprep.subr.bf16.mxu1 %v12949_v8 }
0x1daa   :  { %5157 = vmatprep.mubr.f32.mxu0 %v12944_v35  ;;  %8688 = vmatprep.mubr.msk.f32.mxu1 %vm10903_vm0, %v12944_v35 }
0x1dac   :  { %9920 = vmatpush1.bf16.msra.mxu0 %v11409_v36  ;;  %9950 = vmatpush3.bf16.msra.mxu1 %v11411_v37 }
0x1dad   :  { %9922 = vmatprep.subr.bf16.mxu0 %v11415_v42  ;;  %9951 = vmatprep.subr.bf16.mxu1 %v12949_v8 }
0x1db0   :  { %9924 = vmatpush1.bf16.msra.mxu0 %v11422_v52  ;;  %9953 = vmatpush3.bf16.msra.mxu1 %v11424_v54 }
0x1db1   :  { %9926 = vmatprep.subr.bf16.mxu0 %v11428_v57  ;;  %9954 = vmatprep.subr.bf16.mxu1 %v12949_v8 }
0x1db4   :  { %9928 = vmatpush1.bf16.msra.mxu0 %v11432_v3  ;;  %9956 = vmatpush3.bf16.msra.mxu1 %v11434_v7 }
0x1db5   :  { %9930 = vmatprep.subr.bf16.mxu0 %v11438_v14  ;;  %9957 = vmatprep.subr.bf16.mxu1 %v12949_v8 }
0x1db8   :  { %9932 = vmatpush1.bf16.msra.mxu0 %v11442_v34  ;;  %9959 = vmatpush3.bf16.msra.mxu1 %v11444_v41 }
0x1db9   :  { %9934 = vmatprep.subr.bf16.mxu0 %v11448_v45  ;;  %9960 = vmatprep.subr.bf16.mxu1 %v12949_v8 }
0x1dbc   :  { %9936 = vmatpush1.bf16.msra.mxu0 %v11452_v60  ;;  %9962 = vmatpush3.bf16.msra.mxu1 %v11454_v61 }
0x1dbd   :  { %9938 = vmatprep.subr.bf16.mxu0 %v11458_v63  ;;  %9963 = vmatprep.subr.bf16.mxu1 %v12949_v8 }
0x1dc0   :  { %9940 = vmatpush1.bf16.msra.mxu0 %v12954_v2  ;;  %9965 = vmatpush3.bf16.msra.mxu1 %v12955_v16 }
0x1dc1   :  { %9942 = vmatprep.subr.bf16.mxu0 %v12956_v19  ;;  %9966 = vmatprep.subr.bf16.mxu1 %v12949_v8 }
0x1dc4   :  { %9944 = vmatpush1.bf16.msra.mxu0 %v12957_v22  ;;  %9968 = vmatpush3.bf16.msra.mxu1 %v12987_v26 }
0x1dc5   :  { %9969 = vmatprep.subr.bf16.mxu0 %v12949_v8  ;;  %9981 = vmatprep.subr.bf16.mxu1 %v12949_v8 }
0x1dc7   :  { %5158 = vmatmul.mubr.f32.vlgmr.msra.gmra.mrb[54].mxu0 %v12200_v23  ;;  %8689 = vmatmul.mubr.f32.vlgmr.msra.gmra.mrb[50].mxu1 %v12200_v23  ;;  %v13087_v23 = vld [vmem:[#allocation57_spill] sm:$0xff] }
0x1dc8   :  { %9971 = vmatpush3.bf16.msra.mxu0 %v12988_v20  ;;  %8707 = vmatprep.mubr.msk.f32.mxu0 %vm10903_vm0, %v12944_v35 }
0x1dc9   :  { %9972 = vmatprep.subr.bf16.mxu0 %v12949_v8  ;;  %9983 = vmatpush3.bf16.msra.mxu1 %v12989_v4 }
0x1dca   :  { %9984 = vmatprep.subr.bf16.mxu1 %v12949_v8  ;;  %8742 = vmatprep.mubr.msk.f32.mxu1 %vm10903_vm0, %v12944_v35 }
0x1dcc   :  { %9974 = vmatpush3.bf16.msra.mxu0 %v12990_v58 }
0x1dcd   :  { %9975 = vmatprep.subr.bf16.mxu0 %v12949_v8  ;;  %9986 = vmatpush3.bf16.msra.mxu1 %v13086_v53 }
0x1dce   :  { %9987 = vmatprep.subr.bf16.mxu1 %v12949_v8 }
0x1dd0   :  { %9977 = vmatpush3.bf16.msra.mxu0 %v13087_v23 }
0x1dd1   :  { %9978 = vmatprep.subr.bf16.mxu0 %v12949_v8  ;;  %9989 = vmatpush3.bf16.msra.mxu1 %v13088_v28 }
0x1dd2   :  { %9990 = vmatprep.subr.bf16.mxu1 %v12949_v8 }
0x1dd4   :  { %9980 = vmatpush3.bf16.msra.mxu0 %v13089_v10 }
0x1dd5   :  { %9992 = vmatpush3.bf16.msra.mxu1 %v13090_v39  ;;  %10006 = vmatprep.subr.bf16.mxu0 %v13091_v59 }
0x1dd6   :  { %9993 = vmatprep.subr.bf16.mxu1 %v12949_v8 }
0x1dd7   :  { %8708 = vmatmul.mubr.msk.f32.vlgmr.msra.gmra.mrb[56].mxu0 %vm255_vm2, %v4936_v24 }
0x1dd8   :  { %10008 = vmatpush1.bf16.msra.mxu0 %v13092_v6  ;;  %5490 = vmatprep.mubr.f32.mxu0 %v12944_v35  ;;  %v13101_v6 = vld [vmem:[#allocation69_spill] sm:$0xff] }
0x1dd9   :  { %9995 = vmatpush3.bf16.msra.mxu1 %v13093_v46  ;;  %10010 = vmatprep.subr.bf16.mxu0 %v13094_v21 }
0x1dda   :  { %9996 = vmatprep.subr.bf16.mxu1 %v12949_v8 }
0x1ddc   :  { %10012 = vmatpush1.bf16.msra.mxu0 %v13095_v56 }
0x1ddd   :  { %9998 = vmatpush3.bf16.msra.mxu1 %v13096_v43  ;;  %10013 = vmatprep.subr.bf16.mxu0 %v12949_v8  ;;  %v13100_v43 = vld [vmem:[#allocation67_spill] sm:$0xff] }
0x1dde   :  { %9999 = vmatprep.subr.bf16.mxu1 %v12949_v8 }
0x1de1   :  { %10001 = vmatpush3.bf16.msra.mxu1 %v13097_v51 }
0x1de2   :  { %10002 = vmatprep.subr.bf16.mxu1 %v12949_v8 }
0x1de5   :  { %10004 = vmatpush3.bf16.msra.mxu1 %v13098_v50 }
0x1de6   :  { %10038 = vmatprep.subr.bf16.mxu1 %v13099_v5 }
0x1e7a   :  { %v5006_v1 = vpop.f32.mrb[52].mxu0  ;;  %v5077_v47 = vpop.f32.mrb[48].mxu1 }
0x1e7b   :  { %v5008_v62 = vpop.f32.mrb[53].mxu0  ;;  %v8655_v55 = vpop.f32.mrb[49].mxu1  ;;  %v5084_v9 = vrot.slane %v5006_v1, 3 }
0x1e7c   :  { %v5085_v25 = vrot.slane %v5008_v62, 3 }
0x1e7d   :  { %v5090_v59 = vadd.f32 %v5084_v9, %v12973_v31 }
0x1e7e   :  { %v5091_v50 = vadd.f32 %v5085_v25, %v11553_v30 }
0x1e9a   :  { %v5159_v27 = vpop.f32.mrb[54].mxu0  ;;  %v5230_v24 = vpop.f32.mrb[50].mxu1 }
0x1e9b   :  { %v5160_v56 = vadd.f32 %v5159_v27, %v13100_v43  ;;  %v5161_v21 = vpop.f32.mrb[55].mxu0  ;;  %v8690_v46 = vpop.f32.mrb[51].mxu1 }
0x1e9c   :  { %v5162_v51 = vadd.f32 %v5161_v21, %v13101_v6 }
0x1e9d   :  { %v5235_v39 = vrot.slane %v5160_v56, 3  ;;  %v5231_v56 = vadd.f32 %v5230_v24, %v11562_v0 }
0x1e9e   :  { %v5245_v5 = vrot.slane %v5162_v51, 3  ;;  %v5086_v51 = vrot.slane %v5077_v47, 3 }
0x1e9f   :  { %v5237_v10 = vadd.f32 %v5235_v39, %v5090_v59  ;;  %v5255_v39 = vrot.slane %v5231_v56, 3 }
0x1ea0   :  { %v5247_v28 = vadd.f32 %v5245_v5, %v5091_v50 }
0x1ea1   :  { %v7177_v23 = vmul.f32 -1.442695, %v5237_v10  ;;  %v5092_v10 = vadd.f32 %v5086_v51, %v11565_v48  ;;  %v13102_v51 = vld [vmem:[#allocation35_spill] sm:$0xff] }
0x1ea2   :  { %v7178_v55 = vmul.f32 -1.442695, %v5247_v28  ;;  %v5262_v28 = vrot.slane %v12196_v32, 7 }
0x1ea3   :  { %10444 = vpow2.f32 %v7177_v23 }
0x1ea4   :  { %10446 = vpow2.f32 %v7178_v55 }
0x1eaa   :  { %v5332_v1 = vpop.f32.mrb[56].mxu0 }
0x1eab   :  { %v5337_v62 = vrot.slane %v5332_v1, 3  ;;  %v8709_v53 = vpop.f32.mrb[57].mxu0 }
0x1ead   :  { %v10445_v27 = vpop.eup %10444  ;;  %v5339_v46 = vadd.f32 %v5337_v62, %v11320_v12 }
0x1eae   :  { %v10447_v43 = vpop.eup %10446  ;;  %v5241_v21 = vadd.f32 1.0, %v10445_v27 }
0x1eaf   :  { %v5251_v6 = vadd.f32 1.0, %v10447_v43 }
0x1eb0   :  { %10448 = vrcp.f32 %v5241_v21 }
0x1eb1   :  { %10450 = vrcp.f32 %v5251_v6 }
0x1eba   :  { %v10449_v59 = vpop.eup %10448 }
0x1ebb   :  { %v10451_v23 = vpop.eup %10450  ;;  %v5257_v50 = vmul.f32 %v10449_v59, %v5255_v39  ;;  %v13103_v39 = vld [vmem:[#allocation36_spill] sm:$0xff]  ;;  %v13104_v59 = vld [vmem:[#allocation37_spill] sm:$0xff] }
0x1ebc   :  { %v5264_v53 = vmul.f32 %v10451_v23, %v5262_v28  ;;  %v5260_v9 = vsub.f32 1.0, %v10451_v23  ;;  %v13105_v28 = vld [vmem:[#allocation38_spill] sm:$0xff] }
0x1ebd   :  { %v5258_v5 = vadd.f32 %v5257_v50, %v5092_v10  ;;  %v13106_v10 = vld [vmem:[#allocation39_spill] sm:$0xff]  ;;  %v13107_v50 = vld [vmem:[#allocation40_spill] sm:$0xff] }
0x1ebf   :  { %10452 = vtanh.f32 %v5258_v5  ;;  %v13109_v5 = vld [vmem:[#allocation42_spill] sm:$0xff] }
0x1ec9   :  { %v10453_v25 = vpop.eup %10452 }
0x1eca   :  { %v5261_v55 = vmul.f32 %v10453_v25, %v5260_v9 }
0x1ecc   :  { %v12348_v43 = vadd.f32 %v5264_v53, %v5261_v55  ;;  %v13108_v53 = vld [vmem:[#allocation41_spill] sm:$0xff] }
0x1ece   :  { %v5537_v6 = vrot.slane %v12348_v43, 4  ;;  %v12352_v47 = vrot.slane %v12348_v43, 5 }
0x1ed0   :  { %5538 = vrot.lane.b32.xlu0 %v5537_v6, %s10905_s4  ;;  %8743 = vmatmul.mubr.f32.vlgmr.msra.gmra.mrb[52].mxu1 %v12352_v47 }
0x1ed1   :  { %10040 = vmatpush1.bf16.msra.mxu1 %v11350_v38  ;;  %5788 = vmatprep.mubr.f32.mxu1 %v12944_v35 }
0x1ed2   :  { %10042 = vmatprep.subr.bf16.mxu1 %v11360_v13 }
0x1ed5   :  { %10044 = vmatpush1.bf16.msra.mxu1 %v11362_v18 }
0x1ed6   :  { %10046 = vmatprep.subr.bf16.mxu1 %v11369_v29 }
0x1ed9   :  { %10048 = vmatpush1.bf16.msra.mxu1 %v11372_v33 }
0x1eda   :  { %10050 = vmatprep.subr.bf16.mxu1 %v11379_v40 }
0x1edd   :  { %10052 = vmatpush1.bf16.msra.mxu1 %v11382_v44 }
0x1ede   :  { %10066 = vmatprep.subr.bf16.mxu1 %v11389_v49 }
0x1fa3   :  { %v5409_v32 = vpop.f32.mrb[52].mxu1 }
0x1fa4   :  { %v5414_v24 = vrot.slane %v5409_v32, 3  ;;  %v8744_v1 = vpop.f32.mrb[53].mxu1  ;;  %v13117_v32 = vld [vmem:[#allocation48_spill] sm:$0xff] }
0x1fa5   :  { %v13114_v1 = vld [vmem:[#allocation44_spill] sm:$0xff] }
0x1fa6   :  { %v5416_v62 = vadd.f32 %v5414_v24, %v5339_v46  ;;  %v5539_v46 = vpop.permute.xlu0 %5538 }
0x1fa7   :  { %v5541_v23 = vsel %vm619_vm4, %v12352_v47, %v5539_v46  ;;  %v13116_v46 = vld [vmem:[#allocation47_spill] sm:$0xff] }
0x1fa8   :  { %5418 = vrot.lane.b32.xlu1 %v5416_v62, %s10907_s11 }
0x201a   :  { %v5419_v27 = vpop.permute.xlu1 %5418 }
0x201b   :  { %v5421_v21 = vmax.f32 %v5416_v62, %v5419_v27 }
0x201d   :  { %v5423_v56 = vrot.slane %v5421_v21, 5 }
0x201f   :  { %7180 = vmatmul.mubr.msk.f32.vlgmr.msra.gmra.mrb[58].mxu0 %vm1500_vm7, %v5423_v56  ;;  %v13115_v56 = vld [vmem:[#allocation46_spill] sm:$0xff] }
0x2020   :  { %10015 = vmatpush3.bf16.msra.mxu0 %v13102_v51  ;;  %8761 = vmatprep.mubr.msk.f32.mxu0 %vm10903_vm0, %v12944_v35 }
0x2021   :  { %10016 = vmatprep.subr.bf16.mxu0 %v12949_v8 }
0x2024   :  { %10018 = vmatpush3.bf16.msra.mxu0 %v13103_v39 }
0x2025   :  { %10019 = vmatprep.subr.bf16.mxu0 %v12949_v8 }
0x2028   :  { %10021 = vmatpush3.bf16.msra.mxu0 %v13104_v59 }
0x2029   :  { %10022 = vmatprep.subr.bf16.mxu0 %v12949_v8 }
0x202c   :  { %10024 = vmatpush3.bf16.msra.mxu0 %v13105_v28 }
0x202d   :  { %10025 = vmatprep.subr.bf16.mxu0 %v12949_v8 }
0x202f   :  { %8762 = vmatmul.mubr.msk.f32.vlgmr.msra.gmra.mrb[60].mxu0 %vm255_vm2, %v5541_v23 }
0x2030   :  { %10027 = vmatpush3.bf16.msra.mxu0 %v13106_v10  ;;  %8780 = vmatprep.mubr.msk.f32.mxu0 %vm10903_vm0, %v12944_v35 }
0x2031   :  { %10028 = vmatprep.subr.bf16.mxu0 %v12949_v8 }
0x2034   :  { %10030 = vmatpush3.bf16.msra.mxu0 %v13107_v50 }
0x2035   :  { %10031 = vmatprep.subr.bf16.mxu0 %v12949_v8 }
0x2038   :  { %10033 = vmatpush3.bf16.msra.mxu0 %v13108_v53 }
0x2039   :  { %10034 = vmatprep.subr.bf16.mxu0 %v12949_v8 }
0x203c   :  { %10036 = vmatpush3.bf16.msra.mxu0 %v13109_v5 }
0x203d   :  { %10053 = vmatprep.subr.bf16.mxu0 %v12949_v8 }
0x20f2   :  { %v12390_v9 = vpop.f32.mrb[58].mxu0 }
0x20f3   :  { %13110 = vst [vmem:[#allocation85_spill] sm:$0xff] %v12390_v9  ;;  %v12394_v25 = vsel %vm619_vm4, %v12390_v9, -inf  ;;  %v12396_v55 = vpop.f32.mrb[59].mxu0 }
0x20f4   :  { %13111 = vst [vmem:[#allocation86_spill] sm:$0xff] %v12394_v25  ;;  %13112 = vst [vmem:[#allocation87_spill] sm:$0xff] %v12396_v55  ;;  %v12400_v6 = vsel %vm619_vm4, %v12396_v55, -inf }
0x20f5   :  { %13113 = vst [vmem:[#allocation88_spill] sm:$0xff] %v12400_v6 }
0x2102   :  { %v5611_v24 = vpop.f32.mrb[60].mxu0 }
0x2103   :  { %v5612_v62 = vadd.f32 %v5611_v24, %v13114_v1  ;;  %v8763_v27 = vpop.f32.mrb[61].mxu0  ;;  %v13118_v24 = vld [vmem:[#allocation49_spill] sm:$0xff] }
0x2105   :  { %10454 = vtanh.f32 %v5612_v62 }
0x210f   :  { %v10455_v21 = vpop.eup %10454 }
0x2110   :  { %8781 = vmatmul.mubr.msk.f32.vlgmr.msra.gmra.mrb[62].mxu0 %vm255_vm2, %v10455_v21 }
0x2111   :  { %10055 = vmatpush3.bf16.msra.mxu0 %v13115_v56  ;;  %8799 = vmatprep.mubr.msk.f32.mxu0 %vm10903_vm0, %v12944_v35 }
0x2112   :  { %10056 = vmatprep.subr.bf16.mxu0 %v12949_v8 }
0x2115   :  { %10058 = vmatpush3.bf16.msra.mxu0 %v13116_v46 }
0x2116   :  { %10059 = vmatprep.subr.bf16.mxu0 %v12949_v8 }
0x2119   :  { %10061 = vmatpush3.bf16.msra.mxu0 %v13117_v32 }
0x211a   :  { %10062 = vmatprep.subr.bf16.mxu0 %v12949_v8 }
0x211d   :  { %10064 = vmatpush3.bf16.msra.mxu0 %v13118_v24 }
0x211e   :  { %10097 = vmatprep.subr.bf16.mxu0 %v12949_v8 }
0x21e3   :  { %v5685_v62 = vpop.f32.mrb[62].mxu0 }
0x21e4   :  { %v5689_v27 = vsel %vm994_vm5, %v5685_v62, -inf  ;;  %v8782_v21 = vpop.f32.mrb[63].mxu0 }
0x21e5   :  { %v5690_v55 = vrot.slane %v5689_v27, 4 }
0x21e7   :  { %v5691_v9 = vmax.f32 %v5689_v27, %v5690_v55  ;;  %v13130_v27 = vld [vmem:[#allocation65_spill] sm:$0xff] }
0x21e9   :  { %v5692_v6 = vrot.slane %v5691_v9, 2 }
0x21eb   :  { %v5693_v25 = vmax.f32 %v5691_v9, %v5692_v6 }
0x21ed   :  { %v5694_v56 = vrot.slane %v5693_v25, 1 }
0x21ef   :  { %v5695_v46 = vmax.f32 %v5693_v25, %v5694_v56 }
0x21f1   :  { %v5696_v1 = vsub.f32 %v5685_v62, %v5695_v46 }
0x21f3   :  { %v5697_v5 = vmul.f32 1.442695, %v5696_v1 }
0x21f5   :  { %10456 = vpow2.f32 %v5697_v5 }
0x21ff   :  { %v10457_v32 = vpop.eup %10456 }
0x2200   :  { %v5699_v53 = vsel %vm994_vm5, %v10457_v32, 0.0 }
0x2201   :  { %v5700_v50 = vrot.slane %v5699_v53, 4 }
0x2203   :  { %v5701_v24 = vadd.f32 %v5700_v50, %v5699_v53  ;;  %v13126_v50 = vld [vmem:[#allocation63_spill] sm:$0xff]  ;;  %v13127_v53 = vld [vmem:[#allocation72_spill] sm:$0xff] }
0x2205   :  { %v5702_v10 = vrot.slane %v5701_v24, 2 }
0x2207   :  { %v5703_v28 = vadd.f32 %v5702_v10, %v5701_v24  ;;  %v13125_v10 = vld [vmem:[#allocation71_spill] sm:$0xff]  ;;  %v13129_v24 = vld [vmem:[#allocation64_spill] sm:$0xff] }
0x2209   :  { %v5704_v59 = vrot.slane %v5703_v28, 1 }
0x220b   :  { %v5705_v39 = vadd.f32 %v5704_v59, %v5703_v28  ;;  %v13122_v59 = vld [vmem:[#allocation58_spill] sm:$0xff] }
0x220c   :  { %v13123_v28 = vld [vmem:[#allocation62_spill] sm:$0xff] }
0x220d   :  { %10458 = vrcp.f32 %v5705_v39  ;;  %v13121_v39 = vld [vmem:[#allocation61_spill] sm:$0xff] }
0x2217   :  { %v10459_v21 = vpop.eup %10458 }
0x2218   :  { %v5707_v51 = vmul.f32 %v10459_v21, %v10457_v32  ;;  %v13128_v32 = vld [vmem:[#allocation73_spill] sm:$0xff]  ;;  %v13131_v21 = vld [vmem:[#allocation66_spill] sm:$0xff] }
0x221a   :  { %5710 = vperm.xlu1 %10354, %v5707_v51   ;;  %v13119_v51 = vld [vmem:[#allocation60_spill] sm:$0xff] }
0x2299   :  { %v5711_v55 = vpop.permute.xlu1 %5710 }
0x229a   :  { %v5713_v9 = vmul.f32 %v5711_v55, %v5541_v23  ;;  %v13124_v23 = vld [vmem:[#allocation70_spill] sm:$0xff]  ;;  %v13132_v55 = vld [vmem:[#allocation45_spill] sm:$0xff] }
0x229c   :  { %v5714_v25 = vsel %vm1020_vm6, %v5713_v9, 0.0 }
0x229d   :  { %v5715_v6 = vrot.slane %v5714_v25, 4 }
0x229f   :  { %v5716_v1 = vadd.f32 %v5715_v6, %v5714_v25 }
0x22a1   :  { %v5717_v5 = vrot.slane %v5716_v1, 2 }
0x22a3   :  { %v5718_v56 = vadd.f32 %v5717_v5, %v5716_v1 }
0x22a5   :  { %v5719_v46 = vrot.slane %v5718_v56, 1 }
0x22a7   :  { %v5720_v62 = vadd.f32 %v5719_v46, %v5718_v56 }
0x22a9   :  { %7183 = vmatmul.mubr.msk.f32.vlgmr.msra.gmra.mrb[54].mxu1 %vm255_vm2, %v5720_v62  ;;  %8800 = vmatmul.mubr.msk.f32.vlgmr.msra.gmra.mrb[64].mxu0 %vm255_vm2, %v5720_v62 }
0x22aa   :  { %10068 = vmatpush1.bf16.msra.mxu1 %v11395_v15  ;;  %10099 = vmatpush3.bf16.msra.mxu0 %v11397_v17 }
0x22ab   :  { %10070 = vmatprep.subr.bf16.mxu1 %v11401_v11  ;;  %10100 = vmatprep.subr.bf16.mxu0 %v12949_v8 }
0x22ac   :  { %5941 = vmatprep.mubr.f32.mxu1 %v12944_v35  ;;  %8834 = vmatprep.mubr.msk.f32.mxu0 %vm10903_vm0, %v12944_v35 }
0x22ae   :  { %10072 = vmatpush1.bf16.msra.mxu1 %v11409_v36  ;;  %10102 = vmatpush3.bf16.msra.mxu0 %v11411_v37 }
0x22af   :  { %10074 = vmatprep.subr.bf16.mxu1 %v11415_v42  ;;  %10103 = vmatprep.subr.bf16.mxu0 %v12949_v8 }
0x22b2   :  { %10076 = vmatpush1.bf16.msra.mxu1 %v11422_v52  ;;  %10105 = vmatpush3.bf16.msra.mxu0 %v11424_v54 }
0x22b3   :  { %10078 = vmatprep.subr.bf16.mxu1 %v11428_v57  ;;  %10106 = vmatprep.subr.bf16.mxu0 %v12949_v8 }
0x22b6   :  { %10080 = vmatpush1.bf16.msra.mxu1 %v11432_v3  ;;  %10108 = vmatpush3.bf16.msra.mxu0 %v11434_v7 }
0x22b7   :  { %10082 = vmatprep.subr.bf16.mxu1 %v11438_v14  ;;  %10109 = vmatprep.subr.bf16.mxu0 %v12949_v8 }
0x22ba   :  { %10084 = vmatpush1.bf16.msra.mxu1 %v11442_v34  ;;  %10111 = vmatpush3.bf16.msra.mxu0 %v11444_v41 }
0x22bb   :  { %10086 = vmatprep.subr.bf16.mxu1 %v11448_v45  ;;  %10112 = vmatprep.subr.bf16.mxu0 %v12949_v8 }
0x22be   :  { %10088 = vmatpush1.bf16.msra.mxu1 %v11452_v60  ;;  %10114 = vmatpush3.bf16.msra.mxu0 %v11454_v61 }
0x22bf   :  { %10090 = vmatprep.subr.bf16.mxu1 %v11458_v63  ;;  %10115 = vmatprep.subr.bf16.mxu0 %v12949_v8 }
0x22c2   :  { %10092 = vmatpush1.bf16.msra.mxu1 %v12954_v2  ;;  %10117 = vmatpush3.bf16.msra.mxu0 %v12955_v16 }
0x22c3   :  { %10094 = vmatprep.subr.bf16.mxu1 %v12956_v19  ;;  %10118 = vmatprep.subr.bf16.mxu0 %v12949_v8 }
0x22c6   :  { %10096 = vmatpush1.bf16.msra.mxu1 %v12957_v22  ;;  %10120 = vmatpush3.bf16.msra.mxu0 %v12987_v26 }
0x22c7   :  { %10121 = vmatprep.subr.bf16.mxu1 %v12949_v8  ;;  %10133 = vmatprep.subr.bf16.mxu0 %v12949_v8 }
0x22c9   :  { %5942 = vmatmul.mubr.f32.vlgmr.msra.gmra.mrb[56].mxu1 %v12352_v47  ;;  %8835 = vmatmul.mubr.f32.vlgmr.msra.gmra.mrb[66].mxu0 %v12352_v47  ;;  %v13120_v47 = vld [vmem:[#allocation57_spill] sm:$0xff] }
0x22ca   :  { %10123 = vmatpush3.bf16.msra.mxu1 %v12988_v20  ;;  %8853 = vmatprep.mubr.msk.f32.mxu1 %vm10903_vm0, %v12944_v35 }
0x22cb   :  { %10124 = vmatprep.subr.bf16.mxu1 %v12949_v8  ;;  %10135 = vmatpush3.bf16.msra.mxu0 %v12989_v4 }
0x22cc   :  { %10136 = vmatprep.subr.bf16.mxu0 %v12949_v8  ;;  %8888 = vmatprep.mubr.msk.f32.mxu0 %vm10903_vm0, %v12944_v35 }
0x22ce   :  { %10126 = vmatpush3.bf16.msra.mxu1 %v12990_v58 }
0x22cf   :  { %10127 = vmatprep.subr.bf16.mxu1 %v12949_v8  ;;  %10138 = vmatpush3.bf16.msra.mxu0 %v13119_v51 }
0x22d0   :  { %10139 = vmatprep.subr.bf16.mxu0 %v12949_v8 }
0x22d2   :  { %10129 = vmatpush3.bf16.msra.mxu1 %v13120_v47 }
0x22d3   :  { %10130 = vmatprep.subr.bf16.mxu1 %v12949_v8  ;;  %10141 = vmatpush3.bf16.msra.mxu0 %v13121_v39 }
0x22d4   :  { %10142 = vmatprep.subr.bf16.mxu0 %v12949_v8 }
0x22d6   :  { %10132 = vmatpush3.bf16.msra.mxu1 %v13122_v59 }
0x22d7   :  { %10144 = vmatpush3.bf16.msra.mxu0 %v13123_v28  ;;  %10158 = vmatprep.subr.bf16.mxu1 %v13124_v23 }
0x22d8   :  { %10145 = vmatprep.subr.bf16.mxu0 %v12949_v8 }
0x22d9   :  { %8854 = vmatmul.mubr.msk.f32.vlgmr.msra.gmra.mrb[58].mxu1 %vm255_vm2, %v5720_v62 }
0x22da   :  { %10160 = vmatpush1.bf16.msra.mxu1 %v13125_v10  ;;  %6274 = vmatprep.mubr.f32.mxu1 %v12944_v35  ;;  %v13134_v10 = vld [vmem:[#allocation69_spill] sm:$0xff] }
0x22db   :  { %10147 = vmatpush3.bf16.msra.mxu0 %v13126_v50  ;;  %10162 = vmatprep.subr.bf16.mxu1 %v13127_v53 }
0x22dc   :  { %10148 = vmatprep.subr.bf16.mxu0 %v12949_v8 }
0x22de   :  { %10164 = vmatpush1.bf16.msra.mxu1 %v13128_v32 }
0x22df   :  { %10150 = vmatpush3.bf16.msra.mxu0 %v13129_v24  ;;  %10165 = vmatprep.subr.bf16.mxu1 %v12949_v8  ;;  %v13133_v24 = vld [vmem:[#allocation67_spill] sm:$0xff] }
0x22e0   :  { %10151 = vmatprep.subr.bf16.mxu0 %v12949_v8 }
0x22e3   :  { %10153 = vmatpush3.bf16.msra.mxu0 %v13130_v27 }
0x22e4   :  { %10154 = vmatprep.subr.bf16.mxu0 %v12949_v8 }
0x22e7   :  { %10156 = vmatpush3.bf16.msra.mxu0 %v13131_v21 }
0x22e8   :  { %10190 = vmatprep.subr.bf16.mxu0 %v13132_v55 }
0x237c   :  { %v5790_v9 = vpop.f32.mrb[54].mxu1  ;;  %v5861_v25 = vpop.f32.mrb[64].mxu0 }
0x237d   :  { %v5792_v6 = vpop.f32.mrb[55].mxu1  ;;  %v8801_v1 = vpop.f32.mrb[65].mxu0  ;;  %v5868_v5 = vrot.slane %v5790_v9, 2 }
0x237e   :  { %v5869_v56 = vrot.slane %v5792_v6, 2 }
0x237f   :  { %v5874_v23 = vadd.f32 %v5868_v5, %v12973_v31 }
0x2380   :  { %v5875_v21 = vadd.f32 %v5869_v56, %v11553_v30 }
0x239c   :  { %v5943_v46 = vpop.f32.mrb[56].mxu1  ;;  %v6014_v62 = vpop.f32.mrb[66].mxu0 }
0x239d   :  { %v5944_v32 = vadd.f32 %v5943_v46, %v13133_v24  ;;  %v5945_v53 = vpop.f32.mrb[57].mxu1  ;;  %v8836_v50 = vpop.f32.mrb[67].mxu0 }
0x239e   :  { %v5946_v27 = vadd.f32 %v5945_v53, %v13134_v10 }
0x239f   :  { %v6019_v28 = vrot.slane %v5944_v32, 2  ;;  %v6015_v32 = vadd.f32 %v6014_v62, %v11562_v0 }
0x23a0   :  { %v6029_v55 = vrot.slane %v5946_v27, 2  ;;  %v5870_v27 = vrot.slane %v5861_v25, 2 }
0x23a1   :  { %v6021_v59 = vadd.f32 %v6019_v28, %v5874_v23  ;;  %v6039_v28 = vrot.slane %v6015_v32, 2  ;;  %v13141_v32 = vld [vmem:[#allocation41_spill] sm:$0xff] }
0x23a2   :  { %v6031_v39 = vadd.f32 %v6029_v55, %v5875_v21 }
0x23a3   :  { %v7185_v47 = vmul.f32 -1.442695, %v6021_v59  ;;  %v5876_v59 = vadd.f32 %v5870_v27, %v11565_v48  ;;  %v13142_v27 = vld [vmem:[#allocation42_spill] sm:$0xff] }
0x23a4   :  { %v7186_v1 = vmul.f32 -1.442695, %v6031_v39  ;;  %v6046_v39 = vrot.slane %v12348_v43, 7 }
0x23a5   :  { %10460 = vpow2.f32 %v7185_v47 }
0x23a6   :  { %10462 = vpow2.f32 %v7186_v1 }
0x23ac   :  { %v6116_v9 = vpop.f32.mrb[58].mxu1 }
0x23ad   :  { %v6121_v6 = vrot.slane %v6116_v9, 2  ;;  %v8855_v51 = vpop.f32.mrb[59].mxu1 }
0x23af   :  { %v10461_v46 = vpop.eup %10460  ;;  %v6123_v50 = vadd.f32 %v6121_v6, %v11320_v12 }
0x23b0   :  { %v10463_v24 = vpop.eup %10462  ;;  %v6025_v53 = vadd.f32 1.0, %v10461_v46 }
0x23b1   :  { %v6035_v10 = vadd.f32 1.0, %v10463_v24 }
0x23b2   :  { %10464 = vrcp.f32 %v6025_v53  ;;  %v13140_v53 = vld [vmem:[#allocation40_spill] sm:$0xff] }
0x23b3   :  { %10466 = vrcp.f32 %v6035_v10 }
0x23bc   :  { %v10465_v23 = vpop.eup %10464 }
0x23bd   :  { %v10467_v47 = vpop.eup %10466  ;;  %v6041_v21 = vmul.f32 %v10465_v23, %v6039_v28 }
0x23be   :  { %v6048_v51 = vmul.f32 %v10467_v47, %v6046_v39  ;;  %v6044_v56 = vsub.f32 1.0, %v10467_v47 }
0x23bf   :  { %v6042_v5 = vadd.f32 %v6041_v21, %v5876_v59 }
0x23c1   :  { %10468 = vtanh.f32 %v6042_v5 }
0x23cb   :  { %v10469_v55 = vpop.eup %10468 }
0x23cc   :  { %v6045_v1 = vmul.f32 %v10469_v55, %v6044_v56 }
0x23ce   :  { %v12500_v24 = vadd.f32 %v6048_v51, %v6045_v1  ;;  %v13143_v51 = vld [vmem:[#allocation44_spill] sm:$0xff]  ;;  %v13144_v1 = vld [vmem:[#allocation46_spill] sm:$0xff] }
0x23d0   :  { %v6321_v10 = vrot.slane %v12500_v24, 5  ;;  %v12504_v25 = vrot.slane %v12500_v24, 6 }
0x23d2   :  { %6322 = vrot.lane.b32.xlu1 %v6321_v10, %s10905_s4  ;;  %8889 = vmatmul.mubr.f32.vlgmr.msra.gmra.mrb[68].mxu0 %v12504_v25  ;;  %v13145_v10 = vld [vmem:[#allocation47_spill] sm:$0xff] }
0x23d3   :  { %10192 = vmatpush1.bf16.msra.mxu0 %v11350_v38  ;;  %6572 = vmatprep.mubr.f32.mxu0 %v12944_v35 }
0x23d4   :  { %10194 = vmatprep.subr.bf16.mxu0 %v11360_v13 }
0x23d7   :  { %10196 = vmatpush1.bf16.msra.mxu0 %v11362_v18  ;;  %v13135_v18 = vld [vmem:[#allocation35_spill] sm:$0xff] }
0x23d8   :  { %10198 = vmatprep.subr.bf16.mxu0 %v11369_v29  ;;  %v13136_v29 = vld [vmem:[#allocation36_spill] sm:$0xff] }
0x23db   :  { %10200 = vmatpush1.bf16.msra.mxu0 %v11372_v33  ;;  %v13137_v33 = vld [vmem:[#allocation37_spill] sm:$0xff] }
0x23dc   :  { %10202 = vmatprep.subr.bf16.mxu0 %v11379_v40 }
0x23df   :  { %10204 = vmatpush1.bf16.msra.mxu0 %v11382_v44  ;;  %v13138_v44 = vld [vmem:[#allocation38_spill] sm:$0xff] }
0x23e0   :  { %10218 = vmatprep.subr.bf16.mxu0 %v11389_v49 }
0x2444   :  { %v6323_v40 = vpop.permute.xlu1 %6322 }
0x2445   :  { %v6325_v49 = vsel %vm619_vm4, %v12504_v25, %v6323_v40 }
0x24a5   :  { %v6193_v43 = vpop.f32.mrb[68].mxu0 }
0x24a6   :  { %v6198_v62 = vrot.slane %v6193_v43, 2  ;;  %v8890_v9 = vpop.f32.mrb[69].mxu0  ;;  %v13146_v43 = vld [vmem:[#allocation48_spill] sm:$0xff] }
0x24a8   :  { %v6200_v38 = vadd.f32 %v6198_v62, %v6123_v50  ;;  %v13139_v50 = vld [vmem:[#allocation39_spill] sm:$0xff]  ;;  %v13147_v62 = vld [vmem:[#allocation49_spill] sm:$0xff] }
0x24aa   :  { %6202 = vrot.lane.b32.xlu0 %v6200_v38, %s10907_s11 }
0x251c   :  { %v6203_v6 = vpop.permute.xlu0 %6202 }
0x251d   :  { %v6205_v13 = vmax.f32 %v6200_v38, %v6203_v6 }
0x251f   :  { %v6207_v46 = vrot.slane %v6205_v13, 6 }
0x2521   :  { %7188 = vmatmul.mubr.msk.f32.vlgmr.msra.gmra.mrb[60].mxu1 %vm1500_vm7, %v6207_v46 }
0x2522   :  { %10167 = vmatpush3.bf16.msra.mxu1 %v13135_v18  ;;  %8907 = vmatprep.mubr.msk.f32.mxu1 %vm10903_vm0, %v12944_v35 }
0x2523   :  { %10168 = vmatprep.subr.bf16.mxu1 %v12949_v8 }
0x2526   :  { %10170 = vmatpush3.bf16.msra.mxu1 %v13136_v29 }
0x2527   :  { %10171 = vmatprep.subr.bf16.mxu1 %v12949_v8 }
0x252a   :  { %10173 = vmatpush3.bf16.msra.mxu1 %v13137_v33 }
0x252b   :  { %10174 = vmatprep.subr.bf16.mxu1 %v12949_v8 }
0x252e   :  { %10176 = vmatpush3.bf16.msra.mxu1 %v13138_v44 }
0x252f   :  { %10177 = vmatprep.subr.bf16.mxu1 %v12949_v8 }
0x2531   :  { %8908 = vmatmul.mubr.msk.f32.vlgmr.msra.gmra.mrb[62].mxu1 %vm255_vm2, %v6325_v49 }
0x2532   :  { %10179 = vmatpush3.bf16.msra.mxu1 %v13139_v50  ;;  %8926 = vmatprep.mubr.msk.f32.mxu1 %vm10903_vm0, %v12944_v35 }
0x2533   :  { %10180 = vmatprep.subr.bf16.mxu1 %v12949_v8 }
0x2536   :  { %10182 = vmatpush3.bf16.msra.mxu1 %v13140_v53 }
0x2537   :  { %10183 = vmatprep.subr.bf16.mxu1 %v12949_v8 }
0x253a   :  { %10185 = vmatpush3.bf16.msra.mxu1 %v13141_v32 }
0x253b   :  { %10186 = vmatprep.subr.bf16.mxu1 %v12949_v8 }
0x253e   :  { %10188 = vmatpush3.bf16.msra.mxu1 %v13142_v27 }
0x253f   :  { %10205 = vmatprep.subr.bf16.mxu1 %v12949_v8 }
0x25f4   :  { %v12542_v28 = vpop.f32.mrb[60].mxu1 }
0x25f5   :  { %v12546_v23 = vsel %vm619_vm4, %v12542_v28, -inf  ;;  %v12548_v39 = vpop.f32.mrb[61].mxu1 }
0x25f6   :  { %v12552_v47 = vsel %vm619_vm4, %v12548_v39, -inf }
0x25f7   :  { %v6283_v59 = vmax.f32 %v12546_v23, %v12552_v47  ;;  %v13195_v47 = vld [vmem:[#allocation81_spill] sm:$0xff] }
0x2604   :  { %v6395_v21 = vpop.f32.mrb[62].mxu1 }
0x2605   :  { %v6396_v5 = vadd.f32 %v6395_v21, %v13143_v51  ;;  %v8909_v56 = vpop.f32.mrb[63].mxu1 }
0x2607   :  { %10470 = vtanh.f32 %v6396_v5 }
0x2611   :  { %v10471_v55 = vpop.eup %10470 }
0x2612   :  { %8927 = vmatmul.mubr.msk.f32.vlgmr.msra.gmra.mrb[64].mxu1 %vm255_vm2, %v10471_v55 }
0x2613   :  { %10207 = vmatpush3.bf16.msra.mxu1 %v13144_v1  ;;  %8945 = vmatprep.mubr.msk.f32.mxu1 %vm10903_vm0, %v12944_v35 }
0x2614   :  { %10208 = vmatprep.subr.bf16.mxu1 %v12949_v8 }
0x2617   :  { %10210 = vmatpush3.bf16.msra.mxu1 %v13145_v10 }
0x2618   :  { %10211 = vmatprep.subr.bf16.mxu1 %v12949_v8 }
0x261b   :  { %10213 = vmatpush3.bf16.msra.mxu1 %v13146_v43  ;;  %v13148_v43 = vld [vmem:[#allocation75_spill] sm:$0xff] }
0x261c   :  { %10214 = vmatprep.subr.bf16.mxu1 %v12949_v8 }
0x261f   :  { %10216 = vmatpush3.bf16.msra.mxu1 %v13147_v62  ;;  %v13149_v62 = vld [vmem:[#allocation77_spill] sm:$0xff] }
0x2620   :  { %10249 = vmatprep.subr.bf16.mxu1 %v12949_v8 }
0x26e5   :  { %v6469_v9 = vpop.f32.mrb[64].mxu1 }
0x26e6   :  { %v6473_v38 = vsel %vm994_vm5, %v6469_v9, -inf  ;;  %v8928_v6 = vpop.f32.mrb[65].mxu1 }
0x26e7   :  { %v6474_v13 = vrot.slane %v6473_v38, 4  ;;  %v13152_v6 = vld [vmem:[#allocation53_spill] sm:$0xff] }
0x26e9   :  { %v6475_v46 = vmax.f32 %v6473_v38, %v6474_v13  ;;  %v13150_v38 = vmax.f32 %v13148_v43, %v13149_v62 }
0x26eb   :  { %v6476_v18 = vrot.slane %v6475_v46, 2 }
0x26ed   :  { %v6477_v29 = vmax.f32 %v6475_v46, %v6476_v18 }
0x26ef   :  { %v6478_v33 = vrot.slane %v6477_v29, 1 }
0x26f1   :  { %v6479_v40 = vmax.f32 %v6477_v29, %v6478_v33 }
0x26f3   :  { %v6480_v44 = vsub.f32 %v6469_v9, %v6479_v40  ;;  %v13151_v9 = vld [vmem:[#allocation51_spill] sm:$0xff] }
0x26f4   :  { %v13153_v13 = vmax.f32 %v13151_v9, %v13152_v6  ;;  %v13172_v6 = vlaneseq }
0x26f5   :  { %v6481_v50 = vmul.f32 1.442695, %v6480_v44 }
0x26f6   :  { %vm12668_vm8 = vcmp.lt.s32.totalorder %v13172_v6, 256 }
0x26f7   :  { %10472 = vpow2.f32 %v6481_v50 }
0x2701   :  { %v10473_v53 = vpop.eup %10472 }
0x2702   :  { %v6483_v32 = vsel %vm994_vm5, %v10473_v53, 0.0 }
0x2703   :  { %v6484_v27 = vrot.slane %v6483_v32, 4 }
0x2705   :  { %v6485_v21 = vadd.f32 %v6484_v27, %v6483_v32 }
0x2707   :  { %v6486_v51 = vrot.slane %v6485_v21, 2 }
0x2709   :  { %v6487_v5 = vadd.f32 %v6486_v51, %v6485_v21  ;;  %v10908_v51 = vmov 1966171168  }
0x270b   :  { %v6488_v56 = vrot.slane %v6487_v5, 1 }
0x270d   :  { %v6489_v55 = vadd.f32 %v6488_v56, %v6487_v5  ;;  %v1598_v5 = vunpack.c.l.s4 %v10908_v51 }
0x270f   :  { %10474 = vrcp.f32 %v6489_v55  ;;  %v1599_v56 = vunpack.c.0.s8 %v1598_v5 }
0x2719   :  { %v10475_v1 = vpop.eup %10474 }
0x271a   :  { %v6491_v10 = vmul.f32 %v10475_v1, %v10473_v53  ;;  %v13169_v53 = vld [vmem:[#allocation65_spill] sm:$0xff]  ;;  %v13171_v1 = vld [vmem:[#allocation43_spill] sm:$0xff] }
0x271c   :  { %6494 = vperm.xlu0 %10355, %v6491_v10   ;;  %v12664_v10 = vsub.s32 %v1599_v56, %v13171_v1 }
0x273b   :  { %1578 = vmax.xlane.f32.xlu0 %v13150_v38 }
0x273f   :  { %2365 = vmax.xlane.f32.xlu0 %v13153_v13 }
0x279b   :  { %v6495_v46 = vpop.permute.xlu0 %6494 }
0x279c   :  { %v6497_v18 = vmul.f32 %v6495_v46, %v6325_v49  ;;  %v13168_v49 = vld [vmem:[#allocation64_spill] sm:$0xff] }
0x279e   :  { %v6498_v29 = vsel %vm1020_vm6, %v6497_v18, 0.0 }
0x279f   :  { %v6499_v33 = vrot.slane %v6498_v29, 4 }
0x27a1   :  { %v6500_v40 = vadd.f32 %v6499_v33, %v6498_v29 }
0x27a3   :  { %v6501_v44 = vrot.slane %v6500_v40, 2 }
0x27a5   :  { %v6502_v50 = vadd.f32 %v6501_v44, %v6500_v40 }
0x27a7   :  { %v6503_v32 = vrot.slane %v6502_v50, 1 }
0x27a9   :  { %v12577_v27 = vadd.f32 %v6503_v32, %v6502_v50 }
0x27ab   :  { %7191 = vmatmul.mubr.msk.f32.vlgmr.msra.gmra.mrb[70].mxu0 %vm255_vm2, %v12577_v27  ;;  %8946 = vmatmul.mubr.msk.f32.vlgmr.msra.gmra.mrb[66].mxu1 %vm255_vm2, %v12577_v27 }
0x27ac   :  { %10220 = vmatpush1.bf16.msra.mxu0 %v11395_v15  ;;  %10251 = vmatpush3.bf16.msra.mxu1 %v11397_v17  ;;  %v13154_v17 = vld [vmem:[#allocation74_spill] sm:$0xff] }
0x27ad   :  { %10222 = vmatprep.subr.bf16.mxu0 %v11401_v11  ;;  %10252 = vmatprep.subr.bf16.mxu1 %v12949_v8 }
0x27ae   :  { %6725 = vmatprep.mubr.f32.mxu0 %v12944_v35  ;;  %8980 = vmatprep.mubr.msk.f32.mxu1 %vm10903_vm0, %v12944_v35 }
0x27b0   :  { %10224 = vmatpush1.bf16.msra.mxu0 %v11409_v36  ;;  %10254 = vmatpush3.bf16.msra.mxu1 %v11411_v37  ;;  %v13155_v36 = vld [vmem:[#allocation76_spill] sm:$0xff] }
0x27b1   :  { %10226 = vmatprep.subr.bf16.mxu0 %v11415_v42  ;;  %10255 = vmatprep.subr.bf16.mxu1 %v12949_v8 }
0x27b4   :  { %10228 = vmatpush1.bf16.msra.mxu0 %v11422_v52  ;;  %10257 = vmatpush3.bf16.msra.mxu1 %v11424_v54  ;;  %v13156_v52 = vld [vmem:[#allocation50_spill] sm:$0xff] }
0x27b5   :  { %10230 = vmatprep.subr.bf16.mxu0 %v11428_v57  ;;  %10258 = vmatprep.subr.bf16.mxu1 %v12949_v8  ;;  %v13157_v57 = vld [vmem:[#allocation52_spill] sm:$0xff] }
0x27b8   :  { %10232 = vmatpush1.bf16.msra.mxu0 %v11432_v3  ;;  %10260 = vmatpush3.bf16.msra.mxu1 %v11434_v7 }
0x27b9   :  { %10234 = vmatprep.subr.bf16.mxu0 %v11438_v14  ;;  %10261 = vmatprep.subr.bf16.mxu1 %v12949_v8 }
0x27bc   :  { %10236 = vmatpush1.bf16.msra.mxu0 %v11442_v34  ;;  %10263 = vmatpush3.bf16.msra.mxu1 %v11444_v41  ;;  %v13158_v34 = vld [vmem:[#allocation60_spill] sm:$0xff]  ;;  %v13159_v41 = vld [vmem:[#allocation57_spill] sm:$0xff] }
0x27bd   :  { %10238 = vmatprep.subr.bf16.mxu0 %v11448_v45  ;;  %10264 = vmatprep.subr.bf16.mxu1 %v12949_v8  ;;  %v13160_v45 = vld [vmem:[#allocation61_spill] sm:$0xff] }
0x27c0   :  { %10240 = vmatpush1.bf16.msra.mxu0 %v11452_v60  ;;  %10266 = vmatpush3.bf16.msra.mxu1 %v11454_v61  ;;  %v13161_v60 = vld [vmem:[#allocation58_spill] sm:$0xff] }
0x27c1   :  { %10242 = vmatprep.subr.bf16.mxu0 %v11458_v63  ;;  %10267 = vmatprep.subr.bf16.mxu1 %v12949_v8  ;;  %v13162_v61 = vld [vmem:[#allocation62_spill] sm:$0xff] }
0x27c2   :  { %v13163_v63 = vld [vmem:[#allocation70_spill] sm:$0xff] }
0x27c4   :  { %10244 = vmatpush1.bf16.msra.mxu0 %v12954_v2  ;;  %10269 = vmatpush3.bf16.msra.mxu1 %v12955_v16 }
0x27c5   :  { %10246 = vmatprep.subr.bf16.mxu0 %v12956_v19  ;;  %10270 = vmatprep.subr.bf16.mxu1 %v12949_v8 }
0x27c8   :  { %10248 = vmatpush1.bf16.msra.mxu0 %v12957_v22  ;;  %10272 = vmatpush3.bf16.msra.mxu1 %v12987_v26  ;;  %v12616_v15 = vpop.xlane.xlu0 %1578  ;;  %v13164_v22 = vld [vmem:[#allocation71_spill] sm:$0xff] }
0x27c9   :  { %v1580_v11 = vsub.f32 %v13154_v17, %v12616_v15  ;;  %v1581_v37 = vsub.f32 %v13155_v36, %v12616_v15  ;;  %10273 = vmatprep.subr.bf16.mxu0 %v12949_v8  ;;  %10285 = vmatprep.subr.bf16.mxu1 %v12949_v8  ;;  %v13180_v17 = vld [vmem:[#allocation78_spill] sm:$0xff]  ;;  %v13184_v36 = vld [vmem:[#allocation88_spill] sm:$0xff] }
0x27ca   :  { %v13183_v15 = vld [vmem:[#allocation86_spill] sm:$0xff] }
0x27cb   :  { %6726 = vmatmul.mubr.f32.vlgmr.msra.gmra.mrb[72].mxu0 %v12504_v25  ;;  %8981 = vmatmul.mubr.f32.vlgmr.msra.gmra.mrb[68].mxu1 %v12504_v25  ;;  %v13167_v25 = vld [vmem:[#allocation73_spill] sm:$0xff] }
0x27cc   :  { %10275 = vmatpush3.bf16.msra.mxu0 %v12988_v20  ;;  %v2366_v42 = vpop.xlane.xlu0 %2365  ;;  %8999 = vmatprep.mubr.msk.f32.mxu0 %vm10903_vm0, %v12944_v35  ;;  %v13165_v20 = vld [vmem:[#allocation63_spill] sm:$0xff] }
0x27cd   :  { %v2367_v54 = vsub.f32 %v13156_v52, %v2366_v42  ;;  %v2368_v3 = vsub.f32 %v13157_v57, %v2366_v42  ;;  %10276 = vmatprep.subr.bf16.mxu0 %v12949_v8  ;;  %10287 = vmatpush3.bf16.msra.mxu1 %v12989_v4  ;;  %v13166_v4 = vld [vmem:[#allocation72_spill] sm:$0xff]  ;;  %v13176_v57 = vld [vmem:[#allocation69_spill] sm:$0xff] }
0x27ce   :  { %10288 = vmatprep.subr.bf16.mxu1 %v12949_v8  ;;  %9034 = vmatprep.mubr.msk.f32.mxu1 %vm10903_vm0, %v12944_v35 }
0x27cf   :  { %v2369_v7 = vmul.f32 1.442695, %v2367_v54  ;;  %v2371_v14 = vmul.f32 1.442695, %v2368_v3 }
0x27d0   :  { %10278 = vmatpush3.bf16.msra.mxu0 %v12990_v58 }
0x27d1   :  { %10476 = vpow2.f32 %v2369_v7  ;;  %10279 = vmatprep.subr.bf16.mxu0 %v12949_v8  ;;  %10290 = vmatpush3.bf16.msra.mxu1 %v13158_v34 }
0x27d2   :  { %10478 = vpow2.f32 %v2371_v14  ;;  %10291 = vmatprep.subr.bf16.mxu1 %v12949_v8 }
0x27d4   :  { %10281 = vmatpush3.bf16.msra.mxu0 %v13159_v41 }
0x27d5   :  { %10282 = vmatprep.subr.bf16.mxu0 %v12949_v8  ;;  %10293 = vmatpush3.bf16.msra.mxu1 %v13160_v45 }
0x27d6   :  { %10294 = vmatprep.subr.bf16.mxu1 %v12949_v8 }
0x27d8   :  { %10284 = vmatpush3.bf16.msra.mxu0 %v13161_v60 }
0x27d9   :  { %10296 = vmatpush3.bf16.msra.mxu1 %v13162_v61  ;;  %10310 = vmatprep.subr.bf16.mxu0 %v13163_v63 }
0x27da   :  { %10297 = vmatprep.subr.bf16.mxu1 %v12949_v8 }
0x27db   :  { %v10477_v2 = vpop.eup %10476  ;;  %9000 = vmatmul.mubr.msk.f32.vlgmr.msra.gmra.mrb[74].mxu0 %vm255_vm2, %v12577_v27  ;;  %v13175_v27 = vld [vmem:[#allocation67_spill] sm:$0xff] }
0x27dc   :  { %v10479_v16 = vpop.eup %10478  ;;  %v2373_v19 = vsel %vm619_vm4, %v10477_v2, 0.0  ;;  %10312 = vmatpush1.bf16.msra.mxu0 %v13164_v22  ;;  %7058 = vmatprep.mubr.f32.mxu0 %v12944_v35  ;;  %v13170_v35 = vld [vmem:[#allocation66_spill] sm:$0xff] }
0x27dd   :  { %v2374_v26 = vsel %vm619_vm4, %v10479_v16, 0.0  ;;  %10299 = vmatpush3.bf16.msra.mxu1 %v13165_v20  ;;  %10314 = vmatprep.subr.bf16.mxu0 %v13166_v4 }
0x27de   :  { %v2375_v58 = vadd.f32 %v2374_v26, %v2373_v19  ;;  %10300 = vmatprep.subr.bf16.mxu1 %v12949_v8 }
0x27e0   :  { %2376 = vadd.xlane.f32.xlu0 %v2375_v58  ;;  %10316 = vmatpush1.bf16.msra.mxu0 %v13167_v25 }
0x27e1   :  { %10302 = vmatpush3.bf16.msra.mxu1 %v13168_v49 }
0x27e2   :  { %10303 = vmatprep.subr.bf16.mxu1 %v12949_v8 }
0x27e5   :  { %10305 = vmatpush3.bf16.msra.mxu1 %v13169_v53  ;;  %v6830_v53 = vrot.slane %v12500_v24, 7  ;;  %v1584_v24 = vmul.f32 1.442695, %v1581_v37  ;;  %v13185_v37 = vmax.f32 %v13183_v15, %v13184_v36  ;;  %v13196_v36 = vld [vmem:[#allocation83_spill] sm:$0xff] }
0x27e6   :  { %10306 = vmatprep.subr.bf16.mxu1 %v12949_v8 }
0x27e9   :  { %10308 = vmatpush3.bf16.msra.mxu1 %v13170_v35 }
0x286d   :  { %v2377_v21 = vpop.xlane.xlu0 %2376 }
0x286e   :  { %10480 = vrcp.f32 %v2377_v21 }
0x2878   :  { %v10481_v55 = vpop.eup %10480 }
0x2879   :  { %v2379_v43 = vmul.f32 %v10481_v55, %v10477_v2  ;;  %v2380_v62 = vmul.f32 %v10481_v55, %v10479_v16 }
0x287b   :  { %v2383_v38 = vcombine.low %v2379_v43, %v2380_v62 }
0x287d   :  { %v2390_v9 = vrot.slane %v2383_v38, %v12664_v10 }
0x287e   :  { %v6574_v8 = vpop.f32.mrb[70].mxu0  ;;  %v6645_v46 = vpop.f32.mrb[66].mxu1 }
0x287f   :  { %v2397_v18 = vrot.slane %v2390_v9, %v12664_v10  ;;  %v6576_v29 = vpop.f32.mrb[71].mxu0  ;;  %v8947_v33 = vpop.f32.mrb[67].mxu1  ;;  %v6652_v40 = vrot.slane %v6574_v8, 1 }
0x2880   :  { %v6653_v44 = vrot.slane %v6576_v29, 1 }
0x2881   :  { %2400 = vst.msk [vmem:[#allocation25 + $0x1] ss:$8 sm:$0x3] %vm12668_vm8, %v2397_v18  ;;  %v6658_v7 = vadd.f32 %v6652_v40, %v12973_v31  ;;  %v6654_v31 = vrot.slane %v6645_v46, 1  ;;  %v13177_v40 = vld [vmem:[#allocation54_spill] sm:$0xff] }
0x2882   :  { %v6659_v34 = vadd.f32 %v6653_v44, %v11553_v30  ;;  %v13178_v44 = vld [vmem:[#allocation59_spill] sm:$0xff] }
0x2883   :  { %v6660_v21 = vadd.f32 %v6654_v31, %v11565_v48  ;;  %v1582_v48 = vmul.f32 1.442695, %v1580_v11  ;;  %v13181_v11 = vld [vmem:[#allocation80_spill] sm:$0xff] }
0x289e   :  { %v6727_v50 = vpop.f32.mrb[72].mxu0  ;;  %v6798_v32 = vpop.f32.mrb[68].mxu1 }
0x289f   :  { %v6728_v42 = vadd.f32 %v6727_v50, %v13175_v27  ;;  %v6729_v52 = vpop.f32.mrb[73].mxu0  ;;  %v8982_v54 = vpop.f32.mrb[69].mxu1  ;;  %v6799_v30 = vadd.f32 %v6798_v32, %v11562_v0  ;;  %v13179_v50 = vmax.f32 %v13177_v40, %v13178_v44  ;;  %v13182_v32 = vmax.f32 %v13180_v17, %v13181_v11 }
0x28a0   :  { %v6730_v3 = vadd.f32 %v6729_v52, %v13176_v57 }
0x28a1   :  { %v6803_v14 = vrot.slane %v6728_v42, 1  ;;  %v6823_v25 = vrot.slane %v6799_v30, 1 }
0x28a2   :  { %v6813_v41 = vrot.slane %v6730_v3, 1  ;;  %v13186_v3 = vld [vmem:[#allocation68_spill] sm:$0xff] }
0x28a3   :  { %v6805_v45 = vadd.f32 %v6803_v14, %v6658_v7  ;;  %v13187_v14 = vld [vmem:[#allocation55_spill] sm:$0xff] }
0x28a4   :  { %v6815_v60 = vadd.f32 %v6813_v41, %v6659_v34 }
0x28a5   :  { %v7193_v61 = vmul.f32 -1.442695, %v6805_v45 }
0x28a6   :  { %v7194_v63 = vmul.f32 -1.442695, %v6815_v60 }
0x28a7   :  { %10482 = vpow2.f32 %v7193_v61  ;;  %v13188_v61 = vld [vmem:[#allocation56_spill] sm:$0xff] }
0x28a8   :  { %10484 = vpow2.f32 %v7194_v63 }
0x28ae   :  { %v6900_v2 = vpop.f32.mrb[74].mxu0 }
0x28af   :  { %v6905_v16 = vrot.slane %v6900_v2, 1  ;;  %v9001_v19 = vpop.f32.mrb[75].mxu0  ;;  %v13189_v2 = vld [vmem:[#allocation79_spill] sm:$0xff] }
0x28b1   :  { %v10483_v22 = vpop.eup %10482  ;;  %v6907_v26 = vadd.f32 %v6905_v16, %v11320_v12 }
0x28b2   :  { %v10485_v20 = vpop.eup %10484  ;;  %v6809_v4 = vadd.f32 1.0, %v10483_v22 }
0x28b3   :  { %v6819_v58 = vadd.f32 1.0, %v10485_v20 }
0x28b4   :  { %10486 = vrcp.f32 %v6809_v4 }
0x28b5   :  { %10488 = vrcp.f32 %v6819_v58  ;;  %v13190_v58 = vld [vmem:[#allocation85_spill] sm:$0xff] }
0x28be   :  { %v10487_v49 = vpop.eup %10486 }
0x28bf   :  { %v10489_v35 = vpop.eup %10488  ;;  %v6825_v51 = vmul.f32 %v10487_v49, %v6823_v25  ;;  %v13191_v49 = vld [vmem:[#allocation87_spill] sm:$0xff] }
0x28c0   :  { %v6832_v5 = vmul.f32 %v10489_v35, %v6830_v53  ;;  %v6828_v12 = vsub.f32 1.0, %v10489_v35 }
0x28c1   :  { %v6826_v56 = vadd.f32 %v6825_v51, %v6660_v21 }
0x28c3   :  { %10490 = vtanh.f32 %v6826_v56 }
0x28c4   :  { %10492 = vpow2.f32 %v1582_v48 }
0x28c5   :  { %10494 = vpow2.f32 %v1584_v24 }
0x28cd   :  { %v10491_v55 = vpop.eup %10490 }
0x28ce   :  { %v6829_v1 = vmul.f32 %v10491_v55, %v6828_v12  ;;  %v10493_v8 = vpop.eup %10492 }
0x28cf   :  { %v10495_v46 = vpop.eup %10494  ;;  %v1586_v18 = vsel %vm619_vm4, %v10493_v8, 0.0 }
0x28d0   :  { %v6833_v43 = vadd.f32 %v6832_v5, %v6829_v1  ;;  %v1587_v29 = vsel %vm619_vm4, %v10495_v46, 0.0 }
0x28d1   :  { %v1588_v33 = vadd.f32 %v1587_v29, %v1586_v18 }
0x28d2   :  { %v6909_v62 = vrot.slane %v6833_v43, 7 }
0x28d4   :  { %9035 = vmatmul.mubr.f32.vlgmr.msra.gmra.mrb[70].mxu1 %v6909_v62 }
0x29a7   :  { %v6977_v38 = vpop.f32.mrb[70].mxu1 }
0x29a8   :  { %v6982_v0 = vrot.slane %v6977_v38, 1  ;;  %v9036_v9 = vpop.f32.mrb[71].mxu1 }
0x29a9   :  { %v13193_v9 = vld [vmem:[#allocation84_spill] sm:$0xff] }
0x29aa   :  { %v6984_v6 = vadd.f32 %v6982_v0, %v6907_v26  ;;  %v13192_v0 = vld [vmem:[#allocation82_spill] sm:$0xff] }
0x29ac   :  { %6986 = vrot.lane.b32.xlu1 %v6984_v6, %s10907_s11 }
0x29d0   :  { %1589 = vadd.xlane.f32.xlu1 %v1588_v33 }
0x29d4   :  { %3148 = vmax.xlane.f32.xlu1 %v13179_v50 }
0x29d8   :  { %3932 = vmax.xlane.f32.xlu1 %v13182_v32 }
0x29dc   :  { %5500 = vmax.xlane.f32.xlu1 %v13185_v37 }
0x2a1e   :  { %v6987_v27 = vpop.permute.xlu1 %6986 }
0x2a1f   :  { %v6989_v42 = vmax.f32 %v6984_v6, %v6987_v27  ;;  %v13194_v6 = vmax.f32 %v13192_v0, %v13193_v9 }
0x2a21   :  { %v6991_v52 = vrot.slane %v6989_v42, 7 }
0x2a23   :  { %7196 = vmatmul.mubr.msk.f32.vlgmr.msra.gmra.mrb[76].mxu0 %vm1500_vm7, %v6991_v52 }
0x2a5d   :  { %v1590_v54 = vpop.xlane.xlu1 %1589 }
0x2a5e   :  { %10496 = vrcp.f32 %v1590_v54 }
0x2a61   :  { %v3149_v57 = vpop.xlane.xlu1 %3148 }
0x2a62   :  { %v3150_v7 = vsub.f32 %v13186_v3, %v3149_v57  ;;  %v3151_v34 = vsub.f32 %v13187_v14, %v3149_v57 }
0x2a64   :  { %v3152_v41 = vmul.f32 1.442695, %v3150_v7  ;;  %v3154_v45 = vmul.f32 1.442695, %v3151_v34 }
0x2a65   :  { %v3933_v60 = vpop.xlane.xlu1 %3932 }
0x2a66   :  { %10498 = vpow2.f32 %v3152_v41  ;;  %v3934_v63 = vsub.f32 %v13188_v61, %v3933_v60  ;;  %v3935_v16 = vsub.f32 %v13189_v2, %v3933_v60 }
0x2a67   :  { %10500 = vpow2.f32 %v3154_v45 }
0x2a68   :  { %v10497_v19 = vpop.eup %10496  ;;  %v3936_v4 = vmul.f32 1.442695, %v3934_v63  ;;  %v3938_v25 = vmul.f32 1.442695, %v3935_v16 }
0x2a69   :  { %v1592_v22 = vmul.f32 %v10497_v19, %v10493_v8  ;;  %v1593_v26 = vmul.f32 %v10497_v19, %v10495_v46  ;;  %v5501_v20 = vpop.xlane.xlu1 %5500 }
0x2a6a   :  { %v5502_v30 = vsub.f32 %v13190_v58, %v5501_v20  ;;  %v5503_v53 = vsub.f32 %v13191_v49, %v5501_v20  ;;  %10502 = vpow2.f32 %v3936_v4 }
0x2a6b   :  { %v1596_v31 = vcombine.low %v1592_v22, %v1593_v26  ;;  %10504 = vpow2.f32 %v3938_v25 }
0x2a6c   :  { %v5504_v21 = vmul.f32 1.442695, %v5502_v30  ;;  %v5506_v5 = vmul.f32 1.442695, %v5503_v53 }
0x2a6d   :  { %v1603_v35 = vrot.slane %v1596_v31, %v12664_v10 }
0x2a6e   :  { %10506 = vpow2.f32 %v5504_v21 }
0x2a6f   :  { %v1610_v51 = vrot.slane %v1603_v35, %v12664_v10  ;;  %10508 = vpow2.f32 %v5506_v5 }
0x2a70   :  { %v10499_v56 = vpop.eup %10498 }
0x2a71   :  { %v10501_v12 = vpop.eup %10500  ;;  %1616 = vst.msk [vmem:[#allocation25] ss:$8 sm:$0x3] %vm12668_vm8, %v1610_v51  ;;  %v3156_v55 = vsel %vm619_vm4, %v10499_v56, 0.0 }
0x2a72   :  { %v3157_v1 = vsel %vm619_vm4, %v10501_v12, 0.0 }
0x2a73   :  { %v3158_v43 = vadd.f32 %v3157_v1, %v3156_v55 }
0x2a74   :  { %v10503_v62 = vpop.eup %10502 }
0x2a75   :  { %3159 = vadd.xlane.f32.xlu0 %v3158_v43  ;;  %v10505_v38 = vpop.eup %10504  ;;  %v3940_v24 = vsel %vm619_vm4, %v10503_v62, 0.0 }
0x2a76   :  { %v3941_v8 = vsel %vm619_vm4, %v10505_v38, 0.0 }
0x2a77   :  { %v3942_v18 = vadd.f32 %v3941_v8, %v3940_v24 }
0x2a78   :  { %v10507_v48 = vpop.eup %10506 }
0x2a79   :  { %4716 = vmax.xlane.f32.xlu0 %v13194_v6  ;;  %v10509_v46 = vpop.eup %10508  ;;  %v5508_v29 = vsel %vm619_vm4, %v10507_v48, 0.0 }
0x2a7a   :  { %v5509_v33 = vsel %vm619_vm4, %v10509_v46, 0.0 }
0x2a7b   :  { %v5510_v40 = vadd.f32 %v5509_v33, %v5508_v29 }
0x2a7d   :  { %6284 = vmax.xlane.f32.xlu0 %v6283_v59 }
0x2a81   :  { %3943 = vadd.xlane.f32.xlu0 %v3942_v18 }
0x2a85   :  { %5511 = vadd.xlane.f32.xlu0 %v5510_v40 }
0x2af6   :  { %v7060_v44 = vpop.f32.mrb[76].mxu0 }
0x2af7   :  { %v7065_v50 = vsel %vm619_vm4, %v7060_v44, -inf  ;;  %v7062_v17 = vpop.f32.mrb[77].mxu0 }
0x2af8   :  { %v7066_v11 = vsel %vm619_vm4, %v7062_v17, -inf }
0x2af9   :  { %v7067_v32 = vmax.f32 %v7065_v50, %v7066_v11 }
0x2afb   :  { %7068 = vmax.xlane.f32.xlu1 %v7067_v32 }
0x2b02   :  { %v3160_v15 = vpop.xlane.xlu0 %3159 }
0x2b03   :  { %10510 = vrcp.f32 %v3160_v15 }
0x2b06   :  { %v4717_v23 = vpop.xlane.xlu0 %4716 }
0x2b07   :  { %v4718_v59 = vsub.f32 %v13195_v47, %v4717_v23  ;;  %v4719_v37 = vsub.f32 %v13196_v36, %v4717_v23 }
0x2b09   :  { %v4720_v27 = vmul.f32 1.442695, %v4718_v59  ;;  %v4722_v42 = vmul.f32 1.442695, %v4719_v37 }
0x2b0a   :  { %v6285_v52 = vpop.xlane.xlu0 %6284 }
0x2b0b   :  { %10512 = vpow2.f32 %v4720_v27  ;;  %v6286_v54 = vsub.f32 %v12542_v28, %v6285_v52  ;;  %v6287_v57 = vsub.f32 %v12548_v39, %v6285_v52 }
0x2b0c   :  { %10514 = vpow2.f32 %v4722_v42 }
0x2b0d   :  { %v10511_v3 = vpop.eup %10510  ;;  %v6288_v7 = vmul.f32 1.442695, %v6286_v54  ;;  %v6290_v14 = vmul.f32 1.442695, %v6287_v57 }
0x2b0e   :  { %v3162_v34 = vmul.f32 %v10511_v3, %v10499_v56  ;;  %v3163_v41 = vmul.f32 %v10511_v3, %v10501_v12  ;;  %v3944_v45 = vpop.xlane.xlu0 %3943 }
0x2b0f   :  { %10516 = vpow2.f32 %v6288_v7 }
0x2b10   :  { %v3166_v60 = vcombine.low %v3162_v34, %v3163_v41  ;;  %10518 = vpow2.f32 %v6290_v14 }
0x2b11   :  { %10520 = vrcp.f32 %v3944_v45 }
0x2b12   :  { %v3173_v61 = vrot.slane %v3166_v60, %v12664_v10  ;;  %v5512_v63 = vpop.xlane.xlu0 %5511 }
0x2b13   :  { %10522 = vrcp.f32 %v5512_v63 }
0x2b14   :  { %v3180_v2 = vrot.slane %v3173_v61, %v12664_v10 }
0x2b15   :  { %v10513_v28 = vpop.eup %10512 }
0x2b16   :  { %v10515_v16 = vpop.eup %10514  ;;  %3183 = vst.msk [vmem:[#allocation25 + $0x2] ss:$8 sm:$0x3] %vm12668_vm8, %v3180_v2  ;;  %v4724_v39 = vsel %vm619_vm4, %v10513_v28, 0.0 }
0x2b17   :  { %v4725_v19 = vsel %vm619_vm4, %v10515_v16, 0.0 }
0x2b18   :  { %v4726_v22 = vadd.f32 %v4725_v19, %v4724_v39 }
0x2b19   :  { %v10517_v26 = vpop.eup %10516 }
0x2b1a   :  { %v10519_v20 = vpop.eup %10518  ;;  %4727 = vadd.xlane.f32.xlu1 %v4726_v22  ;;  %v6292_v4 = vsel %vm619_vm4, %v10517_v26, 0.0 }
0x2b1b   :  { %v10521_v58 = vpop.eup %10520  ;;  %v6293_v30 = vsel %vm619_vm4, %v10519_v20, 0.0 }
0x2b1c   :  { %v3946_v31 = vmul.f32 %v10521_v58, %v10503_v62  ;;  %v3947_v25 = vmul.f32 %v10521_v58, %v10505_v38  ;;  %v6294_v49 = vadd.f32 %v6293_v30, %v6292_v4 }
0x2b1d   :  { %v10523_v53 = vpop.eup %10522 }
0x2b1e   :  { %v3950_v35 = vcombine.low %v3946_v31, %v3947_v25  ;;  %v5514_v21 = vmul.f32 %v10523_v53, %v10507_v48  ;;  %v5515_v51 = vmul.f32 %v10523_v53, %v10509_v46  ;;  %6295 = vadd.xlane.f32.xlu1 %v6294_v49 }
0x2b20   :  { %v3957_v5 = vrot.slane %v3950_v35, %v12664_v10  ;;  %v5518_v56 = vcombine.low %v5514_v21, %v5515_v51 }
0x2b22   :  { %v3964_v12 = vrot.slane %v3957_v5, %v12664_v10  ;;  %v5525_v55 = vrot.slane %v5518_v56, %v12664_v10 }
0x2b24   :  { %3967 = vst.msk [vmem:[#allocation25 + $0x3] ss:$8 sm:$0x3] %vm12668_vm8, %v3964_v12  ;;  %v5532_v1 = vrot.slane %v5525_v55, %v12664_v10 }
0x2b26   :  { %5535 = vst.msk [vmem:[#allocation25 + $0x5] ss:$8 sm:$0x3] %vm12668_vm8, %v5532_v1 }
0x2b88   :  { %v7069_v43 = vpop.xlane.xlu1 %7068 }
0x2b89   :  { %v7070_v62 = vsub.f32 %v7060_v44, %v7069_v43  ;;  %v7071_v38 = vsub.f32 %v7062_v17, %v7069_v43 }
0x2b8b   :  { %v7072_v0 = vmul.f32 1.442695, %v7070_v62  ;;  %v7074_v9 = vmul.f32 1.442695, %v7071_v38 }
0x2b8d   :  { %10524 = vpow2.f32 %v7072_v0 }
0x2b8e   :  { %10526 = vpow2.f32 %v7074_v9 }
0x2b97   :  { %v10525_v6 = vpop.eup %10524 }
0x2b98   :  { %v10527_v48 = vpop.eup %10526  ;;  %v7076_v24 = vsel %vm619_vm4, %v10525_v6, 0.0 }
0x2b99   :  { %v7077_v8 = vsel %vm619_vm4, %v10527_v48, 0.0 }
0x2b9a   :  { %v7078_v46 = vadd.f32 %v7077_v8, %v7076_v24 }
0x2b9c   :  { %7079 = vadd.xlane.f32.xlu0 %v7078_v46 }
0x2ba7   :  { %v4728_v18 = vpop.xlane.xlu1 %4727 }
0x2ba8   :  { %10528 = vrcp.f32 %v4728_v18 }
0x2bab   :  { %v6296_v29 = vpop.xlane.xlu1 %6295 }
0x2bac   :  { %10530 = vrcp.f32 %v6296_v29 }
0x2bb2   :  { %v10529_v33 = vpop.eup %10528 }
0x2bb3   :  { %v4730_v40 = vmul.f32 %v10529_v33, %v10513_v28  ;;  %v4731_v44 = vmul.f32 %v10529_v33, %v10515_v16 }
0x2bb5   :  { %v4734_v50 = vcombine.low %v4730_v40, %v4731_v44 }
0x2bb6   :  { %v10531_v17 = vpop.eup %10530 }
0x2bb7   :  { %v4741_v11 = vrot.slane %v4734_v50, %v12664_v10  ;;  %v6298_v32 = vmul.f32 %v10531_v17, %v10517_v26  ;;  %v6299_v15 = vmul.f32 %v10531_v17, %v10519_v20 }
0x2bb9   :  { %v4748_v23 = vrot.slane %v4741_v11, %v12664_v10  ;;  %v6302_v47 = vcombine.low %v6298_v32, %v6299_v15 }
0x2bbb   :  { %4751 = vst.msk [vmem:[#allocation25 + $0x4] ss:$8 sm:$0x3] %vm12668_vm8, %v4748_v23  ;;  %v6309_v59 = vrot.slane %v6302_v47, %v12664_v10 }
0x2bbd   :  { %v6316_v36 = vrot.slane %v6309_v59, %v12664_v10 }
0x2bbf   :  { %6319 = vst.msk [vmem:[#allocation25 + $0x6] ss:$8 sm:$0x3] %vm12668_vm8, %v6316_v36 }
0x2c29   :  { %v7080_v37 = vpop.xlane.xlu0 %7079 }
0x2c2a   :  { %10532 = vrcp.f32 %v7080_v37 }
0x2c34   :  { %v10533_v27 = vpop.eup %10532 }
0x2c35   :  { %v7082_v42 = vmul.f32 %v10533_v27, %v10525_v6  ;;  %v7083_v52 = vmul.f32 %v10533_v27, %v10527_v48 }
0x2c37   :  { %v7086_v54 = vcombine.low %v7082_v42, %v7083_v52 }
0x2c39   :  { %v7093_v57 = vrot.slane %v7086_v54, %v12664_v10 }
0x2c3b   :  { %v7100_v3 = vrot.slane %v7093_v57, %v12664_v10 }
0x2c3d   :  { %7103 = vst.msk [vmem:[#allocation25 + $0x7] ss:$8 sm:$0x3] %vm12668_vm8, %v7100_v3 }
0x2c3e   :  { %10853 = shalt.err (!%p10850_p4)
}
0x2c3f   :  { %s13197_s27 = sld [smem:[#allocation92_spill]] }
0x2c45   :  { %s10854_s7 = scalar_lea.hbm %s13197_s27, 256 }
0x2c46   :  { %p10855_p5 = scmp.ne.s32.totalorder %s13197_s27, %s10854_s7  ;;  %p10858_p6 = scmp.lt.u32.totalorder %s10854_s7, %s13197_s27 }
0x2c48   :  { %p10860_p7 = pnand %p10858_p6, %p10855_p5 }
0x2c4a   :  { %10863 = shalt.err (!%p10860_p7)
}
0x2c4b   :  { %7114 = dma.vmem_to_hbm [thread:$0]  %s7112_s2, 256, %s13197_s27, [#allocation4]  }
0x2c4c   :  { %10880 = dma.done.wait [#allocation4], 256  }
0x2c4d   :  { %10881 = vsyncadd [#allocation4], 4294967040 }
0x2c4e   :  { %7118 = vsyncpa [#allocation3], 1 }
0x2c4f   :  { %7119 = vsyncpa [#allocation6], 1 }
0x2c50   :  { %7120 = vsyncpa [#allocation9], 1 }
0x2c51   :  { %7121 = vsyncpa [#allocation12], 1 }
0x2c52   :  { %7122 = vsyncpa [#allocation15], 1 }
0x2c53   :  { %7123 = vsyncpa [#allocation18], 1 }
0x2c54   :  { %7124 = vsyncpa [#allocation21], 1 }
0x2c55   :  { %7125 = vsyncpa [#allocation24], 1 }
0x2c56   :  { %7126 = vsyncpa [#allocation4], 1 }

</bundles_post_ra>
